<compile_context>
chip_gen: v7x
topology: tpu7x:2x2x1
jax: 0.10.0
libtpu: 0.0.40
codegen_flags: <defaults>
</compile_context>

<pallas_src>
import functools
import math

import jax
import jax.numpy as jnp
from jax import lax
from jax.experimental import pallas as pl
from jax.experimental.pallas import tpu as pltpu


# ----------------------------- fused Pallas kernel -------------------------- #

def _fused_forward_kernel(*refs, num_layers, num_heads, tb, batch, embed_dim, eps):
    """Whole GeneralTransformer forward; every operand lives in VMEM.

    Row layout of the activation slab: r = t*B + b (t-major, b-minor), T = S+1.
    Rows 0..B-1 are the regression-token slots.
    """
    E = embed_dim
    H = num_heads
    Dh = E // H
    scale = 1.0 / math.sqrt(Dh)

    out_ref = refs[-1]
    (x_ref, reg_mask_ref, attn_bias_ref,
     embed_w_ref, embed_b_ref, reg_tok_ref) = refs[:6]
    layer_refs = refs[6:6 + 12 * num_layers]
    norm_w_ref, norm_b_ref, head_w_ref, head_b_ref = refs[6 + 12 * num_layers:-1]

    def matmul(a, b):
        return jnp.dot(a, b, preferred_element_type=jnp.float32)

    def layernorm(y, w_ref, b_ref):
        mu = jnp.mean(y, axis=-1, keepdims=True)
        var = jnp.mean(jnp.square(y - mu), axis=-1, keepdims=True)
        return (y - mu) * lax.rsqrt(var + eps) * w_ref[...] + b_ref[...]

    # ---- embedding + regression-token insertion -----------------------------
    xe = matmul(x_ref[...], embed_w_ref[...]) + embed_b_ref[...]          # (TB, E)
    reg_mask = reg_mask_ref[...]                                          # (TB, 1)
    y = reg_mask * jnp.broadcast_to(reg_tok_ref[...], (tb, E)) \
        + (1.0 - reg_mask) * xe                                           # (TB, E)

    attn_bias = attn_bias_ref[...]                                        # (TB, TB)

    # ---- encoder layers (post-norm, relu, dropout=0) -------------------------
    for l in range(num_layers):
        (in_w, in_b, out_w, out_b, ln1_w, ln1_b,
         ff1_w, ff1_b, ff2_w, ff2_b, ln2_w, ln2_b) = layer_refs[12 * l:12 * (l + 1)]

        qkv = matmul(y, in_w[...]) + in_b[...]                            # (TB, 3E)

        attn = jnp.zeros((tb, E), jnp.float32)
        for h in range(H):                                                # static unroll
            q = qkv[:, h * Dh:(h + 1) * Dh]                               # (TB, Dh)
            k = qkv[:, E + h * Dh:E + (h + 1) * Dh]
            v = qkv[:, 2 * E + h * Dh:2 * E + (h + 1) * Dh]
            # q @ k^T directly via dot_general (no materialized transpose).
            s = lax.dot_general(q, k, (((1,), (1,)), ((), ())),
                                preferred_element_type=jnp.float32)       # (TB, TB)
            s = s * scale + attn_bias                                     # block-diag mask
            m = jnp.max(s, axis=-1, keepdims=True)
            p = jnp.exp(s - m)
            inv = pl.reciprocal(jnp.sum(p, axis=-1, keepdims=True), approx=True)
            o = matmul(p * inv, v)                                        # (TB, Dh)
            # fold the output projection per head: attn += o @ W_out[h*Dh:(h+1)*Dh]
            attn = attn + matmul(o, out_w[h * Dh:(h + 1) * Dh, :])
        attn = attn + out_b[...]

        h1 = layernorm(y + attn, ln1_w, ln1_b)                            # norm1(x + attn)
        ff = jnp.maximum(matmul(h1, ff1_w[...]) + ff1_b[...], 0.0)
        ff = matmul(ff, ff2_w[...]) + ff2_b[...]
        y = layernorm(h1 + ff, ln2_w, ln2_b)                              # norm2(x + ff)

    # ---- final LayerNorm, reg-token readout, mlp head ------------------------
    yf = layernorm(y, norm_w_ref, norm_b_ref)
    reg_out = yf[0:batch, :]                                              # (B, E)
    out = matmul(reg_out, head_w_ref[...]) + head_b_ref[...]              # (B, out_dim)
    out_ref[...] = out.astype(out_ref.dtype)


# ------------------------------ model forward ------------------------------- #

def general_transformer_forward(x, params, num_heads):
    """x: (B, S, in_dim) -> (B, out_dim).  One fused pallas_call."""
    B, S, Din = x.shape
    E = params["embed_w"].shape[1]
    out_dim = params["head_w"].shape[1]
    num_layers = len(params["layers"])
    TB = (S + 1) * B

    # --- plain-JAX layout plumbing (tiny, one-time) ---------------------------
    # Rows ordered t-major / b-minor; B leading zero rows stand in for the
    # regression-token slots (their embedding output is masked out in-kernel).
    x_sb = jnp.transpose(x, (1, 0, 2)).reshape(S * B, Din)
    x_pad = jnp.concatenate([jnp.zeros((B, Din), x.dtype), x_sb], axis=0)   # (TB, Din)

    rows = jnp.arange(TB)
    reg_mask = (rows < B).astype(jnp.float32).reshape(TB, 1)
    same_tok = (rows[:, None] // B) == (rows[None, :] // B)
    attn_bias = jnp.where(same_tok, 0.0, -1e30).astype(jnp.float32)        # (TB, TB)

    args = [x_pad, reg_mask, attn_bias,
            params["embed_w"], params["embed_b"].reshape(1, E),
            params["reg_token"].reshape(1, E)]
    for p in params["layers"]:
        args += [p["in_proj_w"], p["in_proj_b"].reshape(1, 3 * E),
                 p["out_proj_w"], p["out_proj_b"].reshape(1, E),
                 p["ln1_w"].reshape(1, E), p["ln1_b"].reshape(1, E),
                 p["ff1_w"], p["ff1_b"].reshape(1, -1),
                 p["ff2_w"], p["ff2_b"].reshape(1, E),
                 p["ln2_w"].reshape(1, E), p["ln2_b"].reshape(1, E)]
    args += [params["norm_w"].reshape(1, E), params["norm_b"].reshape(1, E),
             params["head_w"], params["head_b"].reshape(1, out_dim)]

    kernel = functools.partial(
        _fused_forward_kernel,
        num_layers=num_layers, num_heads=num_heads,
        tb=TB, batch=B, embed_dim=E, eps=1e-5)

    vmem_spec = pl.BlockSpec(memory_space=pltpu.MemorySpace.VMEM)
    return pl.pallas_call(
        kernel,
        out_shape=jax.ShapeDtypeStruct((B, out_dim), jnp.float32),
        in_specs=[vmem_spec] * len(args),
        out_specs=vmem_spec,
    )(*args)


# --------------------------- pure-JAX reference ------------------------------ #

def _forward_ref(x, params, num_heads):
    def lin(x, w, b, act=None):
        y = x @ w + b
        return jnp.maximum(y, 0.0) if act == "relu" else y

    def ln(y, w, b, eps=1e-5):
        m = y.mean(-1, keepdims=True)
        v = ((y - m) ** 2).mean(-1, keepdims=True)
        return (y - m) / jnp.sqrt(v + eps) * w + b

    B, S, Din = x.shape
    E = params["embed_w"].shape[1]
    H = num_heads
    Dh = E // H
    h = lin(x.reshape(B * S, Din), params["embed_w"], params["embed_b"]).reshape(B, S, E)
    reg = jnp.broadcast_to(params["reg_token"].reshape(1, 1, E), (B, 1, E))
    h = jnp.concatenate([reg, h], axis=1)
    T = S + 1
    y = jnp.transpose(h, (1, 0, 2))                             # (T, B, E)
    for p in params["layers"]:
        y2 = y.reshape(T * B, E)
        qkv = lin(y2, p["in_proj_w"], p["in_proj_b"]).reshape(T, B, 3, H, Dh)
        q = jnp.transpose(qkv[:, :, 0], (0, 2, 1, 3))
        k = jnp.transpose(qkv[:, :, 1], (0, 2, 1, 3))
        v = jnp.transpose(qkv[:, :, 2], (0, 2, 1, 3))
        s = jnp.einsum("thid,thjd->thij", q, k) / math.sqrt(Dh)
        p_attn = jax.nn.softmax(s, axis=-1)
        a = jnp.einsum("thij,thjd->thid", p_attn, v)
        a = jnp.transpose(a, (0, 2, 1, 3)).reshape(T * B, E)
        a = lin(a, p["out_proj_w"], p["out_proj_b"])
        h1 = ln(y2 + a, p["ln1_w"], p["ln1_b"])
        ff = lin(lin(h1, p["ff1_w"], p["ff1_b"], "relu"), p["ff2_w"], p["ff2_b"])
        y = ln(h1 + ff, p["ln2_w"], p["ln2_b"]).reshape(T, B, E)
    yf = ln(y, params["norm_w"], params["norm_b"])
    return lin(yf[0], params["head_w"], params["head_b"])


# ------------------------------- parameters ---------------------------------- #

def init_params(key, in_dim, embed_dim, num_heads, hidden_dim, num_layers, out_dim):
    ks = jax.random.split(key, 4 + num_layers)

    def nrm(k, shape, s=0.1):
        return (s * jax.random.normal(k, shape)).astype(jnp.float32)

    params = {
        "embed_w": nrm(ks[0], (in_dim, embed_dim)),
        "embed_b": nrm(ks[1], (embed_dim,)),
        "reg_token": nrm(ks[2], (embed_dim,), 1.0),
        "norm_w": jnp.ones((embed_dim,), jnp.float32),
        "norm_b": jnp.zeros((embed_dim,), jnp.float32),
        "head_w": nrm(ks[3], (embed_dim, out_dim)),
        "head_b": jnp.zeros((out_dim,), jnp.float32),
        "layers": [],
    }
    for i in range(num_layers):
        lk = jax.random.split(ks[4 + i], 6)
        params["layers"].append({
            "in_proj_w": nrm(lk[0], (embed_dim, 3 * embed_dim)),
            "in_proj_b": jnp.zeros((3 * embed_dim,), jnp.float32),
            "out_proj_w": nrm(lk[1], (embed_dim, embed_dim)),
            "out_proj_b": jnp.zeros((embed_dim,), jnp.float32),
            "ln1_w": jnp.ones((embed_dim,), jnp.float32),
            "ln1_b": jnp.zeros((embed_dim,), jnp.float32),
            "ff1_w": nrm(lk[2], (embed_dim, hidden_dim)),
            "ff1_b": nrm(lk[3], (hidden_dim,)),
            "ff2_w": nrm(lk[4], (hidden_dim, embed_dim)),
            "ff2_b": nrm(lk[5], (embed_dim,)),
            "ln2_w": jnp.ones((embed_dim,), jnp.float32),
            "ln2_b": jnp.zeros((embed_dim,), jnp.float32),
        })
    return params


# ---------------------------------- main -------------------------------------- #

if __name__ == "__main__":
    B, S, IN_DIM = 2, 8, 16
    EMBED_DIM, NUM_HEADS, HIDDEN_DIM, NUM_LAYERS, OUT_DIM = 32, 4, 64, 2, 1

    key = jax.random.PRNGKey(0)
    k_x, k_p = jax.random.split(key)
    x = jax.random.normal(k_x, (B, S, IN_DIM), dtype=jnp.float32)
    params = init_params(k_p, IN_DIM, EMBED_DIM, NUM_HEADS, HIDDEN_DIM,
                         NUM_LAYERS, OUT_DIM)

    forward = jax.jit(general_transformer_forward, static_argnums=2)
    out = jax.block_until_ready(forward(x, params, NUM_HEADS))

    ref = jax.block_until_ready(_forward_ref(x, params, NUM_HEADS))
    assert out.shape == (B, OUT_DIM), out.shape
    assert jnp.allclose(out, ref, rtol=2e-3, atol=2e-3), (out, ref)

    print("KERNEL_OK")
</pallas_src>

<mosaic_0001>
module attributes {stable_mosaic.version = 11 : i64} {
  func.func @_fused_forward_kernel(%arg0: memref<18x16xf32, #tpu.memory_space<vmem>>, %arg1: memref<18x1xf32, #tpu.memory_space<vmem>>, %arg2: memref<18x18xf32, #tpu.memory_space<vmem>>, %arg3: memref<16x32xf32, #tpu.memory_space<vmem>>, %arg4: memref<1x32xf32, #tpu.memory_space<vmem>>, %arg5: memref<1x32xf32, #tpu.memory_space<vmem>>, %arg6: memref<32x96xf32, #tpu.memory_space<vmem>>, %arg7: memref<1x96xf32, #tpu.memory_space<vmem>>, %arg8: memref<32x32xf32, #tpu.memory_space<vmem>>, %arg9: memref<1x32xf32, #tpu.memory_space<vmem>>, %arg10: memref<1x32xf32, #tpu.memory_space<vmem>>, %arg11: memref<1x32xf32, #tpu.memory_space<vmem>>, %arg12: memref<32x64xf32, #tpu.memory_space<vmem>>, %arg13: memref<1x64xf32, #tpu.memory_space<vmem>>, %arg14: memref<64x32xf32, #tpu.memory_space<vmem>>, %arg15: memref<1x32xf32, #tpu.memory_space<vmem>>, %arg16: memref<1x32xf32, #tpu.memory_space<vmem>>, %arg17: memref<1x32xf32, #tpu.memory_space<vmem>>, %arg18: memref<32x96xf32, #tpu.memory_space<vmem>>, %arg19: memref<1x96xf32, #tpu.memory_space<vmem>>, %arg20: memref<32x32xf32, #tpu.memory_space<vmem>>, %arg21: memref<1x32xf32, #tpu.memory_space<vmem>>, %arg22: memref<1x32xf32, #tpu.memory_space<vmem>>, %arg23: memref<1x32xf32, #tpu.memory_space<vmem>>, %arg24: memref<32x64xf32, #tpu.memory_space<vmem>>, %arg25: memref<1x64xf32, #tpu.memory_space<vmem>>, %arg26: memref<64x32xf32, #tpu.memory_space<vmem>>, %arg27: memref<1x32xf32, #tpu.memory_space<vmem>>, %arg28: memref<1x32xf32, #tpu.memory_space<vmem>>, %arg29: memref<1x32xf32, #tpu.memory_space<vmem>>, %arg30: memref<1x32xf32, #tpu.memory_space<vmem>>, %arg31: memref<1x32xf32, #tpu.memory_space<vmem>>, %arg32: memref<32x1xf32, #tpu.memory_space<vmem>>, %arg33: memref<1x1xf32, #tpu.memory_space<vmem>>, %arg34: memref<2x1xf32, #tpu.memory_space<vmem>>) attributes {dimension_semantics = [], scalar_prefetch = 0 : i64, scratch_operands = 0 : i64, tpu.core_type = #tpu.core_type<tc>} {
    %c0 = arith.constant 0 : index
    %c0_0 = arith.constant 0 : index
    %0 = vector.load %arg0[%c0, %c0_0] : memref<18x16xf32, #tpu.memory_space<vmem>>, vector<18x16xf32>
    %c0_1 = arith.constant 0 : index
    %c0_2 = arith.constant 0 : index
    %1 = vector.load %arg3[%c0_1, %c0_2] : memref<16x32xf32, #tpu.memory_space<vmem>>, vector<16x32xf32>
    %cst = arith.constant dense<0.000000e+00> : vector<18x32xf32>
    %2 = tpu.matmul %0, %1, %cst {dimension_numbers = #tpu.dot_dimension_numbers<[1], [0], [0], [1], [0, 0, 1, 1], [], []>} : vector<18x16xf32>, vector<16x32xf32>, vector<18x32xf32> -> vector<18x32xf32>
    %c0_3 = arith.constant 0 : index
    %c0_4 = arith.constant 0 : index
    %3 = vector.load %arg4[%c0_3, %c0_4] : memref<1x32xf32, #tpu.memory_space<vmem>>, vector<1x32xf32>
    %4 = vector.broadcast %3 : vector<1x32xf32> to vector<18x32xf32>
    %5 = arith.addf %2, %4 : vector<18x32xf32>
    %c0_5 = arith.constant 0 : index
    %c0_6 = arith.constant 0 : index
    %6 = vector.load %arg1[%c0_5, %c0_6] : memref<18x1xf32, #tpu.memory_space<vmem>>, vector<18x1xf32>
    %c0_7 = arith.constant 0 : index
    %c0_8 = arith.constant 0 : index
    %7 = vector.load %arg5[%c0_7, %c0_8] : memref<1x32xf32, #tpu.memory_space<vmem>>, vector<1x32xf32>
    %8 = vector.shape_cast %7 : vector<1x32xf32> to vector<1x32xf32>
    %9 = vector.broadcast %8 : vector<1x32xf32> to vector<18x32xf32>
    %10 = vector.broadcast %6 : vector<18x1xf32> to vector<18x32xf32>
    %11 = arith.mulf %10, %9 : vector<18x32xf32>
    %cst_9 = arith.constant 1.000000e+00 : f32
    %12 = vector.broadcast %cst_9 : f32 to vector<18x1xf32>
    %13 = arith.subf %12, %6 : vector<18x1xf32>
    %14 = vector.broadcast %13 : vector<18x1xf32> to vector<18x32xf32>
    %15 = arith.mulf %14, %5 : vector<18x32xf32>
    %16 = arith.addf %11, %15 : vector<18x32xf32>
    %c0_10 = arith.constant 0 : index
    %c0_11 = arith.constant 0 : index
    %17 = vector.load %arg2[%c0_10, %c0_11] : memref<18x18xf32, #tpu.memory_space<vmem>>, vector<18x18xf32>
    %c0_12 = arith.constant 0 : index
    %c0_13 = arith.constant 0 : index
    %18 = vector.load %arg6[%c0_12, %c0_13] : memref<32x96xf32, #tpu.memory_space<vmem>>, vector<32x96xf32>
    %cst_14 = arith.constant dense<0.000000e+00> : vector<18x96xf32>
    %19 = tpu.matmul %16, %18, %cst_14 {dimension_numbers = #tpu.dot_dimension_numbers<[1], [0], [0], [1], [0, 0, 1, 1], [], []>} : vector<18x32xf32>, vector<32x96xf32>, vector<18x96xf32> -> vector<18x96xf32>
    %c0_15 = arith.constant 0 : index
    %c0_16 = arith.constant 0 : index
    %20 = vector.load %arg7[%c0_15, %c0_16] : memref<1x96xf32, #tpu.memory_space<vmem>>, vector<1x96xf32>
    %21 = vector.broadcast %20 : vector<1x96xf32> to vector<18x96xf32>
    %22 = arith.addf %19, %21 : vector<18x96xf32>
    %cst_17 = arith.constant 0.000000e+00 : f32
    %23 = vector.broadcast %cst_17 : f32 to vector<18x32xf32>
    %24 = vector.extract_strided_slice %22 {offsets = [0, 0], sizes = [18, 8], strides = [1, 1]} : vector<18x96xf32> to vector<18x8xf32>
    %25 = vector.extract_strided_slice %22 {offsets = [0, 32], sizes = [18, 8], strides = [1, 1]} : vector<18x96xf32> to vector<18x8xf32>
    %26 = vector.extract_strided_slice %22 {offsets = [0, 64], sizes = [18, 8], strides = [1, 1]} : vector<18x96xf32> to vector<18x8xf32>
    %cst_18 = arith.constant dense<0.000000e+00> : vector<18x18xf32>
    %27 = tpu.matmul %24, %25, %cst_18 {dimension_numbers = #tpu.dot_dimension_numbers<[1], [1], [0], [0], [0, 0, 1, 0], [], []>} : vector<18x8xf32>, vector<18x8xf32>, vector<18x18xf32> -> vector<18x18xf32>
    %cst_19 = arith.constant 0.353553385 : f32
    %28 = vector.broadcast %cst_19 : f32 to vector<18x18xf32>
    %29 = arith.mulf %27, %28 : vector<18x18xf32>
    %30 = arith.addf %29, %17 : vector<18x18xf32>
    %cst_20 = arith.constant dense<0xFF800000> : vector<18xf32>
    %31 = vector.multi_reduction <maximumf>, %30, %cst_20 [1] : vector<18x18xf32> to vector<18xf32>
    %32 = vector.shape_cast %31 : vector<18xf32> to vector<18x1xf32>
    %33 = vector.broadcast %32 : vector<18x1xf32> to vector<18x18xf32>
    %34 = arith.subf %30, %33 : vector<18x18xf32>
    %35 = math.exp %34 : vector<18x18xf32>
    %cst_21 = arith.constant dense<0.000000e+00> : vector<18xf32>
    %36 = vector.multi_reduction <add>, %35, %cst_21 [1] : vector<18x18xf32> to vector<18xf32>
    %37 = vector.shape_cast %36 : vector<18xf32> to vector<18x1xf32>
    %38 = tpu.reciprocal %37 {approx = true} : vector<18x1xf32> -> vector<18x1xf32>
    %39 = vector.broadcast %38 : vector<18x1xf32> to vector<18x18xf32>
    %40 = arith.mulf %35, %39 : vector<18x18xf32>
    %cst_22 = arith.constant dense<0.000000e+00> : vector<18x8xf32>
    %41 = tpu.matmul %40, %26, %cst_22 {dimension_numbers = #tpu.dot_dimension_numbers<[1], [0], [0], [1], [0, 0, 1, 1], [], []>} : vector<18x18xf32>, vector<18x8xf32>, vector<18x8xf32> -> vector<18x8xf32>
    %c0_23 = arith.constant 0 : index
    %c0_24 = arith.constant 0 : index
    %42 = vector.load %arg8[%c0_23, %c0_24] : memref<32x32xf32, #tpu.memory_space<vmem>>, vector<8x32xf32>
    %cst_25 = arith.constant dense<0.000000e+00> : vector<18x32xf32>
    %43 = tpu.matmul %41, %42, %cst_25 {dimension_numbers = #tpu.dot_dimension_numbers<[1], [0], [0], [1], [0, 0, 1, 1], [], []>} : vector<18x8xf32>, vector<8x32xf32>, vector<18x32xf32> -> vector<18x32xf32>
    %44 = arith.addf %23, %43 : vector<18x32xf32>
    %45 = vector.extract_strided_slice %22 {offsets = [0, 8], sizes = [18, 8], strides = [1, 1]} : vector<18x96xf32> to vector<18x8xf32>
    %46 = vector.extract_strided_slice %22 {offsets = [0, 40], sizes = [18, 8], strides = [1, 1]} : vector<18x96xf32> to vector<18x8xf32>
    %47 = vector.extract_strided_slice %22 {offsets = [0, 72], sizes = [18, 8], strides = [1, 1]} : vector<18x96xf32> to vector<18x8xf32>
    %cst_26 = arith.constant dense<0.000000e+00> : vector<18x18xf32>
    %48 = tpu.matmul %45, %46, %cst_26 {dimension_numbers = #tpu.dot_dimension_numbers<[1], [1], [0], [0], [0, 0, 1, 0], [], []>} : vector<18x8xf32>, vector<18x8xf32>, vector<18x18xf32> -> vector<18x18xf32>
    %cst_27 = arith.constant 0.353553385 : f32
    %49 = vector.broadcast %cst_27 : f32 to vector<18x18xf32>
    %50 = arith.mulf %48, %49 : vector<18x18xf32>
    %51 = arith.addf %50, %17 : vector<18x18xf32>
    %cst_28 = arith.constant dense<0xFF800000> : vector<18xf32>
    %52 = vector.multi_reduction <maximumf>, %51, %cst_28 [1] : vector<18x18xf32> to vector<18xf32>
    %53 = vector.shape_cast %52 : vector<18xf32> to vector<18x1xf32>
    %54 = vector.broadcast %53 : vector<18x1xf32> to vector<18x18xf32>
    %55 = arith.subf %51, %54 : vector<18x18xf32>
    %56 = math.exp %55 : vector<18x18xf32>
    %cst_29 = arith.constant dense<0.000000e+00> : vector<18xf32>
    %57 = vector.multi_reduction <add>, %56, %cst_29 [1] : vector<18x18xf32> to vector<18xf32>
    %58 = vector.shape_cast %57 : vector<18xf32> to vector<18x1xf32>
    %59 = tpu.reciprocal %58 {approx = true} : vector<18x1xf32> -> vector<18x1xf32>
    %60 = vector.broadcast %59 : vector<18x1xf32> to vector<18x18xf32>
    %61 = arith.mulf %56, %60 : vector<18x18xf32>
    %cst_30 = arith.constant dense<0.000000e+00> : vector<18x8xf32>
    %62 = tpu.matmul %61, %47, %cst_30 {dimension_numbers = #tpu.dot_dimension_numbers<[1], [0], [0], [1], [0, 0, 1, 1], [], []>} : vector<18x18xf32>, vector<18x8xf32>, vector<18x8xf32> -> vector<18x8xf32>
    %c8 = arith.constant 8 : index
    %c0_31 = arith.constant 0 : index
    %63 = vector.load %arg8[%c8, %c0_31] : memref<32x32xf32, #tpu.memory_space<vmem>>, vector<8x32xf32>
    %cst_32 = arith.constant dense<0.000000e+00> : vector<18x32xf32>
    %64 = tpu.matmul %62, %63, %cst_32 {dimension_numbers = #tpu.dot_dimension_numbers<[1], [0], [0], [1], [0, 0, 1, 1], [], []>} : vector<18x8xf32>, vector<8x32xf32>, vector<18x32xf32> -> vector<18x32xf32>
    %65 = arith.addf %44, %64 : vector<18x32xf32>
    %66 = vector.extract_strided_slice %22 {offsets = [0, 16], sizes = [18, 8], strides = [1, 1]} : vector<18x96xf32> to vector<18x8xf32>
    %67 = vector.extract_strided_slice %22 {offsets = [0, 48], sizes = [18, 8], strides = [1, 1]} : vector<18x96xf32> to vector<18x8xf32>
    %68 = vector.extract_strided_slice %22 {offsets = [0, 80], sizes = [18, 8], strides = [1, 1]} : vector<18x96xf32> to vector<18x8xf32>
    %cst_33 = arith.constant dense<0.000000e+00> : vector<18x18xf32>
    %69 = tpu.matmul %66, %67, %cst_33 {dimension_numbers = #tpu.dot_dimension_numbers<[1], [1], [0], [0], [0, 0, 1, 0], [], []>} : vector<18x8xf32>, vector<18x8xf32>, vector<18x18xf32> -> vector<18x18xf32>
    %cst_34 = arith.constant 0.353553385 : f32
    %70 = vector.broadcast %cst_34 : f32 to vector<18x18xf32>
    %71 = arith.mulf %69, %70 : vector<18x18xf32>
    %72 = arith.addf %71, %17 : vector<18x18xf32>
    %cst_35 = arith.constant dense<0xFF800000> : vector<18xf32>
    %73 = vector.multi_reduction <maximumf>, %72, %cst_35 [1] : vector<18x18xf32> to vector<18xf32>
    %74 = vector.shape_cast %73 : vector<18xf32> to vector<18x1xf32>
    %75 = vector.broadcast %74 : vector<18x1xf32> to vector<18x18xf32>
    %76 = arith.subf %72, %75 : vector<18x18xf32>
    %77 = math.exp %76 : vector<18x18xf32>
    %cst_36 = arith.constant dense<0.000000e+00> : vector<18xf32>
    %78 = vector.multi_reduction <add>, %77, %cst_36 [1] : vector<18x18xf32> to vector<18xf32>
    %79 = vector.shape_cast %78 : vector<18xf32> to vector<18x1xf32>
    %80 = tpu.reciprocal %79 {approx = true} : vector<18x1xf32> -> vector<18x1xf32>
    %81 = vector.broadcast %80 : vector<18x1xf32> to vector<18x18xf32>
    %82 = arith.mulf %77, %81 : vector<18x18xf32>
    %cst_37 = arith.constant dense<0.000000e+00> : vector<18x8xf32>
    %83 = tpu.matmul %82, %68, %cst_37 {dimension_numbers = #tpu.dot_dimension_numbers<[1], [0], [0], [1], [0, 0, 1, 1], [], []>} : vector<18x18xf32>, vector<18x8xf32>, vector<18x8xf32> -> vector<18x8xf32>
    %c16 = arith.constant 16 : index
    %c0_38 = arith.constant 0 : index
    %84 = vector.load %arg8[%c16, %c0_38] : memref<32x32xf32, #tpu.memory_space<vmem>>, vector<8x32xf32>
    %cst_39 = arith.constant dense<0.000000e+00> : vector<18x32xf32>
    %85 = tpu.matmul %83, %84, %cst_39 {dimension_numbers = #tpu.dot_dimension_numbers<[1], [0], [0], [1], [0, 0, 1, 1], [], []>} : vector<18x8xf32>, vector<8x32xf32>, vector<18x32xf32> -> vector<18x32xf32>
    %86 = arith.addf %65, %85 : vector<18x32xf32>
    %87 = vector.extract_strided_slice %22 {offsets = [0, 24], sizes = [18, 8], strides = [1, 1]} : vector<18x96xf32> to vector<18x8xf32>
    %88 = vector.extract_strided_slice %22 {offsets = [0, 56], sizes = [18, 8], strides = [1, 1]} : vector<18x96xf32> to vector<18x8xf32>
    %89 = vector.extract_strided_slice %22 {offsets = [0, 88], sizes = [18, 8], strides = [1, 1]} : vector<18x96xf32> to vector<18x8xf32>
    %cst_40 = arith.constant dense<0.000000e+00> : vector<18x18xf32>
    %90 = tpu.matmul %87, %88, %cst_40 {dimension_numbers = #tpu.dot_dimension_numbers<[1], [1], [0], [0], [0, 0, 1, 0], [], []>} : vector<18x8xf32>, vector<18x8xf32>, vector<18x18xf32> -> vector<18x18xf32>
    %cst_41 = arith.constant 0.353553385 : f32
    %91 = vector.broadcast %cst_41 : f32 to vector<18x18xf32>
    %92 = arith.mulf %90, %91 : vector<18x18xf32>
    %93 = arith.addf %92, %17 : vector<18x18xf32>
    %cst_42 = arith.constant dense<0xFF800000> : vector<18xf32>
    %94 = vector.multi_reduction <maximumf>, %93, %cst_42 [1] : vector<18x18xf32> to vector<18xf32>
    %95 = vector.shape_cast %94 : vector<18xf32> to vector<18x1xf32>
    %96 = vector.broadcast %95 : vector<18x1xf32> to vector<18x18xf32>
    %97 = arith.subf %93, %96 : vector<18x18xf32>
    %98 = math.exp %97 : vector<18x18xf32>
    %cst_43 = arith.constant dense<0.000000e+00> : vector<18xf32>
    %99 = vector.multi_reduction <add>, %98, %cst_43 [1] : vector<18x18xf32> to vector<18xf32>
    %100 = vector.shape_cast %99 : vector<18xf32> to vector<18x1xf32>
    %101 = tpu.reciprocal %100 {approx = true} : vector<18x1xf32> -> vector<18x1xf32>
    %102 = vector.broadcast %101 : vector<18x1xf32> to vector<18x18xf32>
    %103 = arith.mulf %98, %102 : vector<18x18xf32>
    %cst_44 = arith.constant dense<0.000000e+00> : vector<18x8xf32>
    %104 = tpu.matmul %103, %89, %cst_44 {dimension_numbers = #tpu.dot_dimension_numbers<[1], [0], [0], [1], [0, 0, 1, 1], [], []>} : vector<18x18xf32>, vector<18x8xf32>, vector<18x8xf32> -> vector<18x8xf32>
    %c24 = arith.constant 24 : index
    %c0_45 = arith.constant 0 : index
    %105 = vector.load %arg8[%c24, %c0_45] : memref<32x32xf32, #tpu.memory_space<vmem>>, vector<8x32xf32>
    %cst_46 = arith.constant dense<0.000000e+00> : vector<18x32xf32>
    %106 = tpu.matmul %104, %105, %cst_46 {dimension_numbers = #tpu.dot_dimension_numbers<[1], [0], [0], [1], [0, 0, 1, 1], [], []>} : vector<18x8xf32>, vector<8x32xf32>, vector<18x32xf32> -> vector<18x32xf32>
    %107 = arith.addf %86, %106 : vector<18x32xf32>
    %c0_47 = arith.constant 0 : index
    %c0_48 = arith.constant 0 : index
    %108 = vector.load %arg9[%c0_47, %c0_48] : memref<1x32xf32, #tpu.memory_space<vmem>>, vector<1x32xf32>
    %109 = vector.broadcast %108 : vector<1x32xf32> to vector<18x32xf32>
    %110 = arith.addf %107, %109 : vector<18x32xf32>
    %111 = arith.addf %16, %110 : vector<18x32xf32>
    %cst_49 = arith.constant dense<0.000000e+00> : vector<18xf32>
    %112 = vector.multi_reduction <add>, %111, %cst_49 [1] : vector<18x32xf32> to vector<18xf32>
    %113 = vector.shape_cast %112 : vector<18xf32> to vector<18x1xf32>
    %cst_50 = arith.constant 3.200000e+01 : f32
    %114 = vector.broadcast %cst_50 : f32 to vector<18x1xf32>
    %115 = arith.divf %113, %114 : vector<18x1xf32>
    %116 = vector.broadcast %115 : vector<18x1xf32> to vector<18x32xf32>
    %117 = arith.subf %111, %116 : vector<18x32xf32>
    %118 = arith.mulf %117, %117 : vector<18x32xf32>
    %cst_51 = arith.constant dense<0.000000e+00> : vector<18xf32>
    %119 = vector.multi_reduction <add>, %118, %cst_51 [1] : vector<18x32xf32> to vector<18xf32>
    %120 = vector.shape_cast %119 : vector<18xf32> to vector<18x1xf32>
    %cst_52 = arith.constant 3.200000e+01 : f32
    %121 = vector.broadcast %cst_52 : f32 to vector<18x1xf32>
    %122 = arith.divf %120, %121 : vector<18x1xf32>
    %123 = vector.broadcast %115 : vector<18x1xf32> to vector<18x32xf32>
    %124 = arith.subf %111, %123 : vector<18x32xf32>
    %cst_53 = arith.constant 9.99999974E-6 : f32
    %125 = vector.broadcast %cst_53 : f32 to vector<18x1xf32>
    %126 = arith.addf %122, %125 : vector<18x1xf32>
    %127 = math.rsqrt %126 : vector<18x1xf32>
    %128 = vector.broadcast %127 : vector<18x1xf32> to vector<18x32xf32>
    %129 = arith.mulf %124, %128 : vector<18x32xf32>
    %c0_54 = arith.constant 0 : index
    %c0_55 = arith.constant 0 : index
    %130 = vector.load %arg10[%c0_54, %c0_55] : memref<1x32xf32, #tpu.memory_space<vmem>>, vector<1x32xf32>
    %131 = vector.broadcast %130 : vector<1x32xf32> to vector<18x32xf32>
    %132 = arith.mulf %129, %131 : vector<18x32xf32>
    %c0_56 = arith.constant 0 : index
    %c0_57 = arith.constant 0 : index
    %133 = vector.load %arg11[%c0_56, %c0_57] : memref<1x32xf32, #tpu.memory_space<vmem>>, vector<1x32xf32>
    %134 = vector.broadcast %133 : vector<1x32xf32> to vector<18x32xf32>
    %135 = arith.addf %132, %134 : vector<18x32xf32>
    %c0_58 = arith.constant 0 : index
    %c0_59 = arith.constant 0 : index
    %136 = vector.load %arg12[%c0_58, %c0_59] : memref<32x64xf32, #tpu.memory_space<vmem>>, vector<32x64xf32>
    %cst_60 = arith.constant dense<0.000000e+00> : vector<18x64xf32>
    %137 = tpu.matmul %135, %136, %cst_60 {dimension_numbers = #tpu.dot_dimension_numbers<[1], [0], [0], [1], [0, 0, 1, 1], [], []>} : vector<18x32xf32>, vector<32x64xf32>, vector<18x64xf32> -> vector<18x64xf32>
    %c0_61 = arith.constant 0 : index
    %c0_62 = arith.constant 0 : index
    %138 = vector.load %arg13[%c0_61, %c0_62] : memref<1x64xf32, #tpu.memory_space<vmem>>, vector<1x64xf32>
    %139 = vector.broadcast %138 : vector<1x64xf32> to vector<18x64xf32>
    %140 = arith.addf %137, %139 : vector<18x64xf32>
    %cst_63 = arith.constant 0.000000e+00 : f32
    %141 = vector.broadcast %cst_63 : f32 to vector<18x64xf32>
    %142 = arith.maximumf %140, %141 : vector<18x64xf32>
    %c0_64 = arith.constant 0 : index
    %c0_65 = arith.constant 0 : index
    %143 = vector.load %arg14[%c0_64, %c0_65] : memref<64x32xf32, #tpu.memory_space<vmem>>, vector<64x32xf32>
    %cst_66 = arith.constant dense<0.000000e+00> : vector<18x32xf32>
    %144 = tpu.matmul %142, %143, %cst_66 {dimension_numbers = #tpu.dot_dimension_numbers<[1], [0], [0], [1], [0, 0, 1, 1], [], []>} : vector<18x64xf32>, vector<64x32xf32>, vector<18x32xf32> -> vector<18x32xf32>
    %c0_67 = arith.constant 0 : index
    %c0_68 = arith.constant 0 : index
    %145 = vector.load %arg15[%c0_67, %c0_68] : memref<1x32xf32, #tpu.memory_space<vmem>>, vector<1x32xf32>
    %146 = vector.broadcast %145 : vector<1x32xf32> to vector<18x32xf32>
    %147 = arith.addf %144, %146 : vector<18x32xf32>
    %148 = arith.addf %135, %147 : vector<18x32xf32>
    %cst_69 = arith.constant dense<0.000000e+00> : vector<18xf32>
    %149 = vector.multi_reduction <add>, %148, %cst_69 [1] : vector<18x32xf32> to vector<18xf32>
    %150 = vector.shape_cast %149 : vector<18xf32> to vector<18x1xf32>
    %cst_70 = arith.constant 3.200000e+01 : f32
    %151 = vector.broadcast %cst_70 : f32 to vector<18x1xf32>
    %152 = arith.divf %150, %151 : vector<18x1xf32>
    %153 = vector.broadcast %152 : vector<18x1xf32> to vector<18x32xf32>
    %154 = arith.subf %148, %153 : vector<18x32xf32>
    %155 = arith.mulf %154, %154 : vector<18x32xf32>
    %cst_71 = arith.constant dense<0.000000e+00> : vector<18xf32>
    %156 = vector.multi_reduction <add>, %155, %cst_71 [1] : vector<18x32xf32> to vector<18xf32>
    %157 = vector.shape_cast %156 : vector<18xf32> to vector<18x1xf32>
    %cst_72 = arith.constant 3.200000e+01 : f32
    %158 = vector.broadcast %cst_72 : f32 to vector<18x1xf32>
    %159 = arith.divf %157, %158 : vector<18x1xf32>
    %160 = vector.broadcast %152 : vector<18x1xf32> to vector<18x32xf32>
    %161 = arith.subf %148, %160 : vector<18x32xf32>
    %cst_73 = arith.constant 9.99999974E-6 : f32
    %162 = vector.broadcast %cst_73 : f32 to vector<18x1xf32>
    %163 = arith.addf %159, %162 : vector<18x1xf32>
    %164 = math.rsqrt %163 : vector<18x1xf32>
    %165 = vector.broadcast %164 : vector<18x1xf32> to vector<18x32xf32>
    %166 = arith.mulf %161, %165 : vector<18x32xf32>
    %c0_74 = arith.constant 0 : index
    %c0_75 = arith.constant 0 : index
    %167 = vector.load %arg16[%c0_74, %c0_75] : memref<1x32xf32, #tpu.memory_space<vmem>>, vector<1x32xf32>
    %168 = vector.broadcast %167 : vector<1x32xf32> to vector<18x32xf32>
    %169 = arith.mulf %166, %168 : vector<18x32xf32>
    %c0_76 = arith.constant 0 : index
    %c0_77 = arith.constant 0 : index
    %170 = vector.load %arg17[%c0_76, %c0_77] : memref<1x32xf32, #tpu.memory_space<vmem>>, vector<1x32xf32>
    %171 = vector.broadcast %170 : vector<1x32xf32> to vector<18x32xf32>
    %172 = arith.addf %169, %171 : vector<18x32xf32>
    %c0_78 = arith.constant 0 : index
    %c0_79 = arith.constant 0 : index
    %173 = vector.load %arg18[%c0_78, %c0_79] : memref<32x96xf32, #tpu.memory_space<vmem>>, vector<32x96xf32>
    %cst_80 = arith.constant dense<0.000000e+00> : vector<18x96xf32>
    %174 = tpu.matmul %172, %173, %cst_80 {dimension_numbers = #tpu.dot_dimension_numbers<[1], [0], [0], [1], [0, 0, 1, 1], [], []>} : vector<18x32xf32>, vector<32x96xf32>, vector<18x96xf32> -> vector<18x96xf32>
    %c0_81 = arith.constant 0 : index
    %c0_82 = arith.constant 0 : index
    %175 = vector.load %arg19[%c0_81, %c0_82] : memref<1x96xf32, #tpu.memory_space<vmem>>, vector<1x96xf32>
    %176 = vector.broadcast %175 : vector<1x96xf32> to vector<18x96xf32>
    %177 = arith.addf %174, %176 : vector<18x96xf32>
    %cst_83 = arith.constant 0.000000e+00 : f32
    %178 = vector.broadcast %cst_83 : f32 to vector<18x32xf32>
    %179 = vector.extract_strided_slice %177 {offsets = [0, 0], sizes = [18, 8], strides = [1, 1]} : vector<18x96xf32> to vector<18x8xf32>
    %180 = vector.extract_strided_slice %177 {offsets = [0, 32], sizes = [18, 8], strides = [1, 1]} : vector<18x96xf32> to vector<18x8xf32>
    %181 = vector.extract_strided_slice %177 {offsets = [0, 64], sizes = [18, 8], strides = [1, 1]} : vector<18x96xf32> to vector<18x8xf32>
    %cst_84 = arith.constant dense<0.000000e+00> : vector<18x18xf32>
    %182 = tpu.matmul %179, %180, %cst_84 {dimension_numbers = #tpu.dot_dimension_numbers<[1], [1], [0], [0], [0, 0, 1, 0], [], []>} : vector<18x8xf32>, vector<18x8xf32>, vector<18x18xf32> -> vector<18x18xf32>
    %cst_85 = arith.constant 0.353553385 : f32
    %183 = vector.broadcast %cst_85 : f32 to vector<18x18xf32>
    %184 = arith.mulf %182, %183 : vector<18x18xf32>
    %185 = arith.addf %184, %17 : vector<18x18xf32>
    %cst_86 = arith.constant dense<0xFF800000> : vector<18xf32>
    %186 = vector.multi_reduction <maximumf>, %185, %cst_86 [1] : vector<18x18xf32> to vector<18xf32>
    %187 = vector.shape_cast %186 : vector<18xf32> to vector<18x1xf32>
    %188 = vector.broadcast %187 : vector<18x1xf32> to vector<18x18xf32>
    %189 = arith.subf %185, %188 : vector<18x18xf32>
    %190 = math.exp %189 : vector<18x18xf32>
    %cst_87 = arith.constant dense<0.000000e+00> : vector<18xf32>
    %191 = vector.multi_reduction <add>, %190, %cst_87 [1] : vector<18x18xf32> to vector<18xf32>
    %192 = vector.shape_cast %191 : vector<18xf32> to vector<18x1xf32>
    %193 = tpu.reciprocal %192 {approx = true} : vector<18x1xf32> -> vector<18x1xf32>
    %194 = vector.broadcast %193 : vector<18x1xf32> to vector<18x18xf32>
    %195 = arith.mulf %190, %194 : vector<18x18xf32>
    %cst_88 = arith.constant dense<0.000000e+00> : vector<18x8xf32>
    %196 = tpu.matmul %195, %181, %cst_88 {dimension_numbers = #tpu.dot_dimension_numbers<[1], [0], [0], [1], [0, 0, 1, 1], [], []>} : vector<18x18xf32>, vector<18x8xf32>, vector<18x8xf32> -> vector<18x8xf32>
    %c0_89 = arith.constant 0 : index
    %c0_90 = arith.constant 0 : index
    %197 = vector.load %arg20[%c0_89, %c0_90] : memref<32x32xf32, #tpu.memory_space<vmem>>, vector<8x32xf32>
    %cst_91 = arith.constant dense<0.000000e+00> : vector<18x32xf32>
    %198 = tpu.matmul %196, %197, %cst_91 {dimension_numbers = #tpu.dot_dimension_numbers<[1], [0], [0], [1], [0, 0, 1, 1], [], []>} : vector<18x8xf32>, vector<8x32xf32>, vector<18x32xf32> -> vector<18x32xf32>
    %199 = arith.addf %178, %198 : vector<18x32xf32>
    %200 = vector.extract_strided_slice %177 {offsets = [0, 8], sizes = [18, 8], strides = [1, 1]} : vector<18x96xf32> to vector<18x8xf32>
    %201 = vector.extract_strided_slice %177 {offsets = [0, 40], sizes = [18, 8], strides = [1, 1]} : vector<18x96xf32> to vector<18x8xf32>
    %202 = vector.extract_strided_slice %177 {offsets = [0, 72], sizes = [18, 8], strides = [1, 1]} : vector<18x96xf32> to vector<18x8xf32>
    %cst_92 = arith.constant dense<0.000000e+00> : vector<18x18xf32>
    %203 = tpu.matmul %200, %201, %cst_92 {dimension_numbers = #tpu.dot_dimension_numbers<[1], [1], [0], [0], [0, 0, 1, 0], [], []>} : vector<18x8xf32>, vector<18x8xf32>, vector<18x18xf32> -> vector<18x18xf32>
    %cst_93 = arith.constant 0.353553385 : f32
    %204 = vector.broadcast %cst_93 : f32 to vector<18x18xf32>
    %205 = arith.mulf %203, %204 : vector<18x18xf32>
    %206 = arith.addf %205, %17 : vector<18x18xf32>
    %cst_94 = arith.constant dense<0xFF800000> : vector<18xf32>
    %207 = vector.multi_reduction <maximumf>, %206, %cst_94 [1] : vector<18x18xf32> to vector<18xf32>
    %208 = vector.shape_cast %207 : vector<18xf32> to vector<18x1xf32>
    %209 = vector.broadcast %208 : vector<18x1xf32> to vector<18x18xf32>
    %210 = arith.subf %206, %209 : vector<18x18xf32>
    %211 = math.exp %210 : vector<18x18xf32>
    %cst_95 = arith.constant dense<0.000000e+00> : vector<18xf32>
    %212 = vector.multi_reduction <add>, %211, %cst_95 [1] : vector<18x18xf32> to vector<18xf32>
    %213 = vector.shape_cast %212 : vector<18xf32> to vector<18x1xf32>
    %214 = tpu.reciprocal %213 {approx = true} : vector<18x1xf32> -> vector<18x1xf32>
    %215 = vector.broadcast %214 : vector<18x1xf32> to vector<18x18xf32>
    %216 = arith.mulf %211, %215 : vector<18x18xf32>
    %cst_96 = arith.constant dense<0.000000e+00> : vector<18x8xf32>
    %217 = tpu.matmul %216, %202, %cst_96 {dimension_numbers = #tpu.dot_dimension_numbers<[1], [0], [0], [1], [0, 0, 1, 1], [], []>} : vector<18x18xf32>, vector<18x8xf32>, vector<18x8xf32> -> vector<18x8xf32>
    %c8_97 = arith.constant 8 : index
    %c0_98 = arith.constant 0 : index
    %218 = vector.load %arg20[%c8_97, %c0_98] : memref<32x32xf32, #tpu.memory_space<vmem>>, vector<8x32xf32>
    %cst_99 = arith.constant dense<0.000000e+00> : vector<18x32xf32>
    %219 = tpu.matmul %217, %218, %cst_99 {dimension_numbers = #tpu.dot_dimension_numbers<[1], [0], [0], [1], [0, 0, 1, 1], [], []>} : vector<18x8xf32>, vector<8x32xf32>, vector<18x32xf32> -> vector<18x32xf32>
    %220 = arith.addf %199, %219 : vector<18x32xf32>
    %221 = vector.extract_strided_slice %177 {offsets = [0, 16], sizes = [18, 8], strides = [1, 1]} : vector<18x96xf32> to vector<18x8xf32>
    %222 = vector.extract_strided_slice %177 {offsets = [0, 48], sizes = [18, 8], strides = [1, 1]} : vector<18x96xf32> to vector<18x8xf32>
    %223 = vector.extract_strided_slice %177 {offsets = [0, 80], sizes = [18, 8], strides = [1, 1]} : vector<18x96xf32> to vector<18x8xf32>
    %cst_100 = arith.constant dense<0.000000e+00> : vector<18x18xf32>
    %224 = tpu.matmul %221, %222, %cst_100 {dimension_numbers = #tpu.dot_dimension_numbers<[1], [1], [0], [0], [0, 0, 1, 0], [], []>} : vector<18x8xf32>, vector<18x8xf32>, vector<18x18xf32> -> vector<18x18xf32>
    %cst_101 = arith.constant 0.353553385 : f32
    %225 = vector.broadcast %cst_101 : f32 to vector<18x18xf32>
    %226 = arith.mulf %224, %225 : vector<18x18xf32>
    %227 = arith.addf %226, %17 : vector<18x18xf32>
    %cst_102 = arith.constant dense<0xFF800000> : vector<18xf32>
    %228 = vector.multi_reduction <maximumf>, %227, %cst_102 [1] : vector<18x18xf32> to vector<18xf32>
    %229 = vector.shape_cast %228 : vector<18xf32> to vector<18x1xf32>
    %230 = vector.broadcast %229 : vector<18x1xf32> to vector<18x18xf32>
    %231 = arith.subf %227, %230 : vector<18x18xf32>
    %232 = math.exp %231 : vector<18x18xf32>
    %cst_103 = arith.constant dense<0.000000e+00> : vector<18xf32>
    %233 = vector.multi_reduction <add>, %232, %cst_103 [1] : vector<18x18xf32> to vector<18xf32>
    %234 = vector.shape_cast %233 : vector<18xf32> to vector<18x1xf32>
    %235 = tpu.reciprocal %234 {approx = true} : vector<18x1xf32> -> vector<18x1xf32>
    %236 = vector.broadcast %235 : vector<18x1xf32> to vector<18x18xf32>
    %237 = arith.mulf %232, %236 : vector<18x18xf32>
    %cst_104 = arith.constant dense<0.000000e+00> : vector<18x8xf32>
    %238 = tpu.matmul %237, %223, %cst_104 {dimension_numbers = #tpu.dot_dimension_numbers<[1], [0], [0], [1], [0, 0, 1, 1], [], []>} : vector<18x18xf32>, vector<18x8xf32>, vector<18x8xf32> -> vector<18x8xf32>
    %c16_105 = arith.constant 16 : index
    %c0_106 = arith.constant 0 : index
    %239 = vector.load %arg20[%c16_105, %c0_106] : memref<32x32xf32, #tpu.memory_space<vmem>>, vector<8x32xf32>
    %cst_107 = arith.constant dense<0.000000e+00> : vector<18x32xf32>
    %240 = tpu.matmul %238, %239, %cst_107 {dimension_numbers = #tpu.dot_dimension_numbers<[1], [0], [0], [1], [0, 0, 1, 1], [], []>} : vector<18x8xf32>, vector<8x32xf32>, vector<18x32xf32> -> vector<18x32xf32>
    %241 = arith.addf %220, %240 : vector<18x32xf32>
    %242 = vector.extract_strided_slice %177 {offsets = [0, 24], sizes = [18, 8], strides = [1, 1]} : vector<18x96xf32> to vector<18x8xf32>
    %243 = vector.extract_strided_slice %177 {offsets = [0, 56], sizes = [18, 8], strides = [1, 1]} : vector<18x96xf32> to vector<18x8xf32>
    %244 = vector.extract_strided_slice %177 {offsets = [0, 88], sizes = [18, 8], strides = [1, 1]} : vector<18x96xf32> to vector<18x8xf32>
    %cst_108 = arith.constant dense<0.000000e+00> : vector<18x18xf32>
    %245 = tpu.matmul %242, %243, %cst_108 {dimension_numbers = #tpu.dot_dimension_numbers<[1], [1], [0], [0], [0, 0, 1, 0], [], []>} : vector<18x8xf32>, vector<18x8xf32>, vector<18x18xf32> -> vector<18x18xf32>
    %cst_109 = arith.constant 0.353553385 : f32
    %246 = vector.broadcast %cst_109 : f32 to vector<18x18xf32>
    %247 = arith.mulf %245, %246 : vector<18x18xf32>
    %248 = arith.addf %247, %17 : vector<18x18xf32>
    %cst_110 = arith.constant dense<0xFF800000> : vector<18xf32>
    %249 = vector.multi_reduction <maximumf>, %248, %cst_110 [1] : vector<18x18xf32> to vector<18xf32>
    %250 = vector.shape_cast %249 : vector<18xf32> to vector<18x1xf32>
    %251 = vector.broadcast %250 : vector<18x1xf32> to vector<18x18xf32>
    %252 = arith.subf %248, %251 : vector<18x18xf32>
    %253 = math.exp %252 : vector<18x18xf32>
    %cst_111 = arith.constant dense<0.000000e+00> : vector<18xf32>
    %254 = vector.multi_reduction <add>, %253, %cst_111 [1] : vector<18x18xf32> to vector<18xf32>
    %255 = vector.shape_cast %254 : vector<18xf32> to vector<18x1xf32>
    %256 = tpu.reciprocal %255 {approx = true} : vector<18x1xf32> -> vector<18x1xf32>
    %257 = vector.broadcast %256 : vector<18x1xf32> to vector<18x18xf32>
    %258 = arith.mulf %253, %257 : vector<18x18xf32>
    %cst_112 = arith.constant dense<0.000000e+00> : vector<18x8xf32>
    %259 = tpu.matmul %258, %244, %cst_112 {dimension_numbers = #tpu.dot_dimension_numbers<[1], [0], [0], [1], [0, 0, 1, 1], [], []>} : vector<18x18xf32>, vector<18x8xf32>, vector<18x8xf32> -> vector<18x8xf32>
    %c24_113 = arith.constant 24 : index
    %c0_114 = arith.constant 0 : index
    %260 = vector.load %arg20[%c24_113, %c0_114] : memref<32x32xf32, #tpu.memory_space<vmem>>, vector<8x32xf32>
    %cst_115 = arith.constant dense<0.000000e+00> : vector<18x32xf32>
    %261 = tpu.matmul %259, %260, %cst_115 {dimension_numbers = #tpu.dot_dimension_numbers<[1], [0], [0], [1], [0, 0, 1, 1], [], []>} : vector<18x8xf32>, vector<8x32xf32>, vector<18x32xf32> -> vector<18x32xf32>
    %262 = arith.addf %241, %261 : vector<18x32xf32>
    %c0_116 = arith.constant 0 : index
    %c0_117 = arith.constant 0 : index
    %263 = vector.load %arg21[%c0_116, %c0_117] : memref<1x32xf32, #tpu.memory_space<vmem>>, vector<1x32xf32>
    %264 = vector.broadcast %263 : vector<1x32xf32> to vector<18x32xf32>
    %265 = arith.addf %262, %264 : vector<18x32xf32>
    %266 = arith.addf %172, %265 : vector<18x32xf32>
    %cst_118 = arith.constant dense<0.000000e+00> : vector<18xf32>
    %267 = vector.multi_reduction <add>, %266, %cst_118 [1] : vector<18x32xf32> to vector<18xf32>
    %268 = vector.shape_cast %267 : vector<18xf32> to vector<18x1xf32>
    %cst_119 = arith.constant 3.200000e+01 : f32
    %269 = vector.broadcast %cst_119 : f32 to vector<18x1xf32>
    %270 = arith.divf %268, %269 : vector<18x1xf32>
    %271 = vector.broadcast %270 : vector<18x1xf32> to vector<18x32xf32>
    %272 = arith.subf %266, %271 : vector<18x32xf32>
    %273 = arith.mulf %272, %272 : vector<18x32xf32>
    %cst_120 = arith.constant dense<0.000000e+00> : vector<18xf32>
    %274 = vector.multi_reduction <add>, %273, %cst_120 [1] : vector<18x32xf32> to vector<18xf32>
    %275 = vector.shape_cast %274 : vector<18xf32> to vector<18x1xf32>
    %cst_121 = arith.constant 3.200000e+01 : f32
    %276 = vector.broadcast %cst_121 : f32 to vector<18x1xf32>
    %277 = arith.divf %275, %276 : vector<18x1xf32>
    %278 = vector.broadcast %270 : vector<18x1xf32> to vector<18x32xf32>
    %279 = arith.subf %266, %278 : vector<18x32xf32>
    %cst_122 = arith.constant 9.99999974E-6 : f32
    %280 = vector.broadcast %cst_122 : f32 to vector<18x1xf32>
    %281 = arith.addf %277, %280 : vector<18x1xf32>
    %282 = math.rsqrt %281 : vector<18x1xf32>
    %283 = vector.broadcast %282 : vector<18x1xf32> to vector<18x32xf32>
    %284 = arith.mulf %279, %283 : vector<18x32xf32>
    %c0_123 = arith.constant 0 : index
    %c0_124 = arith.constant 0 : index
    %285 = vector.load %arg22[%c0_123, %c0_124] : memref<1x32xf32, #tpu.memory_space<vmem>>, vector<1x32xf32>
    %286 = vector.broadcast %285 : vector<1x32xf32> to vector<18x32xf32>
    %287 = arith.mulf %284, %286 : vector<18x32xf32>
    %c0_125 = arith.constant 0 : index
    %c0_126 = arith.constant 0 : index
    %288 = vector.load %arg23[%c0_125, %c0_126] : memref<1x32xf32, #tpu.memory_space<vmem>>, vector<1x32xf32>
    %289 = vector.broadcast %288 : vector<1x32xf32> to vector<18x32xf32>
    %290 = arith.addf %287, %289 : vector<18x32xf32>
    %c0_127 = arith.constant 0 : index
    %c0_128 = arith.constant 0 : index
    %291 = vector.load %arg24[%c0_127, %c0_128] : memref<32x64xf32, #tpu.memory_space<vmem>>, vector<32x64xf32>
    %cst_129 = arith.constant dense<0.000000e+00> : vector<18x64xf32>
    %292 = tpu.matmul %290, %291, %cst_129 {dimension_numbers = #tpu.dot_dimension_numbers<[1], [0], [0], [1], [0, 0, 1, 1], [], []>} : vector<18x32xf32>, vector<32x64xf32>, vector<18x64xf32> -> vector<18x64xf32>
    %c0_130 = arith.constant 0 : index
    %c0_131 = arith.constant 0 : index
    %293 = vector.load %arg25[%c0_130, %c0_131] : memref<1x64xf32, #tpu.memory_space<vmem>>, vector<1x64xf32>
    %294 = vector.broadcast %293 : vector<1x64xf32> to vector<18x64xf32>
    %295 = arith.addf %292, %294 : vector<18x64xf32>
    %cst_132 = arith.constant 0.000000e+00 : f32
    %296 = vector.broadcast %cst_132 : f32 to vector<18x64xf32>
    %297 = arith.maximumf %295, %296 : vector<18x64xf32>
    %c0_133 = arith.constant 0 : index
    %c0_134 = arith.constant 0 : index
    %298 = vector.load %arg26[%c0_133, %c0_134] : memref<64x32xf32, #tpu.memory_space<vmem>>, vector<64x32xf32>
    %cst_135 = arith.constant dense<0.000000e+00> : vector<18x32xf32>
    %299 = tpu.matmul %297, %298, %cst_135 {dimension_numbers = #tpu.dot_dimension_numbers<[1], [0], [0], [1], [0, 0, 1, 1], [], []>} : vector<18x64xf32>, vector<64x32xf32>, vector<18x32xf32> -> vector<18x32xf32>
    %c0_136 = arith.constant 0 : index
    %c0_137 = arith.constant 0 : index
    %300 = vector.load %arg27[%c0_136, %c0_137] : memref<1x32xf32, #tpu.memory_space<vmem>>, vector<1x32xf32>
    %301 = vector.broadcast %300 : vector<1x32xf32> to vector<18x32xf32>
    %302 = arith.addf %299, %301 : vector<18x32xf32>
    %303 = arith.addf %290, %302 : vector<18x32xf32>
    %cst_138 = arith.constant dense<0.000000e+00> : vector<18xf32>
    %304 = vector.multi_reduction <add>, %303, %cst_138 [1] : vector<18x32xf32> to vector<18xf32>
    %305 = vector.shape_cast %304 : vector<18xf32> to vector<18x1xf32>
    %cst_139 = arith.constant 3.200000e+01 : f32
    %306 = vector.broadcast %cst_139 : f32 to vector<18x1xf32>
    %307 = arith.divf %305, %306 : vector<18x1xf32>
    %308 = vector.broadcast %307 : vector<18x1xf32> to vector<18x32xf32>
    %309 = arith.subf %303, %308 : vector<18x32xf32>
    %310 = arith.mulf %309, %309 : vector<18x32xf32>
    %cst_140 = arith.constant dense<0.000000e+00> : vector<18xf32>
    %311 = vector.multi_reduction <add>, %310, %cst_140 [1] : vector<18x32xf32> to vector<18xf32>
    %312 = vector.shape_cast %311 : vector<18xf32> to vector<18x1xf32>
    %cst_141 = arith.constant 3.200000e+01 : f32
    %313 = vector.broadcast %cst_141 : f32 to vector<18x1xf32>
    %314 = arith.divf %312, %313 : vector<18x1xf32>
    %315 = vector.broadcast %307 : vector<18x1xf32> to vector<18x32xf32>
    %316 = arith.subf %303, %315 : vector<18x32xf32>
    %cst_142 = arith.constant 9.99999974E-6 : f32
    %317 = vector.broadcast %cst_142 : f32 to vector<18x1xf32>
    %318 = arith.addf %314, %317 : vector<18x1xf32>
    %319 = math.rsqrt %318 : vector<18x1xf32>
    %320 = vector.broadcast %319 : vector<18x1xf32> to vector<18x32xf32>
    %321 = arith.mulf %316, %320 : vector<18x32xf32>
    %c0_143 = arith.constant 0 : index
    %c0_144 = arith.constant 0 : index
    %322 = vector.load %arg28[%c0_143, %c0_144] : memref<1x32xf32, #tpu.memory_space<vmem>>, vector<1x32xf32>
    %323 = vector.broadcast %322 : vector<1x32xf32> to vector<18x32xf32>
    %324 = arith.mulf %321, %323 : vector<18x32xf32>
    %c0_145 = arith.constant 0 : index
    %c0_146 = arith.constant 0 : index
    %325 = vector.load %arg29[%c0_145, %c0_146] : memref<1x32xf32, #tpu.memory_space<vmem>>, vector<1x32xf32>
    %326 = vector.broadcast %325 : vector<1x32xf32> to vector<18x32xf32>
    %327 = arith.addf %324, %326 : vector<18x32xf32>
    %cst_147 = arith.constant dense<0.000000e+00> : vector<18xf32>
    %328 = vector.multi_reduction <add>, %327, %cst_147 [1] : vector<18x32xf32> to vector<18xf32>
    %329 = vector.shape_cast %328 : vector<18xf32> to vector<18x1xf32>
    %cst_148 = arith.constant 3.200000e+01 : f32
    %330 = vector.broadcast %cst_148 : f32 to vector<18x1xf32>
    %331 = arith.divf %329, %330 : vector<18x1xf32>
    %332 = vector.broadcast %331 : vector<18x1xf32> to vector<18x32xf32>
    %333 = arith.subf %327, %332 : vector<18x32xf32>
    %334 = arith.mulf %333, %333 : vector<18x32xf32>
    %cst_149 = arith.constant dense<0.000000e+00> : vector<18xf32>
    %335 = vector.multi_reduction <add>, %334, %cst_149 [1] : vector<18x32xf32> to vector<18xf32>
    %336 = vector.shape_cast %335 : vector<18xf32> to vector<18x1xf32>
    %cst_150 = arith.constant 3.200000e+01 : f32
    %337 = vector.broadcast %cst_150 : f32 to vector<18x1xf32>
    %338 = arith.divf %336, %337 : vector<18x1xf32>
    %339 = vector.broadcast %331 : vector<18x1xf32> to vector<18x32xf32>
    %340 = arith.subf %327, %339 : vector<18x32xf32>
    %cst_151 = arith.constant 9.99999974E-6 : f32
    %341 = vector.broadcast %cst_151 : f32 to vector<18x1xf32>
    %342 = arith.addf %338, %341 : vector<18x1xf32>
    %343 = math.rsqrt %342 : vector<18x1xf32>
    %344 = vector.broadcast %343 : vector<18x1xf32> to vector<18x32xf32>
    %345 = arith.mulf %340, %344 : vector<18x32xf32>
    %c0_152 = arith.constant 0 : index
    %c0_153 = arith.constant 0 : index
    %346 = vector.load %arg30[%c0_152, %c0_153] : memref<1x32xf32, #tpu.memory_space<vmem>>, vector<1x32xf32>
    %347 = vector.broadcast %346 : vector<1x32xf32> to vector<18x32xf32>
    %348 = arith.mulf %345, %347 : vector<18x32xf32>
    %c0_154 = arith.constant 0 : index
    %c0_155 = arith.constant 0 : index
    %349 = vector.load %arg31[%c0_154, %c0_155] : memref<1x32xf32, #tpu.memory_space<vmem>>, vector<1x32xf32>
    %350 = vector.broadcast %349 : vector<1x32xf32> to vector<18x32xf32>
    %351 = arith.addf %348, %350 : vector<18x32xf32>
    %352 = vector.extract_strided_slice %351 {offsets = [0, 0], sizes = [2, 32], strides = [1, 1]} : vector<18x32xf32> to vector<2x32xf32>
    %c0_156 = arith.constant 0 : index
    %c0_157 = arith.constant 0 : index
    %353 = vector.load %arg32[%c0_156, %c0_157] : memref<32x1xf32, #tpu.memory_space<vmem>>, vector<32x1xf32>
    %cst_158 = arith.constant dense<0.000000e+00> : vector<2x1xf32>
    %354 = tpu.matmul %352, %353, %cst_158 {dimension_numbers = #tpu.dot_dimension_numbers<[1], [0], [0], [1], [0, 0, 1, 1], [], []>} : vector<2x32xf32>, vector<32x1xf32>, vector<2x1xf32> -> vector<2x1xf32>
    %c0_159 = arith.constant 0 : index
    %c0_160 = arith.constant 0 : index
    %355 = vector.load %arg33[%c0_159, %c0_160] : memref<1x1xf32, #tpu.memory_space<vmem>>, vector<1x1xf32>
    %356 = vector.broadcast %355 : vector<1x1xf32> to vector<2x1xf32>
    %357 = arith.addf %354, %356 : vector<2x1xf32>
    %c0_161 = arith.constant 0 : index
    %c0_162 = arith.constant 0 : index
    %358 = vector.load %arg34[%c0_161, %c0_162] : memref<2x1xf32, #tpu.memory_space<vmem>>, vector<2x1xf32>
    tpu.vector_store %arg34[%c0_161, %c0_162], %357 {strides = array<i32>} : memref<2x1xf32, #tpu.memory_space<vmem>>, vector<2x1xf32>,
    return
  }
}

</mosaic_0001>

<bundles_post_ra>
// kernel: general_transformer_forward.1
= control target key start
LH: loop header
LB: loop body
LE: loop exit
PB: predicated region body
PF: predicated region fallthrough
CT: control target
= control target key end

     0   :  { %v5142_v0 = vmov 0.0|0.0   ;;  %s5143_s3 = smov 3   ;;  %vm5144_vm0 = vmmov 0   ;;  %v5145_v1 = vmov 0.0   ;;  %v5146_v2 = vmov 0   ;;  %s5147_s10 = smov 1   ;;  %s6057_s0 = inlined_call_operand.smem [shape: u32[35], index: -1, kind: input, shape index: {}] }
   0x1   :  { %4777 = vmatprep.subr.bf16.mxu0 %v5142_v0  ;;  %s3940_s6 = sld [smem:[%s6057_s0 + %s5143_s3]]   ;;  %4311 = vmatprep.mubr.msk.f32.mxu0 %vm5144_vm0, %v5145_v1  ;;  %vm156_vm1 = vcmask 130048   ;;  %s5148_s14 = smov 6   ;;  %vm312_vm2 = vcmask 261120   ;;  %vm411_vm3 = vcmask 64512   ;;  %vm510_vm5 = vcmask 146432  }
   0x2   :  { %s5205_s9 = sld [smem:[%s6057_s0]]   ;;  %4939 = vset.pattern.permute.xlu0 %v5146_v2  ;;  %4940 = vset.pattern.permute.xlu1 %v5146_v2  ;;  %s5149_s18 = smov 4   ;;  %vm5284_vm4 = vmpackc.low %vm411_vm3, %vm411_vm3  ;;  %vm517_vm6 = vcmask 140288   ;;  %vm562_vm7 = vcmask 1041408   ;;  %vm1756_vm8 = vcmask 254976   ;;  %vm1929_vm9 = vcmask 523264  }
   0x3   :  { %s3938_s13 = sld [smem:[%s6057_s0 + %s5147_s10]]   ;;  %4780 = vmatprep.subr.bf16.mxu1 %v5142_v0  ;;  %4328 = vmatprep.mubr.msk.f32.mxu1 %vm5144_vm0, %v5145_v1  ;;  %s5150_s22 = smov 5   ;;  %vm3932_vm10 = vcmask 1024  }
   0x4   :  { %s3943_s17 = sld [smem:[%s6057_s0 + %s5148_s14]]   ;;  %s5151_s26 = smov 7  }
   0x5   :  { %s3941_s21 = sld [smem:[%s6057_s0 + %s5149_s18]]   ;;  %s5152_s30 = smov 96  }
   0x6   :  { %s3942_s25 = sld [smem:[%s6057_s0 + %s5150_s22]]   ;;  %s5153_s1 = smov 88  }
   0x7   :  { %v147_v3 = vld [vmem:[%s3940_s6] sm:$0xff]  ;;  %v148_v4 = vld [vmem:[%s3940_s6 + $0x8] sm:$0xff]  ;;  %s3944_s29 = sld [smem:[%s6057_s0 + %s5151_s26]]   ;;  %s5154_s2 = smov 120  }
   0x8   :  { %v4778_v5 = vpack.c.bf16 %v148_v4, %v147_v3  ;;  %v144_v9 = vld [vmem:[%s5205_s9] sm:$0xff]  ;;  %v145_v12 = vld [vmem:[%s5205_s9 + $0x8] sm:$0xff]  ;;  %v146_v14 = vld [vmem:[%s5205_s9 + $0x10] sm:$0x3]  ;;  %s5155_s3 = smov 2   ;;  %s5156_s7 = smov 64  }
   0x9   :  { %v246_v6 = vld [vmem:[%s3938_s13] sm:$0xff]  ;;  %v247_v8 = vld [vmem:[%s3938_s13 + $0x8] sm:$0xff]  ;;  %v248_v11 = vld [vmem:[%s3938_s13 + $0x10] sm:$0x3]  ;;  %s5322_s6 = sld [smem:[%s6057_s0 + %s5155_s3]]   ;;  %s5157_s8 = smov 56  }
   0xa   :  { %258 = vperm.xlu0 %4939, %v246_v6   ;;  %v274_v7 = vsub.f32 1.0, %v246_v6  ;;  %4779 = vmatpush3.bf16.msra.mxu0 %v4778_v5  ;;  %v275_v10 = vsub.f32 1.0, %v247_v8  ;;  %v276_v13 = vsub.f32 1.0, %v248_v11  ;;  %v301_v15 = vld [vmem:[%s3943_s17] sm:$0xff]  ;;  %v302_v16 = vld [vmem:[%s3943_s17 + $0x8] sm:$0xff]  ;;  %v303_v18 = vld [vmem:[%s3943_s17 + $0x10] sm:$0xff] }
   0xb   :  { %263 = vperm.xlu1 %4940, %v247_v8   ;;  %4786 = vmatprep.subr.bf16.mxu0 %v5142_v0  ;;  %v4781_v17 = vpack.c.bf16 %v302_v16, %v301_v15  ;;  %v304_v19 = vld [vmem:[%s3943_s17 + $0x18] sm:$0xff]  ;;  %v3972_v23 = vld [vmem:[%s3941_s21] ss:$0 sm:$0xff]  ;;  %s5158_s9 = smov 80   ;;  %s5159_s10 = smov 112  }
   0xc   :  { %v4784_v20 = vpack.c.bf16 %v304_v19, %v303_v18  ;;  %v3976_v24 = vld [vmem:[%s3942_s25] ss:$0 sm:$0xff]  ;;  %s5160_s11 = smov 8   ;;  %s5161_s15 = smov 48  }
   0xd   :  { %4312 = vmatmul.mubr.msk.f32.vlgmr.msra.gmra.mrb[0].mxu0 %vm156_vm1, %v144_v9  ;;  %4782 = vmatpush3.bf16.msra.mxu1 %v4781_v17  ;;  %v3977_v49 = vld [vmem:[%s3944_s29] ss:$0 sm:$0xff]  ;;  %s5404_s14 = sld [smem:[%s6057_s0 + %s5160_s11]]   ;;  %s5162_s16 = smov 72  }
   0xe   :  { %279 = vperm.xlu0 %4939, %v274_v7   ;;  %4314 = vmatprep.mubr.msk.f32.mxu0 %vm5144_vm0, %v5145_v1  ;;  %s5163_s17 = smov 104   ;;  %s5164_s18 = smov 40  }
   0xf   :  { %284 = vperm.xlu1 %4940, %v275_v10   ;;  %4783 = vmatprep.subr.bf16.mxu1 %v5142_v0  ;;  %v5329_v16 = vld [vmem:[%s5322_s6 + $0x8] sm:$0xff]  ;;  %s5165_s19 = smov 9   ;;  %s5166_s23 = smov 12  }
  0x10   :  { %s3946_s22 = sld [smem:[%s6057_s0 + %s5165_s19]]   ;;  %s5167_s27 = smov 14  }
  0x11   :  { %4315 = vmatmul.mubr.msk.f32.gmra.mrb[2].mxu0 %vm156_vm1, %v145_v12  ;;  %4785 = vmatpush3.bf16.msra.mxu1 %v4784_v20  ;;  %s3949_s26 = sld [smem:[%s6057_s0 + %s5166_s23]]   ;;  %s5168_s4 = smov 10  }
  0x12   :  { %268 = vperm.xlu0 %4939, %v248_v11   ;;  %4317 = vmatprep.mubr.msk.f32.mxu0 %vm5144_vm0, %v5145_v1  ;;  %v5325_v11 = vld [vmem:[%s5322_s6] sm:$0xff]  ;;  %s5585_s3 = sld [smem:[%s6057_s0 + %s5167_s27]]   ;;  %s5169_s13 = smov 11  }
  0x13   :  { %289 = vperm.xlu1 %4940, %v276_v13   ;;  %4790 = vmatprep.subr.bf16.mxu1 %v5142_v0  ;;  %s3947_s12 = sld [smem:[%s6057_s0 + %s5168_s4]]   ;;  %s5170_s21 = smov 13  }
  0x14   :  { %s3948_s20 = sld [smem:[%s6057_s0 + %s5169_s13]]   ;;  %s5171_s25 = smov 15  }
  0x15   :  { %4318 = vmatmul.mubr.msk.f32.gmra.mrb[4].mxu0 %vm156_vm1, %v146_v14  ;;  %s3950_s24 = sld [smem:[%s6057_s0 + %s5170_s21]]   ;;  %s5172_s29 = smov 18  }
  0x16   :  { %4343 = vmatprep.mubr.msk.f32.mxu0 %vm5144_vm0, %v5145_v1  ;;  %s3952_s28 = sld [smem:[%s6057_s0 + %s5171_s25]]   ;;  %s5173_s11 = smov 16  }
  0x17   :  { %s3955_s5 = sld [smem:[%s6057_s0 + %s5172_s29]]   ;;  %s5174_s19 = smov 17  }
  0x18   :  { %s5175_s23 = smov 19   ;;  %s5179_s27 = smov 26  }
  0x19   :  { %s5180_s4 = smov 22   ;;  %s5181_s13 = smov 23  }
  0x1a   :  { %s5182_s21 = smov 25   ;;  %s5183_s25 = smov 27  }
  0x1b   :  { %s5187_s29 = smov 33  }
  0x89   :  { %v259_v21 = vpop.permute.xlu0 %258 }
  0x8a   :  { %v264_v22 = vpop.permute.xlu1 %263  ;;  %v271_v29 = vmul.f32 %v3976_v24, %v259_v21 }
  0x8b   :  { %v272_v36 = vmul.f32 %v3976_v24, %v264_v22  ;;  %v5334_v22 = vld [vmem:[%s5322_s6 + $0x10] sm:$0x3] }
  0x8d   :  { %v280_v28 = vpop.permute.xlu0 %279 }
  0x8e   :  { %v285_v31 = vpop.permute.xlu1 %284 }
  0x91   :  { %v269_v38 = vpop.permute.xlu0 %268 }
  0x92   :  { %v290_v43 = vpop.permute.xlu1 %289  ;;  %v273_v44 = vmul.f32 %v3976_v24, %v269_v38 }
  0xe0   :  { %v232_v25 = vpop.f32.mrb[0].mxu0 }
  0xe1   :  { %v233_v26 = vadd.f32 %v3972_v23, %v232_v25  ;;  %v4313_v27 = vpop.f32.mrb[1].mxu0 }
  0xe3   :  { %v292_v30 = vmul.f32 %v280_v28, %v233_v26 }
  0xe4   :  { %v237_v32 = vpop.f32.mrb[2].mxu0 }
  0xe5   :  { %v5237_v33 = vadd.f32 %v292_v30, %v271_v29  ;;  %v238_v34 = vadd.f32 %v3972_v23, %v237_v32  ;;  %v4316_v35 = vpop.f32.mrb[3].mxu0 }
  0xe7   :  { %v293_v37 = vmul.f32 %v285_v31, %v238_v34  ;;  %4329 = vmatmul.mubr.msk.f32.vlgmr.msra.gmra.mrb[0].mxu1 %vm312_vm2, %v5237_v33 }
  0xe8   :  { %v242_v39 = vpop.f32.mrb[4].mxu0  ;;  %4331 = vmatprep.mubr.msk.f32.mxu1 %vm5144_vm0, %v5145_v1 }
  0xe9   :  { %v5243_v40 = vadd.f32 %v293_v37, %v272_v36  ;;  %v243_v41 = vadd.f32 %v3972_v23, %v242_v39  ;;  %v4319_v42 = vpop.f32.mrb[5].mxu0 }
  0xeb   :  { %v294_v45 = vmul.f32 %v290_v43, %v243_v41  ;;  %4332 = vmatmul.mubr.msk.f32.gmra.mrb[2].mxu1 %vm312_vm2, %v5243_v40 }
  0xec   :  { %4334 = vmatprep.mubr.msk.f32.mxu1 %vm5144_vm0, %v5145_v1 }
  0xed   :  { %v5249_v46 = vadd.f32 %v294_v45, %v273_v44 }
  0xef   :  { %4335 = vmatmul.mubr.msk.f32.gmra.mrb[4].mxu1 %vm312_vm2, %v5249_v46 }
  0xf0   :  { %4358 = vmatprep.mubr.msk.f32.mxu1 %vm5144_vm0, %v5145_v1 }
 0x1ba   :  { %v388_v47 = vpop.f32.mrb[0].mxu1 }
 0x1bb   :  { %v4330_v48 = vpop.f32.mrb[1].mxu1  ;;  %v5258_v51 = vadd.f32 %v3977_v49, %v388_v47 }
 0x1be   :  { %v393_v50 = vpop.f32.mrb[2].mxu1 }
 0x1bf   :  { %v5260_v52 = vadd.f32 %v3977_v49, %v393_v50  ;;  %v4333_v53 = vpop.f32.mrb[3].mxu1 }
 0x1c1   :  { %v5264_v54 = vpack.i.bf16 %v5260_v52, %v5258_v51 }
 0x1c2   :  { %v398_v55 = vpop.f32.mrb[4].mxu1 }
 0x1c3   :  { %v5266_v56 = vadd.f32 %v3977_v49, %v398_v55  ;;  %4942 = vrot.lane.b32.xlu0 %v5264_v54, %s5152_s30  ;;  %v4336_v57 = vpop.f32.mrb[5].mxu1 }
 0x1c5   :  { %409 = vrot.lane.b32.xlu1 %v5266_v56, %s5152_s30 }
 0x1c7   :  { %4947 = vrot.lane.b32.xlu0 %v5264_v54, %s5153_s1 }
 0x1c9   :  { %656 = vrot.lane.b32.xlu1 %v5266_v56, %s5153_s1 }
 0x1cb   :  { %646 = vrot.lane.b32.xlu0 %v5258_v51, %s5154_s2 }
 0x1cd   :  { %648 = vrot.lane.b32.xlu1 %v5260_v52, %s5154_s2 }
 0x1cf   :  { %650 = vrot.lane.b32.xlu0 %v5266_v56, %s5154_s2 }
 0x235   :  { %v4943_v58 = vpop.permute.xlu0 %4942 }
 0x236   :  { %v4945_v59 = vunpack.i.h.bf16 %v4943_v58  ;;  %v4944_v60 = vunpack.i.l.bf16 %v4943_v58 }
 0x237   :  { %v410_v4 = vpop.permute.xlu1 %409 }
 0x238   :  { %v4787_v62 = vpack.c.bf16 %v4945_v59, %v4944_v60 }
 0x239   :  { %v4948_v63 = vpop.permute.xlu0 %4947 }
 0x23a   :  { %4789 = vmatpush3.bf16.xpose.msk.msra.mxu0 %vm5284_vm4, %v4787_v62  ;;  %v4950_v2 = vunpack.i.h.bf16 %v4948_v63  ;;  %v4949_v3 = vunpack.i.l.bf16 %v4948_v63 }
 0x23b   :  { %4341 = vmatprep.subr.mxu0 %v5145_v1  ;;  %v657_v6 = vpop.permute.xlu1 %656 }
 0x23c   :  { %v4794_v5 = vpack.c.bf16 %v4950_v2, %v4949_v3 }
 0x23d   :  { %v647_v7 = vpop.permute.xlu0 %646 }
 0x23f   :  { %v649_v8 = vpop.permute.xlu1 %648 }
 0x241   :  { %v651_v9 = vpop.permute.xlu0 %650 }
 0x242   :  { %4342 = vmatpush3.xpose.msk.msra.mxu0 %vm411_vm3, %v410_v4 }
 0x243   :  { %4793 = vmatprep.subr.bf16.mxu0 %v5142_v0 }
 0x245   :  { %4344 = vmatmul.mubr.msk.f32.vlgmr.msra.gmra.mrb[6].mxu0 %vm411_vm3, %v5258_v51 }
 0x246   :  { %4796 = vmatpush3.bf16.xpose.msk.msra.mxu0 %vm5284_vm4, %v4794_v5  ;;  %4346 = vmatprep.mubr.msk.f32.mxu0 %vm5144_vm0, %v5145_v1 }
 0x247   :  { %4371 = vmatprep.subr.mxu0 %v5145_v1 }
 0x249   :  { %4347 = vmatmul.mubr.msk.f32.gmra.mrb[8].mxu0 %vm411_vm3, %v5260_v52 }
 0x24a   :  { %4349 = vmatprep.mubr.msk.f32.mxu0 %vm5144_vm0, %v5145_v1 }
 0x24d   :  { %4350 = vmatmul.mubr.msk.f32.gmra.mrb[10].mxu0 %vm411_vm3, %v5266_v56 }
 0x24e   :  { %4372 = vmatpush3.xpose.msk.msra.mxu0 %vm411_vm3, %v657_v6  ;;  %4373 = vmatprep.mubr.msk.f32.mxu0 %vm5144_vm0, %v5145_v1 }
 0x24f   :  { %4397 = vmatprep.subr.mxu0 %v5145_v1 }
 0x251   :  { %4374 = vmatmul.mubr.msk.f32.vlgmr.msra.gmra.mrb[12].mxu0 %vm411_vm3, %v647_v7 }
 0x252   :  { %4376 = vmatprep.mubr.msk.f32.mxu0 %vm5144_vm0, %v5145_v1 }
 0x255   :  { %4377 = vmatmul.mubr.msk.f32.gmra.mrb[14].mxu0 %vm411_vm3, %v649_v8 }
 0x256   :  { %4379 = vmatprep.mubr.msk.f32.mxu0 %vm5144_vm0, %v5145_v1 }
 0x259   :  { %4380 = vmatmul.mubr.msk.f32.gmra.mrb[16].mxu0 %vm411_vm3, %v651_v9 }
 0x25a   :  { %4399 = vmatprep.mubr.msk.f32.mxu0 %vm5144_vm0, %v5145_v1 }
 0x318   :  { %v490_v10 = vpop.f32.mrb[6].mxu0 }
 0x319   :  { %v504_v12 = vmul.f32 0.35355338, %v490_v10  ;;  %v4345_v13 = vpop.f32.mrb[7].mxu0 }
 0x31b   :  { %v507_v14 = vadd.f32 %v504_v12, %v5325_v11 }
 0x31c   :  { %v495_v15 = vpop.f32.mrb[8].mxu0 }
 0x31d   :  { %v505_v17 = vmul.f32 0.35355338, %v495_v15  ;;  %v4348_v18 = vpop.f32.mrb[9].mxu0  ;;  %v511_v19 = vsel %vm510_vm5, %v507_v14, -inf }
 0x31e   :  { %512 = vmax.xlane.f32.xlu1 %v511_v19 }
 0x31f   :  { %v508_v20 = vadd.f32 %v505_v17, %v5329_v16 }
 0x320   :  { %v500_v21 = vpop.f32.mrb[10].mxu0 }
 0x321   :  { %v506_v23 = vmul.f32 0.35355338, %v500_v21  ;;  %v4351_v24 = vpop.f32.mrb[11].mxu0  ;;  %v514_v25 = vsel %vm510_vm5, %v508_v20, -inf }
 0x322   :  { %515 = vmax.xlane.f32.xlu0 %v514_v25 }
 0x323   :  { %v509_v26 = vadd.f32 %v506_v23, %v5334_v22 }
 0x324   :  { %v736_v27 = vpop.f32.mrb[12].mxu0 }
 0x325   :  { %v750_v28 = vmul.f32 0.35355338, %v736_v27  ;;  %v4375_v29 = vpop.f32.mrb[13].mxu0  ;;  %v518_v30 = vsel %vm517_vm6, %v509_v26, -inf }
 0x326   :  { %519 = vmax.xlane.f32.xlu0 %v518_v30 }
 0x327   :  { %v753_v31 = vadd.f32 %v750_v28, %v5325_v11 }
 0x328   :  { %v741_v32 = vpop.f32.mrb[14].mxu0 }
 0x329   :  { %v751_v34 = vmul.f32 0.35355338, %v741_v32  ;;  %v4378_v35 = vpop.f32.mrb[15].mxu0  ;;  %v756_v36 = vsel %vm510_vm5, %v753_v31, -inf }
 0x32a   :  { %757 = vmax.xlane.f32.xlu1 %v756_v36 }
 0x32b   :  { %v754_v37 = vadd.f32 %v751_v34, %v5329_v16 }
 0x32c   :  { %v746_v38 = vpop.f32.mrb[16].mxu0 }
 0x32d   :  { %v752_v39 = vmul.f32 0.35355338, %v746_v38  ;;  %v4381_v41 = vpop.f32.mrb[17].mxu0  ;;  %v759_v42 = vsel %vm510_vm5, %v754_v37, -inf }
 0x32e   :  { %760 = vmax.xlane.f32.xlu0 %v759_v42 }
 0x32f   :  { %v755_v43 = vadd.f32 %v752_v39, %v5334_v22 }
 0x331   :  { %v762_v44 = vsel %vm517_vm6, %v755_v43, -inf }
 0x332   :  { %763 = vmax.xlane.f32.xlu1 %v762_v44 }
 0x343   :  { %4952 = vrot.lane.b32.xlu1 %v5264_v54, %s5156_s7 }
 0x3ab   :  { %v513_v45 = vpop.xlane.xlu1 %512 }
 0x3ac   :  { %v521_v47 = vsub.f32 %v507_v14, %v513_v45 }
 0x3ae   :  { %v524_v48 = vmul.f32 1.442695, %v521_v47 }
 0x3af   :  { %v516_v49 = vpop.xlane.xlu0 %515 }
 0x3b0   :  { %5021 = vpow2.f32 %v524_v48  ;;  %v522_v50 = vsub.f32 %v508_v20, %v516_v49 }
 0x3b2   :  { %v526_v53 = vmul.f32 1.442695, %v522_v50 }
 0x3b3   :  { %v520_v55 = vpop.xlane.xlu0 %519 }
 0x3b4   :  { %5023 = vpow2.f32 %v526_v53  ;;  %v523_v57 = vsub.f32 %v509_v26, %v520_v55 }
 0x3b6   :  { %v528_v58 = vmul.f32 1.442695, %v523_v57  ;;  %v645_v57 = vld [vmem:[%s5404_s14] sm:$0xff] }
 0x3b7   :  { %v758_v59 = vpop.xlane.xlu1 %757 }
 0x3b8   :  { %5025 = vpow2.f32 %v528_v58  ;;  %v765_v60 = vsub.f32 %v753_v31, %v758_v59  ;;  %v888_v58 = vld [vmem:[%s5404_s14 + $0x8] sm:$0xff] }
 0x3b9   :  { %4398 = vmatpush3.msra.mxu0 %v888_v58 }
 0x3ba   :  { %v5022_v62 = vpop.eup %5021  ;;  %v768_v63 = vmul.f32 1.442695, %v765_v60  ;;  %4800 = vmatprep.subr.bf16.mxu0 %v5142_v0 }
 0x3bb   :  { %v761_v2 = vpop.xlane.xlu0 %760  ;;  %v530_v3 = vsel %vm510_vm5, %v5022_v62, 0.0 }
 0x3bc   :  { %5027 = vpow2.f32 %v768_v63  ;;  %v766_v4 = vsub.f32 %v754_v37, %v761_v2  ;;  %531 = vadd.xlane.f32.xlu0 %v530_v3 }
 0x3be   :  { %v5348_v5 = vpop.eup %5023  ;;  %v770_v6 = vmul.f32 1.442695, %v766_v4 }
 0x3bf   :  { %v764_v7 = vpop.xlane.xlu1 %763  ;;  %v533_v8 = vsel %vm510_vm5, %v5348_v5, 0.0 }
 0x3c0   :  { %5029 = vpow2.f32 %v770_v6  ;;  %v767_v9 = vsub.f32 %v755_v43, %v764_v7  ;;  %534 = vadd.xlane.f32.xlu1 %v533_v8 }
 0x3c2   :  { %v5352_v10 = vpop.eup %5025  ;;  %v772_v12 = vmul.f32 1.442695, %v767_v9 }
 0x3c3   :  { %v4953_v13 = vpop.permute.xlu1 %4952  ;;  %v536_v14 = vsel %vm517_vm6, %v5352_v10, 0.0 }
 0x3c4   :  { %5031 = vpow2.f32 %v772_v12  ;;  %v4955_v15 = vunpack.i.h.bf16 %v4953_v13  ;;  %v4954_v17 = vunpack.i.l.bf16 %v4953_v13  ;;  %537 = vadd.xlane.f32.xlu0 %v536_v14 }
 0x3c6   :  { %v5028_v18 = vpop.eup %5027  ;;  %v4791_v19 = vpack.c.bf16 %v4955_v15, %v4954_v17 }
 0x3c7   :  { %v774_v20 = vsel %vm510_vm5, %v5028_v18, 0.0 }
 0x3c8   :  { %775 = vadd.xlane.f32.xlu1 %v774_v20  ;;  %4792 = vmatpush3.bf16.msra.mxu1 %v4791_v19 }
 0x3c9   :  { %4356 = vmatprep.subr.mxu1 %v5145_v1 }
 0x3ca   :  { %v5030_v21 = vpop.eup %5029 }
 0x3cb   :  { %v777_v23 = vsel %vm510_vm5, %v5030_v21, 0.0 }
 0x3cc   :  { %778 = vadd.xlane.f32.xlu0 %v777_v23 }
 0x3ce   :  { %v5032_v24 = vpop.eup %5031 }
 0x3cf   :  { %v780_v25 = vsel %vm517_vm6, %v5032_v24, 0.0 }
 0x3d0   :  { %781 = vadd.xlane.f32.xlu0 %v780_v25 }
 0x3d9   :  { %4957 = vrot.lane.b32.xlu1 %v5264_v54, %s5157_s8 }
 0x3dd   :  { %793 = vrot.lane.b32.xlu1 %v5266_v56, %s5157_s8 }
 0x3e1   :  { %4962 = vrot.lane.b32.xlu1 %v5264_v54, %s5158_s9 }
 0x3e5   :  { %1067 = vrot.lane.b32.xlu1 %v5258_v51, %s5159_s10 }
 0x3e6   :  { %549 = vrot.lane.b32.xlu0 %v5266_v56, %s5156_s7 }
 0x3e9   :  { %1071 = vrot.lane.b32.xlu1 %v5266_v56, %s5159_s10 }
 0x3ea   :  { %1077 = vrot.lane.b32.xlu0 %v5266_v56, %s5158_s9 }
 0x3ee   :  { %1069 = vrot.lane.b32.xlu0 %v5260_v52, %s5159_s10 }
 0x449   :  { %v532_v26 = vpop.xlane.xlu0 %531 }
 0x44a   :  { %5033 = vrcp.f32 %v532_v26 }
 0x44d   :  { %v535_v27 = vpop.xlane.xlu1 %534 }
 0x44e   :  { %5035 = vrcp.f32 %v535_v27 }
 0x451   :  { %v538_v28 = vpop.xlane.xlu0 %537 }
 0x452   :  { %5037 = vrcp.f32 %v538_v28 }
 0x454   :  { %v5034_v34 = vpop.eup %5033 }
 0x455   :  { %v776_v29 = vpop.xlane.xlu1 %775  ;;  %v542_v37 = vmul.f32 %v5034_v34, %v5022_v62 }
 0x456   :  { %5039 = vrcp.f32 %v776_v29 }
 0x458   :  { %v5036_v39 = vpop.eup %5035 }
 0x459   :  { %v779_v30 = vpop.xlane.xlu0 %778  ;;  %v4958_v31 = vpop.permute.xlu1 %4957  ;;  %v543_v42 = vmul.f32 %v5036_v39, %v5348_v5 }
 0x45a   :  { %v4960_v35 = vunpack.i.h.bf16 %v4958_v31  ;;  %v4959_v36 = vunpack.i.l.bf16 %v4958_v31  ;;  %5041 = vrcp.f32 %v779_v30 }
 0x45c   :  { %v4798_v41 = vpack.c.bf16 %v4960_v35, %v4959_v36  ;;  %v5038_v43 = vpop.eup %5037 }
 0x45d   :  { %v782_v32 = vpop.xlane.xlu0 %781  ;;  %v794_v44 = vpop.permute.xlu1 %793  ;;  %v544_v45 = vmul.f32 %v5038_v43, %v5352_v10 }
 0x45e   :  { %5043 = vrcp.f32 %v782_v32 }
 0x460   :  { %v5040_v47 = vpop.eup %5039 }
 0x461   :  { %v550_v38 = vpop.permute.xlu0 %549  ;;  %v786_v48 = vmul.f32 %v5040_v47, %v5028_v18  ;;  %v4963_v63 = vpop.permute.xlu1 %4962 }
 0x462   :  { %4357 = vmatpush3.msk.msra.mxu1 %vm562_vm7, %v550_v38  ;;  %v4965_v3 = vunpack.i.h.bf16 %v4963_v63  ;;  %v4964_v4 = vunpack.i.l.bf16 %v4963_v63 }
 0x463   :  { %4359 = vmatmul.mubr.msk.f32.vlgmr.msra.gmra.mrb[6].mxu1 %vm510_vm5, %v542_v37  ;;  %4797 = vmatprep.subr.bf16.mxu1 %v5142_v0 }
 0x464   :  { %4799 = vmatpush3.bf16.msra.mxu1 %v4798_v41  ;;  %4361 = vmatprep.mubr.msk.f32.mxu1 %vm5144_vm0, %v5145_v1  ;;  %v5042_v49 = vpop.eup %5041  ;;  %v4801_v7 = vpack.c.bf16 %v4965_v3, %v4964_v4 }
 0x465   :  { %4386 = vmatprep.subr.mxu1 %v5145_v1  ;;  %v787_v50 = vmul.f32 %v5042_v49, %v5030_v21  ;;  %v1078_v14 = vpop.permute.xlu0 %1077  ;;  %v1068_v17 = vpop.permute.xlu1 %1067 }
 0x467   :  { %4362 = vmatmul.mubr.msk.f32.gmra.mrb[8].mxu1 %vm510_vm5, %v543_v42 }
 0x468   :  { %4387 = vmatpush3.msk.msra.mxu1 %vm562_vm7, %v794_v44  ;;  %4364 = vmatprep.mubr.msk.f32.mxu1 %vm5144_vm0, %v5145_v1  ;;  %v5044_v53 = vpop.eup %5043 }
 0x469   :  { %4408 = vmatprep.subr.mxu1 %v5145_v1  ;;  %v788_v55 = vmul.f32 %v5044_v53, %v5032_v24  ;;  %v1070_v18 = vpop.permute.xlu0 %1069  ;;  %v1072_v19 = vpop.permute.xlu1 %1071 }
 0x46b   :  { %4365 = vmatmul.mubr.msk.f32.gmra.mrb[10].mxu1 %vm510_vm5, %v544_v45 }
 0x46c   :  { %4388 = vmatprep.mubr.msk.f32.mxu1 %vm5144_vm0, %v5145_v1 }
 0x46f   :  { %4389 = vmatmul.mubr.msk.f32.vlgmr.msra.gmra.mrb[12].mxu1 %vm510_vm5, %v786_v48 }
 0x470   :  { %4391 = vmatprep.mubr.msk.f32.mxu1 %vm5144_vm0, %v5145_v1  ;;  %4409 = vmatpush3.msra.mxu1 %v645_v57 }
 0x471   :  { %4804 = vmatprep.subr.bf16.mxu1 %v5142_v0 }
 0x473   :  { %4392 = vmatmul.mubr.msk.f32.gmra.mrb[14].mxu1 %vm510_vm5, %v787_v50 }
 0x474   :  { %4394 = vmatprep.mubr.msk.f32.mxu1 %vm5144_vm0, %v5145_v1 }
 0x477   :  { %4395 = vmatmul.mubr.msk.f32.gmra.mrb[16].mxu1 %vm510_vm5, %v788_v55 }
 0x478   :  { %4410 = vmatprep.mubr.msk.f32.mxu1 %vm5144_vm0, %v5145_v1 }
 0x536   :  { %v631_v59 = vpop.f32.mrb[6].mxu1 }
 0x537   :  { %v4360_v60 = vpop.f32.mrb[7].mxu1  ;;  %4411 = vmatmul.mubr.msk.f32.vlgmr.msra.gmra.mrb[18].mxu1 %vm411_vm3, %v631_v59 }
 0x538   :  { %4413 = vmatprep.mubr.msk.f32.mxu1 %vm5144_vm0, %v5145_v1 }
 0x53a   :  { %v636_v62 = vpop.f32.mrb[8].mxu1 }
 0x53b   :  { %v4363_v2 = vpop.f32.mrb[9].mxu1  ;;  %4414 = vmatmul.mubr.msk.f32.gmra.mrb[20].mxu1 %vm411_vm3, %v636_v62 }
 0x53c   :  { %4416 = vmatprep.mubr.msk.f32.mxu1 %vm5144_vm0, %v5145_v1 }
 0x53e   :  { %v641_v5 = vpop.f32.mrb[10].mxu1 }
 0x53f   :  { %v4366_v6 = vpop.f32.mrb[11].mxu1  ;;  %4417 = vmatmul.mubr.msk.f32.gmra.mrb[22].mxu1 %vm411_vm3, %v641_v5 }
 0x540   :  { %4440 = vmatprep.mubr.msk.f32.mxu1 %vm5144_vm0, %v5145_v1 }
 0x542   :  { %v874_v8 = vpop.f32.mrb[12].mxu1 }
 0x543   :  { %v4390_v9 = vpop.f32.mrb[13].mxu1  ;;  %4400 = vmatmul.mubr.msk.f32.vlgmr.msra.gmra.mrb[18].mxu0 %vm411_vm3, %v874_v8 }
 0x544   :  { %4803 = vmatpush3.bf16.xpose.msk.msra.mxu0 %vm5284_vm4, %v4801_v7  ;;  %4402 = vmatprep.mubr.msk.f32.mxu0 %vm5144_vm0, %v5145_v1 }
 0x545   :  { %4423 = vmatprep.subr.mxu0 %v5145_v1 }
 0x546   :  { %v879_v10 = vpop.f32.mrb[14].mxu1 }
 0x547   :  { %v4393_v12 = vpop.f32.mrb[15].mxu1  ;;  %4403 = vmatmul.mubr.msk.f32.gmra.mrb[20].mxu0 %vm411_vm3, %v879_v10 }
 0x548   :  { %4405 = vmatprep.mubr.msk.f32.mxu0 %vm5144_vm0, %v5145_v1 }
 0x54a   :  { %v884_v13 = vpop.f32.mrb[16].mxu1 }
 0x54b   :  { %v4396_v15 = vpop.f32.mrb[17].mxu1  ;;  %4406 = vmatmul.mubr.msk.f32.gmra.mrb[22].mxu0 %vm411_vm3, %v884_v13 }
 0x54c   :  { %4424 = vmatpush3.xpose.msk.msra.mxu0 %vm411_vm3, %v1078_v14  ;;  %4425 = vmatprep.mubr.msk.f32.mxu0 %vm5144_vm0, %v5145_v1 }
 0x54d   :  { %4449 = vmatprep.subr.mxu0 %v5145_v1 }
 0x54f   :  { %4426 = vmatmul.mubr.msk.f32.vlgmr.msra.gmra.mrb[24].mxu0 %vm411_vm3, %v1068_v17 }
 0x550   :  { %4428 = vmatprep.mubr.msk.f32.mxu0 %vm5144_vm0, %v5145_v1 }
 0x553   :  { %4429 = vmatmul.mubr.msk.f32.gmra.mrb[26].mxu0 %vm411_vm3, %v1070_v18 }
 0x554   :  { %4431 = vmatprep.mubr.msk.f32.mxu0 %vm5144_vm0, %v5145_v1 }
 0x557   :  { %4432 = vmatmul.mubr.msk.f32.gmra.mrb[28].mxu0 %vm411_vm3, %v1072_v19 }
 0x558   :  { %4451 = vmatprep.mubr.msk.f32.mxu0 %vm5144_vm0, %v5145_v1 }
 0x60a   :  { %v1053_v20 = vpop.f32.mrb[18].mxu1 }
 0x60b   :  { %v4412_v21 = vpop.f32.mrb[19].mxu1 }
 0x60e   :  { %v1058_v23 = vpop.f32.mrb[20].mxu1 }
 0x60f   :  { %v4415_v24 = vpop.f32.mrb[21].mxu1 }
 0x612   :  { %v1063_v25 = vpop.f32.mrb[22].mxu1 }
 0x613   :  { %v4418_v26 = vpop.f32.mrb[23].mxu1 }
 0x616   :  { %v964_v27 = vpop.f32.mrb[18].mxu0 }
 0x617   :  { %v5442_v28 = vadd.f32 %v1053_v20, %v964_v27  ;;  %v4401_v29 = vpop.f32.mrb[19].mxu0 }
 0x61a   :  { %v969_v30 = vpop.f32.mrb[20].mxu0 }
 0x61b   :  { %v5444_v31 = vadd.f32 %v1058_v23, %v969_v30  ;;  %v4404_v32 = vpop.f32.mrb[21].mxu0 }
 0x61e   :  { %v974_v34 = vpop.f32.mrb[22].mxu0 }
 0x61f   :  { %v5446_v35 = vadd.f32 %v1063_v25, %v974_v34  ;;  %v4407_v36 = vpop.f32.mrb[23].mxu0 }
 0x622   :  { %v1157_v37 = vpop.f32.mrb[24].mxu0 }
 0x623   :  { %v1171_v38 = vmul.f32 0.35355338, %v1157_v37  ;;  %v4427_v39 = vpop.f32.mrb[25].mxu0 }
 0x624   :  { %v1309_v39 = vld [vmem:[%s5404_s14 + $0x10] sm:$0xff] }
 0x625   :  { %v1174_v41 = vadd.f32 %v1171_v38, %v5325_v11  ;;  %4450 = vmatpush3.msra.mxu0 %v1309_v39 }
 0x626   :  { %v1162_v42 = vpop.f32.mrb[26].mxu0  ;;  %4811 = vmatprep.subr.bf16.mxu0 %v5142_v0 }
 0x627   :  { %v1172_v43 = vmul.f32 0.35355338, %v1162_v42  ;;  %v4430_v44 = vpop.f32.mrb[27].mxu0  ;;  %v1177_v45 = vsel %vm510_vm5, %v1174_v41, -inf }
 0x628   :  { %1178 = vmax.xlane.f32.xlu0 %v1177_v45 }
 0x629   :  { %v1175_v47 = vadd.f32 %v1172_v43, %v5329_v16 }
 0x62a   :  { %v1167_v48 = vpop.f32.mrb[28].mxu0 }
 0x62b   :  { %v1173_v49 = vmul.f32 0.35355338, %v1167_v48  ;;  %v4433_v50 = vpop.f32.mrb[29].mxu0  ;;  %v1180_v53 = vsel %vm510_vm5, %v1175_v47, -inf }
 0x62c   :  { %1181 = vmax.xlane.f32.xlu1 %v1180_v53 }
 0x62d   :  { %v1176_v55 = vadd.f32 %v1173_v49, %v5334_v22 }
 0x62f   :  { %v1183_v57 = vsel %vm517_vm6, %v1176_v55, -inf }
 0x630   :  { %1184 = vmax.xlane.f32.xlu0 %v1183_v57 }
 0x63d   :  { %4967 = vrot.lane.b32.xlu1 %v5264_v54, %s5161_s15 }
 0x641   :  { %4972 = vrot.lane.b32.xlu1 %v5264_v54, %s5162_s16 }
 0x6b5   :  { %v1179_v58 = vpop.xlane.xlu0 %1178 }
 0x6b6   :  { %v1186_v59 = vsub.f32 %v1174_v41, %v1179_v58 }
 0x6b8   :  { %v1189_v60 = vmul.f32 1.442695, %v1186_v59 }
 0x6b9   :  { %v1182_v62 = vpop.xlane.xlu1 %1181 }
 0x6ba   :  { %5045 = vpow2.f32 %v1189_v60  ;;  %v1187_v63 = vsub.f32 %v1175_v47, %v1182_v62 }
 0x6bc   :  { %v1191_v2 = vmul.f32 1.442695, %v1187_v63 }
 0x6bd   :  { %v4968_v3 = vpop.permute.xlu1 %4967  ;;  %v1185_v12 = vpop.xlane.xlu0 %1184 }
 0x6be   :  { %5047 = vpow2.f32 %v1191_v2  ;;  %v4970_v4 = vunpack.i.h.bf16 %v4968_v3  ;;  %v4969_v5 = vunpack.i.l.bf16 %v4968_v3  ;;  %v1188_v13 = vsub.f32 %v1176_v55, %v1185_v12 }
 0x6c0   :  { %v4805_v6 = vpack.c.bf16 %v4970_v4, %v4969_v5  ;;  %v1193_v14 = vmul.f32 1.442695, %v1188_v13 }
 0x6c1   :  { %v4973_v18 = vpop.permute.xlu1 %4972 }
 0x6c2   :  { %4806 = vmatpush3.bf16.msra.mxu1 %v4805_v6  ;;  %5049 = vpow2.f32 %v1193_v14  ;;  %v4974_v23 = vunpack.i.l.bf16 %v4973_v18 }
 0x6c3   :  { %4438 = vmatprep.subr.mxu1 %v5145_v1 }
 0x6c4   :  { %v5046_v7 = vpop.eup %5045 }
 0x6c5   :  { %v1195_v8 = vsel %vm510_vm5, %v5046_v7, 0.0 }
 0x6c6   :  { %1196 = vadd.xlane.f32.xlu0 %v1195_v8 }
 0x6c8   :  { %v5048_v9 = vpop.eup %5047 }
 0x6c9   :  { %v1198_v10 = vsel %vm510_vm5, %v5048_v9, 0.0 }
 0x6ca   :  { %1199 = vadd.xlane.f32.xlu1 %v1198_v10 }
 0x6cc   :  { %v5050_v15 = vpop.eup %5049 }
 0x6cd   :  { %v1201_v17 = vsel %vm517_vm6, %v5050_v15, 0.0 }
 0x6db   :  { %1412 = vrot.lane.b32.xlu1 %v5266_v56, %s5162_s16 }
 0x6dc   :  { %1214 = vrot.lane.b32.xlu0 %v5266_v56, %s5161_s15 }
 0x6df   :  { %1404 = vrot.lane.b32.xlu1 %v5260_v52, %s5163_s17  ;;  %v4975_v52 = vunpack.i.h.bf16 %v4973_v18 }
 0x6e1   :  { %v4808_v26 = vpack.c.bf16 %v4975_v52, %v4974_v23 }
 0x6fb   :  { %1202 = vadd.xlane.f32.xlu0 %v1201_v17 }
 0x711   :  { %1402 = vrot.lane.b32.xlu0 %v5258_v51, %s5163_s17 }
 0x715   :  { %1406 = vrot.lane.b32.xlu0 %v5266_v56, %s5163_s17 }
 0x753   :  { %v1197_v19 = vpop.xlane.xlu0 %1196 }
 0x754   :  { %5051 = vrcp.f32 %v1197_v19 }
 0x757   :  { %v1200_v20 = vpop.xlane.xlu1 %1199  ;;  %v1215_v21 = vpop.permute.xlu0 %1214 }
 0x758   :  { %5053 = vrcp.f32 %v1200_v20  ;;  %4439 = vmatpush3.msk.msra.mxu1 %vm562_vm7, %v1215_v21 }
 0x759   :  { %4807 = vmatprep.subr.bf16.mxu1 %v5142_v0 }
 0x75b   :  { %v1413_v29 = vpop.permute.xlu1 %1412 }
 0x75e   :  { %v5052_v24 = vpop.eup %5051 }
 0x75f   :  { %v1207_v25 = vmul.f32 %v5052_v24, %v5046_v7  ;;  %v1405_v37 = vpop.permute.xlu1 %1404 }
 0x761   :  { %4441 = vmatmul.mubr.msk.f32.vlgmr.msra.gmra.mrb[24].mxu1 %vm510_vm5, %v1207_v25 }
 0x762   :  { %v5054_v51 = vpop.eup %5053  ;;  %4810 = vmatpush3.bf16.xpose.msk.msra.mxu1 %vm5284_vm4, %v4808_v26  ;;  %4443 = vmatprep.mubr.msk.f32.mxu1 %vm5144_vm0, %v5145_v1 }
 0x763   :  { %v1208_v27 = vmul.f32 %v5054_v51, %v5048_v9  ;;  %4464 = vmatprep.subr.mxu1 %v5145_v1 }
 0x765   :  { %4444 = vmatmul.mubr.msk.f32.gmra.mrb[26].mxu1 %vm510_vm5, %v1208_v27 }
 0x766   :  { %4446 = vmatprep.mubr.msk.f32.mxu1 %vm5144_vm0, %v5145_v1 }
 0x76a   :  { %4465 = vmatpush3.xpose.msk.msra.mxu1 %vm411_vm3, %v1413_v29 }
 0x76b   :  { %4490 = vmatprep.subr.mxu1 %v5145_v1 }
 0x788   :  { %v1203_v30 = vpop.xlane.xlu0 %1202 }
 0x789   :  { %5055 = vrcp.f32 %v1203_v30 }
 0x78c   :  { %v1403_v36 = vpop.permute.xlu0 %1402 }
 0x790   :  { %v1407_v38 = vpop.permute.xlu0 %1406 }
 0x793   :  { %v5056_v32 = vpop.eup %5055 }
 0x794   :  { %v1209_v34 = vmul.f32 %v5056_v32, %v5050_v15 }
 0x796   :  { %4447 = vmatmul.mubr.msk.f32.gmra.mrb[28].mxu1 %vm510_vm5, %v1209_v34 }
 0x797   :  { %4466 = vmatprep.mubr.msk.f32.mxu1 %vm5144_vm0, %v5145_v1 }
 0x79a   :  { %4467 = vmatmul.mubr.msk.f32.vlgmr.msra.gmra.mrb[30].mxu1 %vm411_vm3, %v1403_v36 }
 0x79b   :  { %4469 = vmatprep.mubr.msk.f32.mxu1 %vm5144_vm0, %v5145_v1 }
 0x79e   :  { %4470 = vmatmul.mubr.msk.f32.gmra.mrb[32].mxu1 %vm411_vm3, %v1405_v37 }
 0x79f   :  { %4472 = vmatprep.mubr.msk.f32.mxu1 %vm5144_vm0, %v5145_v1 }
 0x7a2   :  { %4473 = vmatmul.mubr.msk.f32.gmra.mrb[34].mxu1 %vm411_vm3, %v1407_v38 }
 0x7a3   :  { %4492 = vmatprep.mubr.msk.f32.mxu1 %vm5144_vm0, %v5145_v1 }
 0x834   :  { %v1295_v41 = vpop.f32.mrb[24].mxu1 }
 0x835   :  { %v4442_v42 = vpop.f32.mrb[25].mxu1  ;;  %4452 = vmatmul.mubr.msk.f32.vlgmr.msra.gmra.mrb[30].mxu0 %vm411_vm3, %v1295_v41 }
 0x836   :  { %4454 = vmatprep.mubr.msk.f32.mxu0 %vm5144_vm0, %v5145_v1 }
 0x838   :  { %v1300_v43 = vpop.f32.mrb[26].mxu1 }
 0x839   :  { %v4445_v44 = vpop.f32.mrb[27].mxu1  ;;  %4455 = vmatmul.mubr.msk.f32.gmra.mrb[32].mxu0 %vm411_vm3, %v1300_v43 }
 0x83a   :  { %4457 = vmatprep.mubr.msk.f32.mxu0 %vm5144_vm0, %v5145_v1 }
 0x869   :  { %v1305_v45 = vpop.f32.mrb[28].mxu1 }
 0x86a   :  { %v4448_v47 = vpop.f32.mrb[29].mxu1  ;;  %4458 = vmatmul.mubr.msk.f32.gmra.mrb[34].mxu0 %vm411_vm3, %v1305_v45 }
 0x86b   :  { %4481 = vmatprep.mubr.msk.f32.mxu0 %vm5144_vm0, %v5145_v1 }
 0x86d   :  { %v1492_v48 = vpop.f32.mrb[30].mxu1 }
 0x86e   :  { %v1506_v49 = vmul.f32 0.35355338, %v1492_v48  ;;  %v4468_v50 = vpop.f32.mrb[31].mxu1 }
 0x870   :  { %v1509_v53 = vadd.f32 %v1506_v49, %v5325_v11 }
 0x871   :  { %v1497_v55 = vpop.f32.mrb[32].mxu1 }
 0x872   :  { %v1507_v57 = vmul.f32 0.35355338, %v1497_v55  ;;  %v4471_v58 = vpop.f32.mrb[33].mxu1  ;;  %v1512_v59 = vsel %vm510_vm5, %v1509_v53, -inf }
 0x873   :  { %1513 = vmax.xlane.f32.xlu1 %v1512_v59 }
 0x874   :  { %v1510_v60 = vadd.f32 %v1507_v57, %v5329_v16 }
 0x875   :  { %v1502_v62 = vpop.f32.mrb[34].mxu1 }
 0x876   :  { %v1508_v63 = vmul.f32 0.35355338, %v1502_v62  ;;  %v4474_v2 = vpop.f32.mrb[35].mxu1  ;;  %v1515_v3 = vsel %vm510_vm5, %v1510_v60, -inf }
 0x877   :  { %1516 = vmax.xlane.f32.xlu0 %v1515_v3 }
 0x878   :  { %v1511_v4 = vadd.f32 %v1508_v63, %v5334_v22 }
 0x87a   :  { %v1518_v5 = vsel %vm517_vm6, %v1511_v4, -inf }
 0x87b   :  { %1519 = vmax.xlane.f32.xlu0 %v1518_v5 }
 0x900   :  { %v1514_v11 = vpop.xlane.xlu1 %1513 }
 0x901   :  { %v1521_v6 = vsub.f32 %v1509_v53, %v1514_v11  ;;  %v4033_v53 = vld [vmem:[%s3946_s22] ss:$0 sm:$0xff]  ;;  %s3954_s22 = sld [smem:[%s6057_s0 + %s5174_s19]]   ;;  %s5189_s19 = smov 31  }
 0x903   :  { %v1524_v7 = vmul.f32 1.442695, %v1521_v6 }
 0x904   :  { %v1517_v8 = vpop.xlane.xlu0 %1516 }
 0x905   :  { %5057 = vpow2.f32 %v1524_v7  ;;  %v1522_v9 = vsub.f32 %v1510_v60, %v1517_v8 }
 0x907   :  { %v1526_v10 = vmul.f32 1.442695, %v1522_v9 }
 0x908   :  { %v1520_v12 = vpop.xlane.xlu0 %1519  ;;  %v1385_v16 = vpop.f32.mrb[30].mxu0 }
 0x909   :  { %5059 = vpow2.f32 %v1526_v10  ;;  %v1523_v13 = vsub.f32 %v1511_v4, %v1520_v12  ;;  %v5515_v14 = vadd.f32 %v1385_v16, %v5442_v28  ;;  %v4453_v15 = vpop.f32.mrb[31].mxu0 }
 0x90b   :  { %v1528_v17 = vmul.f32 1.442695, %v1523_v13 }
 0x90c   :  { %v1390_v22 = vpop.f32.mrb[32].mxu0 }
 0x90d   :  { %5061 = vpow2.f32 %v1528_v17  ;;  %v5518_v18 = vadd.f32 %v1390_v22, %v5444_v31  ;;  %v4456_v19 = vpop.f32.mrb[33].mxu0  ;;  %v1644_v31 = vld [vmem:[%s5404_s14 + $0x18] sm:$0xff]  ;;  %s3953_s14 = sld [smem:[%s6057_s0 + %s5173_s11]]   ;;  %s5188_s11 = smov 30  }
 0x90e   :  { %4491 = vmatpush3.msra.mxu1 %v1644_v31  ;;  %v1813_v31 = vld [vmem:[%s3949_s26 + $0x10] sm:$0xff] }
 0x90f   :  { %v5058_v20 = vpop.eup %5057  ;;  %4820 = vmatprep.subr.bf16.mxu1 %v5142_v0 }
 0x910   :  { %v1530_v21 = vsel %vm510_vm5, %v5058_v20, 0.0 }
 0x911   :  { %1531 = vadd.xlane.f32.xlu1 %v1530_v21 }
 0x913   :  { %v5060_v52 = vpop.eup %5059 }
 0x914   :  { %v1533_v23 = vsel %vm510_vm5, %v5060_v52, 0.0 }
 0x915   :  { %1534 = vadd.xlane.f32.xlu0 %v1533_v23  ;;  %v1811_v23 = vld [vmem:[%s3949_s26] sm:$0xff] }
 0x917   :  { %v5062_v24 = vpop.eup %5061 }
 0x918   :  { %v1536_v28 = vsel %vm517_vm6, %v5062_v24, 0.0 }
 0x919   :  { %1537 = vadd.xlane.f32.xlu1 %v1536_v28 }
 0x92a   :  { %1549 = vrot.lane.b32.xlu1 %v5266_v56, %s5164_s18 }
 0x92b   :  { %4977 = vrot.lane.b32.xlu0 %v5264_v54, %s5164_s18 }
 0x93d   :  { %v1395_v25 = vpop.f32.mrb[34].mxu0 }
 0x93e   :  { %v1401_v26 = vadd.f32 %v1395_v25, %v5446_v35  ;;  %v4459_v51 = vpop.f32.mrb[35].mxu0  ;;  %v1814_v25 = vld [vmem:[%s3949_s26 + $0x18] sm:$0xff] }
 0x93f   :  { %v1914_v51 = vld [vmem:[%s5585_s3] sm:$0xff] }
 0x99e   :  { %v1532_v27 = vpop.xlane.xlu1 %1531 }
 0x99f   :  { %5063 = vrcp.f32 %v1532_v27  ;;  %v1915_v27 = vld [vmem:[%s5585_s3 + $0x8] sm:$0xff] }
 0x9a2   :  { %v1535_v29 = vpop.xlane.xlu0 %1534 }
 0x9a3   :  { %5065 = vrcp.f32 %v1535_v29  ;;  %v1916_v29 = vld [vmem:[%s5585_s3 + $0x10] sm:$0xff] }
 0x9a6   :  { %v1538_v30 = vpop.xlane.xlu1 %1537  ;;  %v4978_v32 = vpop.permute.xlu0 %4977 }
 0x9a7   :  { %v4980_v34 = vunpack.i.h.bf16 %v4978_v32  ;;  %v4979_v36 = vunpack.i.l.bf16 %v4978_v32  ;;  %5067 = vrcp.f32 %v1538_v30  ;;  %v4821_v30 = vpack.c.bf16 %v1915_v27, %v1914_v51  ;;  %v1917_v32 = vld [vmem:[%s5585_s3 + $0x18] sm:$0xff] }
 0x9a9   :  { %v4812_v56 = vpack.c.bf16 %v4980_v34, %v4979_v36  ;;  %v5064_v37 = vpop.eup %5063  ;;  %v4824_v34 = vpack.c.bf16 %v1917_v32, %v1916_v29  ;;  %v1918_v36 = vld [vmem:[%s5585_s3 + $0x20] sm:$0xff] }
 0x9aa   :  { %v1542_v54 = vmul.f32 %v5064_v37, %v5058_v20  ;;  %v1550_v38 = vpop.permute.xlu1 %1549 }
 0x9ab   :  { %4813 = vmatpush3.bf16.msra.mxu0 %v4812_v56  ;;  %v1919_v56 = vld [vmem:[%s5585_s3 + $0x28] sm:$0xff] }
 0x9ac   :  { %4479 = vmatprep.subr.mxu0 %v5145_v1  ;;  %v4827_v37 = vpack.c.bf16 %v1919_v56, %v1918_v36 }
 0x9ad   :  { %v5066_v39 = vpop.eup %5065 }
 0x9ae   :  { %v1543_v35 = vmul.f32 %v5066_v39, %v5060_v52 }
 0x9af   :  { %4480 = vmatpush3.msk.msra.mxu0 %vm562_vm7, %v1550_v38 }
 0x9b0   :  { %4482 = vmatmul.mubr.msk.f32.vlgmr.msra.gmra.mrb[36].mxu0 %vm510_vm5, %v1542_v54  ;;  %4814 = vmatprep.subr.bf16.mxu0 %v5142_v0 }
 0x9b1   :  { %4484 = vmatprep.mubr.msk.f32.mxu0 %vm5144_vm0, %v5145_v1  ;;  %v5068_v41 = vpop.eup %5067 }
 0x9b2   :  { %v1544_v42 = vmul.f32 %v5068_v41, %v5062_v24  ;;  %v1812_v24 = vld [vmem:[%s3949_s26 + $0x8] sm:$0xff]  ;;  %s3956_s26 = sld [smem:[%s6057_s0 + %s5175_s23]]   ;;  %s5190_s23 = smov 34  }
 0x9b3   :  { %v4815_v28 = vpack.c.bf16 %v1812_v24, %v1811_v23 }
 0x9b4   :  { %4485 = vmatmul.mubr.msk.f32.gmra.mrb[38].mxu0 %vm510_vm5, %v1543_v35 }
 0x9b5   :  { %4487 = vmatprep.mubr.msk.f32.mxu0 %vm5144_vm0, %v5145_v1  ;;  %4816 = vmatpush3.bf16.msra.mxu0 %v4815_v28 }
 0x9b6   :  { %4817 = vmatprep.subr.bf16.mxu0 %v5142_v0 }
 0x9b8   :  { %4488 = vmatmul.mubr.msk.f32.gmra.mrb[40].mxu0 %vm510_vm5, %v1544_v42 }
 0x9b9   :  { %4509 = vmatprep.mubr.msk.f32.mxu0 %vm5144_vm0, %v5145_v1 }
 0xa83   :  { %v1630_v43 = vpop.f32.mrb[36].mxu0 }
 0xa84   :  { %v4483_v44 = vpop.f32.mrb[37].mxu0  ;;  %4493 = vmatmul.mubr.msk.f32.vlgmr.msra.gmra.mrb[36].mxu1 %vm411_vm3, %v1630_v43 }
 0xa85   :  { %4495 = vmatprep.mubr.msk.f32.mxu1 %vm5144_vm0, %v5145_v1  ;;  %4822 = vmatpush3.bf16.msra.mxu1 %v4821_v30 }
 0xa86   :  { %4823 = vmatprep.subr.bf16.mxu1 %v5142_v0 }
 0xa87   :  { %v1635_v45 = vpop.f32.mrb[38].mxu0 }
 0xa88   :  { %v4486_v47 = vpop.f32.mrb[39].mxu0  ;;  %4496 = vmatmul.mubr.msk.f32.gmra.mrb[38].mxu1 %vm411_vm3, %v1635_v45 }
 0xa89   :  { %4498 = vmatprep.mubr.msk.f32.mxu1 %vm5144_vm0, %v5145_v1  ;;  %4825 = vmatpush3.bf16.msra.mxu1 %v4824_v34 }
 0xa8a   :  { %4826 = vmatprep.subr.bf16.mxu1 %v5142_v0 }
 0xa8b   :  { %v1640_v48 = vpop.f32.mrb[40].mxu0 }
 0xa8c   :  { %v4489_v49 = vpop.f32.mrb[41].mxu0  ;;  %4499 = vmatmul.mubr.msk.f32.gmra.mrb[40].mxu1 %vm411_vm3, %v1640_v48  ;;  %v4034_v48 = vld [vmem:[%s3947_s12] ss:$0 sm:$0xff]  ;;  %s3959_s12 = sld [smem:[%s6057_s0 + %s5180_s4]]  }
 0xa8d   :  { %4534 = vmatprep.mubr.msk.f32.mxu1 %vm5144_vm0, %v5145_v1  ;;  %4828 = vmatpush3.bf16.msra.mxu1 %v4827_v37 }
 0xa8e   :  { %4829 = vmatprep.subr.bf16.mxu1 %v5142_v0 }
 0xb57   :  { %v1720_v50 = vpop.f32.mrb[36].mxu1 }
 0xb58   :  { %v1734_v55 = vadd.f32 %v1720_v50, %v5515_v14  ;;  %v4494_v57 = vpop.f32.mrb[37].mxu1  ;;  %v4035_v50 = vld [vmem:[%s3948_s20] ss:$0 sm:$0xff]  ;;  %s3960_s20 = sld [smem:[%s6057_s0 + %s5181_s13]]  }
 0xb5a   :  { %v1744_v58 = vadd.f32 %v4033_v53, %v1734_v55 }
 0xb5b   :  { %v1725_v59 = vpop.f32.mrb[38].mxu1 }
 0xb5c   :  { %v1735_v60 = vadd.f32 %v1725_v59, %v5518_v18  ;;  %v4497_v62 = vpop.f32.mrb[39].mxu1  ;;  %v1747_v63 = vadd.f32 %v1744_v58, %v5237_v33 }
 0xb5e   :  { %v1745_v2 = vadd.f32 %v4033_v53, %v1735_v60  ;;  %v1750_v3 = vsel %vm312_vm2, %v1747_v63, 0.0 }
 0xb5f   :  { %1751 = vadd.xlane.f32.xlu1 %v1750_v3  ;;  %v1730_v4 = vpop.f32.mrb[40].mxu1 }
 0xb60   :  { %v1736_v5 = vadd.f32 %v1730_v4, %v1401_v26  ;;  %v4500_v11 = vpop.f32.mrb[41].mxu1  ;;  %v1748_v6 = vadd.f32 %v1745_v2, %v5243_v40  ;;  %v4818_v26 = vpack.c.bf16 %v1814_v25, %v1813_v31  ;;  %v1920_v4 = vld [vmem:[%s5585_s3 + $0x30] sm:$0xff] }
 0xb62   :  { %v1746_v7 = vadd.f32 %v4033_v53, %v1736_v5  ;;  %v1753_v8 = vsel %vm312_vm2, %v1748_v6, 0.0  ;;  %4819 = vmatpush3.bf16.msra.mxu0 %v4818_v26  ;;  %v1921_v5 = vld [vmem:[%s5585_s3 + $0x38] sm:$0xff]  ;;  %s5958_s3 = sld [smem:[%s6057_s0 + %s5179_s27]]  }
 0xb63   :  { %1754 = vadd.xlane.f32.xlu0 %v1753_v8  ;;  %4832 = vmatprep.subr.bf16.mxu0 %v5142_v0  ;;  %v4830_v11 = vpack.c.bf16 %v1921_v5, %v1920_v4 }
 0xb64   :  { %v1749_v9 = vadd.f32 %v1746_v7, %v5249_v46 }
 0xb65   :  { %4831 = vmatpush3.bf16.msra.mxu1 %v4830_v11  ;;  %v4044_v11 = vld [vmem:[%s3953_s14] ss:$0 sm:$0xff]  ;;  %s3967_s14 = sld [smem:[%s6057_s0 + %s5188_s11]]  }
 0xb66   :  { %v1757_v10 = vsel %vm1756_vm8, %v1749_v9, 0.0  ;;  %4838 = vmatprep.subr.bf16.mxu1 %v5142_v0 }
 0xb67   :  { %1758 = vadd.xlane.f32.xlu0 %v1757_v10 }
 0xbec   :  { %v1752_v33 = vpop.xlane.xlu1 %1751 }
 0xbed   :  { %v1761_v12 = vmul.f32 0.03125, %v1752_v33 }
 0xbef   :  { %v5562_v16 = vsub.f32 %v1747_v63, %v1761_v12 }
 0xbf0   :  { %v1755_v13 = vpop.xlane.xlu0 %1754 }
 0xbf1   :  { %v1762_v14 = vmul.f32 0.03125, %v1755_v13  ;;  %v1767_v15 = vmul.f32 %v5562_v16, %v5562_v16 }
 0xbf3   :  { %v5566_v40 = vsub.f32 %v1748_v6, %v1762_v14  ;;  %v1770_v17 = vsel %vm312_vm2, %v1767_v15, 0.0  ;;  %v4036_v6 = vld [vmem:[%s3950_s24] ss:$0 sm:$0xff]  ;;  %s3962_s24 = sld [smem:[%s6057_s0 + %s5182_s21]]  }
 0xbf4   :  { %1771 = vadd.xlane.f32.xlu1 %v1770_v17  ;;  %v1759_v22 = vpop.xlane.xlu0 %1758 }
 0xbf5   :  { %v1763_v18 = vmul.f32 0.03125, %v1759_v22  ;;  %v1768_v46 = vmul.f32 %v5566_v40, %v5566_v40  ;;  %v4040_v22 = vld [vmem:[%s3952_s28] ss:$0 sm:$0xff] }
 0xbf7   :  { %v5571_v19 = vsub.f32 %v1749_v9, %v1763_v18  ;;  %v1773_v20 = vsel %vm312_vm2, %v1768_v46, 0.0 }
 0xbf8   :  { %1774 = vadd.xlane.f32.xlu0 %v1773_v20 }
 0xbf9   :  { %v1769_v21 = vmul.f32 %v5571_v19, %v5571_v19 }
 0xbfb   :  { %v1776_v52 = vsel %vm1756_vm8, %v1769_v21, 0.0 }
 0xbfc   :  { %1777 = vadd.xlane.f32.xlu1 %v1776_v52 }
 0xc81   :  { %v1772_v54 = vpop.xlane.xlu1 %1771 }
 0xc82   :  { %v1779_v38 = vmul.f32 0.03125, %v1772_v54 }
 0xc84   :  { %v1782_v39 = vadd.f32 1e-05, %v1779_v38 }
 0xc85   :  { %v1775_v35 = vpop.xlane.xlu0 %1774 }
 0xc86   :  { %5069 = vrsqrt.f32 %v1782_v39  ;;  %v1780_v41 = vmul.f32 0.03125, %v1775_v35 }
 0xc88   :  { %v1783_v42 = vadd.f32 1e-05, %v1780_v41 }
 0xc89   :  { %v1778_v43 = vpop.xlane.xlu1 %1777 }
 0xc8a   :  { %5071 = vrsqrt.f32 %v1783_v42  ;;  %v1781_v44 = vmul.f32 0.03125, %v1778_v43 }
 0xc8c   :  { %v1784_v45 = vadd.f32 1e-05, %v1781_v44 }
 0xc8e   :  { %5073 = vrsqrt.f32 %v1784_v45 }
 0xc90   :  { %v5070_v47 = vpop.eup %5069 }
 0xc91   :  { %v1788_v49 = vmul.f32 %v5070_v47, %v5562_v16  ;;  %v2081_v47 = vld [vmem:[%s3955_s5] sm:$0xff] }
 0xc93   :  { %v1798_v53 = vmul.f32 %v4034_v48, %v1788_v49 }
 0xc94   :  { %v5072_v55 = vpop.eup %5071 }
 0xc95   :  { %v1808_v57 = vadd.f32 %v4035_v50, %v1798_v53  ;;  %v1789_v58 = vmul.f32 %v5072_v55, %v5566_v40  ;;  %v2084_v53 = vld [vmem:[%s3955_s5 + $0x18] sm:$0xff] }
 0xc97   :  { %4510 = vmatmul.mubr.msk.f32.vlgmr.msra.gmra.mrb[42].mxu0 %vm312_vm2, %v1808_v57  ;;  %v1799_v59 = vmul.f32 %v4034_v48, %v1789_v58 }
 0xc98   :  { %v5074_v60 = vpop.eup %5073  ;;  %4512 = vmatprep.mubr.msk.f32.mxu0 %vm5144_vm0, %v5145_v1 }
 0xc99   :  { %v1809_v62 = vadd.f32 %v4035_v50, %v1799_v59  ;;  %v1790_v63 = vmul.f32 %v5074_v60, %v5571_v19 }
 0xc9b   :  { %4513 = vmatmul.mubr.msk.f32.gmra.mrb[44].mxu0 %vm312_vm2, %v1809_v62  ;;  %v1800_v2 = vmul.f32 %v4034_v48, %v1790_v63  ;;  %v2082_v48 = vld [vmem:[%s3955_s5 + $0x8] sm:$0xff] }
 0xc9c   :  { %4515 = vmatprep.mubr.msk.f32.mxu0 %vm5144_vm0, %v5145_v1  ;;  %v4833_v49 = vpack.c.bf16 %v2082_v48, %v2081_v47  ;;  %v5731_v48 = vld [vmem:[%s5322_s6 + $0x8] sm:$0xff] }
 0xc9d   :  { %v1810_v3 = vadd.f32 %v4035_v50, %v1800_v2  ;;  %v2083_v50 = vld [vmem:[%s3955_s5 + $0x10] sm:$0xff]  ;;  %s3970_s5 = sld [smem:[%s6057_s0 + %s5187_s29]]  }
 0xc9e   :  { %4834 = vmatpush3.bf16.msra.mxu0 %v4833_v49  ;;  %v4836_v55 = vpack.c.bf16 %v2084_v53, %v2083_v50 }
 0xc9f   :  { %4516 = vmatmul.mubr.msk.f32.gmra.mrb[46].mxu0 %vm312_vm2, %v1810_v3  ;;  %4835 = vmatprep.subr.bf16.mxu0 %v5142_v0 }
 0xca0   :  { %4551 = vmatprep.mubr.msk.f32.mxu0 %vm5144_vm0, %v5145_v1 }
 0xca2   :  { %4837 = vmatpush3.bf16.msra.mxu0 %v4836_v55 }
 0xca3   :  { %4842 = vmatprep.subr.bf16.mxu0 %v5142_v0 }
 0xd6a   :  { %v1897_v7 = vpop.f32.mrb[42].mxu0 }
 0xd6b   :  { %v1898_v8 = vadd.f32 %v4036_v6, %v1897_v7  ;;  %v4511_v9 = vpop.f32.mrb[43].mxu0  ;;  %v4045_v7 = vld [vmem:[%s3954_s22] ss:$0 sm:$0xff]  ;;  %s3968_s22 = sld [smem:[%s6057_s0 + %s5189_s19]]  }
 0xd6d   :  { %v1911_v10 = vmax.f32 %v1898_v8, 0.0 }
 0xd6e   :  { %v1902_v33 = vpop.f32.mrb[44].mxu0 }
 0xd6f   :  { %v1903_v12 = vadd.f32 %v4036_v6, %v1902_v33  ;;  %v4514_v16 = vpop.f32.mrb[45].mxu0  ;;  %4535 = vmatmul.mubr.msk.f32.vlgmr.msra.gmra.mrb[42].mxu1 %vm1929_vm9, %v1911_v10 }
 0xd70   :  { %4537 = vmatprep.mubr.msk.f32.mxu1 %vm5144_vm0, %v5145_v1 }
 0xd71   :  { %v1912_v13 = vmax.f32 %v1903_v12, 0.0 }
 0xd72   :  { %v1907_v14 = vpop.f32.mrb[46].mxu0 }
 0xd73   :  { %v1908_v15 = vadd.f32 %v4036_v6, %v1907_v14  ;;  %v4517_v40 = vpop.f32.mrb[47].mxu0  ;;  %4538 = vmatmul.mubr.msk.f32.gmra.mrb[44].mxu1 %vm1929_vm9, %v1912_v13 }
 0xd74   :  { %4540 = vmatprep.mubr.msk.f32.mxu1 %vm5144_vm0, %v5145_v1 }
 0xd75   :  { %v1913_v17 = vmax.f32 %v1908_v15, 0.0 }
 0xd77   :  { %4541 = vmatmul.mubr.msk.f32.gmra.mrb[46].mxu1 %vm1929_vm9, %v1913_v17 }
 0xd78   :  { %4566 = vmatprep.mubr.msk.f32.mxu1 %vm5144_vm0, %v5145_v1 }
 0xe42   :  { %v2005_v18 = vpop.f32.mrb[42].mxu1 }
 0xe43   :  { %v2006_v46 = vadd.f32 %v4040_v22, %v2005_v18  ;;  %v4536_v19 = vpop.f32.mrb[43].mxu1  ;;  %v4046_v18 = vld [vmem:[%s3956_s26] ss:$0 sm:$0xff]  ;;  %s3971_s26 = sld [smem:[%s6057_s0 + %s5190_s23]]  }
 0xe45   :  { %v2019_v20 = vadd.f32 %v2006_v46, %v1808_v57 }
 0xe46   :  { %v2010_v21 = vpop.f32.mrb[44].mxu1 }
 0xe47   :  { %v2011_v52 = vadd.f32 %v4040_v22, %v2010_v21  ;;  %v4539_v23 = vpop.f32.mrb[45].mxu1  ;;  %v2022_v24 = vsel %vm312_vm2, %v2019_v20, 0.0 }
 0xe48   :  { %2023 = vadd.xlane.f32.xlu0 %v2022_v24 }
 0xe49   :  { %v2020_v28 = vadd.f32 %v2011_v52, %v1809_v62 }
 0xe4a   :  { %v2015_v31 = vpop.f32.mrb[46].mxu1 }
 0xe4b   :  { %v2016_v25 = vadd.f32 %v4040_v22, %v2015_v31  ;;  %v4542_v26 = vpop.f32.mrb[47].mxu1  ;;  %v2025_v51 = vsel %vm312_vm2, %v2020_v28, 0.0 }
 0xe4c   :  { %2026 = vadd.xlane.f32.xlu1 %v2025_v51 }
 0xe4d   :  { %v2021_v27 = vadd.f32 %v2016_v25, %v1810_v3 }
 0xe4f   :  { %v2028_v29 = vsel %vm1756_vm8, %v2021_v27, 0.0 }
 0xe50   :  { %2029 = vadd.xlane.f32.xlu0 %v2028_v29 }
 0xed5   :  { %v2024_v30 = vpop.xlane.xlu0 %2023 }
 0xed6   :  { %v2031_v32 = vmul.f32 0.03125, %v2024_v30 }
 0xed8   :  { %v2034_v34 = vsub.f32 %v2019_v20, %v2031_v32 }
 0xed9   :  { %v2027_v36 = vpop.xlane.xlu1 %2026 }
 0xeda   :  { %v2032_v56 = vmul.f32 0.03125, %v2027_v36  ;;  %v2037_v37 = vmul.f32 %v2034_v34, %v2034_v34 }
 0xedc   :  { %v2035_v54 = vsub.f32 %v2020_v28, %v2032_v56  ;;  %v2040_v38 = vsel %vm312_vm2, %v2037_v37, 0.0 }
 0xedd   :  { %2041 = vadd.xlane.f32.xlu1 %v2040_v38  ;;  %v2030_v39 = vpop.xlane.xlu0 %2029 }
 0xede   :  { %v2033_v35 = vmul.f32 0.03125, %v2030_v39  ;;  %v2038_v41 = vmul.f32 %v2035_v54, %v2035_v54 }
 0xee0   :  { %v2036_v42 = vsub.f32 %v2021_v27, %v2033_v35  ;;  %v2043_v43 = vsel %vm312_vm2, %v2038_v41, 0.0  ;;  %v5726_v41 = vld [vmem:[%s5322_s6] sm:$0xff] }
 0xee1   :  { %2044 = vadd.xlane.f32.xlu0 %v2043_v43 }
 0xee2   :  { %v2039_v44 = vmul.f32 %v2036_v42, %v2036_v42 }
 0xee4   :  { %v2046_v45 = vsel %vm1756_vm8, %v2039_v44, 0.0 }
 0xee5   :  { %2047 = vadd.xlane.f32.xlu1 %v2046_v45 }
 0xf6a   :  { %v2042_v57 = vpop.xlane.xlu1 %2041 }
 0xf6b   :  { %v2049_v58 = vmul.f32 0.03125, %v2042_v57 }
 0xf6d   :  { %v2052_v59 = vadd.f32 1e-05, %v2049_v58  ;;  %v5736_v58 = vld [vmem:[%s5322_s6 + $0x10] sm:$0x3] }
 0xf6e   :  { %v2045_v60 = vpop.xlane.xlu0 %2044 }
 0xf6f   :  { %5075 = vrsqrt.f32 %v2052_v59  ;;  %v2050_v62 = vmul.f32 0.03125, %v2045_v60 }
 0xf71   :  { %v2053_v63 = vadd.f32 1e-05, %v2050_v62 }
 0xf72   :  { %v2048_v2 = vpop.xlane.xlu1 %2047 }
 0xf73   :  { %5077 = vrsqrt.f32 %v2053_v63  ;;  %v2051_v3 = vmul.f32 0.03125, %v2048_v2 }
 0xf75   :  { %v2054_v4 = vadd.f32 1e-05, %v2051_v3 }
 0xf77   :  { %5079 = vrsqrt.f32 %v2054_v4 }
 0xf79   :  { %v5076_v5 = vpop.eup %5075 }
 0xf7a   :  { %v2058_v6 = vmul.f32 %v5076_v5, %v2034_v34 }
 0xf7c   :  { %v2068_v8 = vmul.f32 %v4044_v11, %v2058_v6 }
 0xf7d   :  { %v5078_v9 = vpop.eup %5077 }
 0xf7e   :  { %v5649_v10 = vadd.f32 %v4045_v7, %v2068_v8  ;;  %v2059_v33 = vmul.f32 %v5078_v9, %v2035_v54 }
 0xf80   :  { %4552 = vmatmul.mubr.msk.f32.vlgmr.msra.gmra.mrb[48].mxu0 %vm312_vm2, %v5649_v10  ;;  %v2069_v12 = vmul.f32 %v4044_v11, %v2059_v33 }
 0xf81   :  { %v5080_v16 = vpop.eup %5079  ;;  %4554 = vmatprep.mubr.msk.f32.mxu0 %vm5144_vm0, %v5145_v1 }
 0xf82   :  { %v5655_v13 = vadd.f32 %v4045_v7, %v2069_v12  ;;  %v2060_v14 = vmul.f32 %v5080_v16, %v2036_v42 }
 0xf84   :  { %4555 = vmatmul.mubr.msk.f32.gmra.mrb[50].mxu0 %vm312_vm2, %v5655_v13  ;;  %v2070_v15 = vmul.f32 %v4044_v11, %v2060_v14 }
 0xf85   :  { %4557 = vmatprep.mubr.msk.f32.mxu0 %vm5144_vm0, %v5145_v1 }
 0xf86   :  { %v5661_v40 = vadd.f32 %v4045_v7, %v2070_v15 }
 0xf88   :  { %4558 = vmatmul.mubr.msk.f32.gmra.mrb[52].mxu0 %vm312_vm2, %v5661_v40 }
 0xf89   :  { %4581 = vmatprep.mubr.msk.f32.mxu0 %vm5144_vm0, %v5145_v1 }
0x1053   :  { %v2167_v17 = vpop.f32.mrb[48].mxu0 }
0x1054   :  { %v4553_v22 = vpop.f32.mrb[49].mxu0  ;;  %v5670_v19 = vadd.f32 %v4046_v18, %v2167_v17 }
0x1057   :  { %v2172_v46 = vpop.f32.mrb[50].mxu0 }
0x1058   :  { %v5672_v20 = vadd.f32 %v4046_v18, %v2172_v46  ;;  %v4556_v21 = vpop.f32.mrb[51].mxu0 }
0x105a   :  { %v5676_v52 = vpack.i.bf16 %v5672_v20, %v5670_v19 }
0x105b   :  { %v2177_v23 = vpop.f32.mrb[52].mxu0 }
0x105c   :  { %v5678_v24 = vadd.f32 %v4046_v18, %v2177_v23  ;;  %4982 = vrot.lane.b32.xlu0 %v5676_v52, %s5152_s30  ;;  %v4559_v28 = vpop.f32.mrb[53].mxu0 }
0x105e   :  { %2188 = vrot.lane.b32.xlu1 %v5678_v24, %s5152_s30  ;;  %s5176_s30 = smov 20  }
0x105f   :  { %s5797_s6 = sld [smem:[%s6057_s0 + %s5176_s30]]  }
0x1060   :  { %2431 = vrot.lane.b32.xlu0 %v5678_v24, %s5153_s1 }
0x1062   :  { %4987 = vrot.lane.b32.xlu1 %v5676_v52, %s5153_s1  ;;  %s3964_s1 = sld [smem:[%s6057_s0 + %s5183_s25]]  }
0x1064   :  { %2423 = vrot.lane.b32.xlu0 %v5672_v20, %s5154_s2 }
0x1065   :  { %v3084_v61 = vld [vmem:[%s5797_s6 + $0x10] sm:$0xff] }
0x1066   :  { %2421 = vrot.lane.b32.xlu1 %v5670_v19, %s5154_s2 }
0x106a   :  { %2425 = vrot.lane.b32.xlu1 %v5678_v24, %s5154_s2  ;;  %s5184_s2 = smov 28  }
0x10ce   :  { %v4983_v31 = vpop.permute.xlu0 %4982 }
0x10cf   :  { %v4985_v25 = vunpack.i.h.bf16 %v4983_v31  ;;  %v4984_v26 = vunpack.i.l.bf16 %v4983_v31 }
0x10d0   :  { %v2189_v51 = vpop.permute.xlu1 %2188 }
0x10d1   :  { %v4839_v27 = vpack.c.bf16 %v4985_v25, %v4984_v26 }
0x10d2   :  { %v2432_v36 = vpop.permute.xlu0 %2431 }
0x10d3   :  { %4841 = vmatpush3.bf16.xpose.msk.msra.mxu1 %vm5284_vm4, %v4839_v27 }
0x10d4   :  { %4564 = vmatprep.subr.mxu1 %v5145_v1  ;;  %v4988_v29 = vpop.permute.xlu1 %4987 }
0x10d5   :  { %v4990_v30 = vunpack.i.h.bf16 %v4988_v29  ;;  %v4989_v32 = vunpack.i.l.bf16 %v4988_v29 }
0x10d6   :  { %v2424_v37 = vpop.permute.xlu0 %2423 }
0x10d7   :  { %v4846_v34 = vpack.c.bf16 %v4990_v30, %v4989_v32 }
0x10d8   :  { %v2422_v56 = vpop.permute.xlu1 %2421 }
0x10db   :  { %4565 = vmatpush3.xpose.msk.msra.mxu1 %vm411_vm3, %v2189_v51 }
0x10dc   :  { %4845 = vmatprep.subr.bf16.mxu1 %v5142_v0  ;;  %v2426_v54 = vpop.permute.xlu1 %2425 }
0x10de   :  { %4567 = vmatmul.mubr.msk.f32.vlgmr.msra.gmra.mrb[48].mxu1 %vm411_vm3, %v5670_v19 }
0x10df   :  { %4848 = vmatpush3.bf16.xpose.msk.msra.mxu1 %vm5284_vm4, %v4846_v34  ;;  %4569 = vmatprep.mubr.msk.f32.mxu1 %vm5144_vm0, %v5145_v1 }
0x10e0   :  { %4594 = vmatprep.subr.mxu1 %v5145_v1 }
0x10e2   :  { %4570 = vmatmul.mubr.msk.f32.gmra.mrb[50].mxu1 %vm411_vm3, %v5672_v20 }
0x10e3   :  { %4572 = vmatprep.mubr.msk.f32.mxu1 %vm5144_vm0, %v5145_v1 }
0x10e6   :  { %4573 = vmatmul.mubr.msk.f32.gmra.mrb[52].mxu1 %vm411_vm3, %v5678_v24 }
0x10e7   :  { %4595 = vmatpush3.xpose.msk.msra.mxu1 %vm411_vm3, %v2432_v36  ;;  %4596 = vmatprep.mubr.msk.f32.mxu1 %vm5144_vm0, %v5145_v1 }
0x10e8   :  { %4620 = vmatprep.subr.mxu1 %v5145_v1 }
0x10ea   :  { %4597 = vmatmul.mubr.msk.f32.vlgmr.msra.gmra.mrb[54].mxu1 %vm411_vm3, %v2422_v56 }
0x10eb   :  { %4599 = vmatprep.mubr.msk.f32.mxu1 %vm5144_vm0, %v5145_v1 }
0x10ee   :  { %4600 = vmatmul.mubr.msk.f32.gmra.mrb[56].mxu1 %vm411_vm3, %v2424_v37 }
0x10ef   :  { %4602 = vmatprep.mubr.msk.f32.mxu1 %vm5144_vm0, %v5145_v1 }
0x10f2   :  { %4603 = vmatmul.mubr.msk.f32.gmra.mrb[58].mxu1 %vm411_vm3, %v2426_v54 }
0x10f3   :  { %4622 = vmatprep.mubr.msk.f32.mxu1 %vm5144_vm0, %v5145_v1 }
0x11b1   :  { %v2268_v38 = vpop.f32.mrb[48].mxu1 }
0x11b2   :  { %v2282_v39 = vmul.f32 0.35355338, %v2268_v38  ;;  %v4568_v35 = vpop.f32.mrb[49].mxu1 }
0x11b4   :  { %v2285_v42 = vadd.f32 %v5726_v41, %v2282_v39 }
0x11b5   :  { %v2273_v43 = vpop.f32.mrb[50].mxu1 }
0x11b6   :  { %v2283_v44 = vmul.f32 0.35355338, %v2273_v43  ;;  %v4571_v45 = vpop.f32.mrb[51].mxu1  ;;  %v2288_v47 = vsel %vm510_vm5, %v2285_v42, -inf }
0x11b7   :  { %2289 = vmax.xlane.f32.xlu0 %v2288_v47 }
0x11b8   :  { %v2286_v49 = vadd.f32 %v5731_v48, %v2283_v44 }
0x11b9   :  { %v2278_v50 = vpop.f32.mrb[52].mxu1 }
0x11ba   :  { %v2284_v53 = vmul.f32 0.35355338, %v2278_v50  ;;  %v4574_v55 = vpop.f32.mrb[53].mxu1  ;;  %v2291_v57 = vsel %vm510_vm5, %v2286_v49, -inf }
0x11bb   :  { %2292 = vmax.xlane.f32.xlu1 %v2291_v57 }
0x11bc   :  { %v2287_v59 = vadd.f32 %v5736_v58, %v2284_v53 }
0x11bd   :  { %v2511_v60 = vpop.f32.mrb[54].mxu1 }
0x11be   :  { %v2525_v62 = vmul.f32 0.35355338, %v2511_v60  ;;  %v4598_v63 = vpop.f32.mrb[55].mxu1  ;;  %v2294_v2 = vsel %vm517_vm6, %v2287_v59, -inf }
0x11bf   :  { %2295 = vmax.xlane.f32.xlu0 %v2294_v2 }
0x11c0   :  { %v2528_v3 = vadd.f32 %v5726_v41, %v2525_v62 }
0x11c1   :  { %v2516_v4 = vpop.f32.mrb[56].mxu1 }
0x11c2   :  { %v2526_v5 = vmul.f32 0.35355338, %v2516_v4  ;;  %v4601_v11 = vpop.f32.mrb[57].mxu1  ;;  %v2531_v6 = vsel %vm510_vm5, %v2528_v3, -inf }
0x11c3   :  { %2532 = vmax.xlane.f32.xlu0 %v2531_v6 }
0x11c4   :  { %v2529_v7 = vadd.f32 %v5731_v48, %v2526_v5 }
0x11c5   :  { %v2521_v8 = vpop.f32.mrb[58].mxu1 }
0x11c6   :  { %v2527_v9 = vmul.f32 0.35355338, %v2521_v8  ;;  %v4604_v33 = vpop.f32.mrb[59].mxu1  ;;  %v2534_v12 = vsel %vm510_vm5, %v2529_v7, -inf }
0x11c7   :  { %2535 = vmax.xlane.f32.xlu1 %v2534_v12 }
0x11c8   :  { %v2530_v16 = vadd.f32 %v5736_v58, %v2527_v9 }
0x11ca   :  { %v2537_v14 = vsel %vm517_vm6, %v2530_v16, -inf }
0x11cb   :  { %2538 = vmax.xlane.f32.xlu0 %v2537_v14 }
0x11d8   :  { %2325 = vrot.lane.b32.xlu1 %v5678_v24, %s5156_s7 }
0x11e1   :  { %4992 = vrot.lane.b32.xlu0 %v5676_v52, %s5156_s7  ;;  %s5177_s7 = smov 21  }
0x1244   :  { %v2290_v15 = vpop.xlane.xlu0 %2289 }
0x1245   :  { %v2297_v17 = vsub.f32 %v2285_v42, %v2290_v15 }
0x1247   :  { %v2300_v22 = vmul.f32 1.442695, %v2297_v17 }
0x1248   :  { %v2293_v18 = vpop.xlane.xlu1 %2292 }
0x1249   :  { %5081 = vpow2.f32 %v2300_v22  ;;  %v2298_v46 = vsub.f32 %v2286_v49, %v2293_v18 }
0x124b   :  { %v2302_v21 = vmul.f32 1.442695, %v2298_v46 }
0x124c   :  { %v2296_v23 = vpop.xlane.xlu0 %2295 }
0x124d   :  { %5083 = vpow2.f32 %v2302_v21  ;;  %v2299_v28 = vsub.f32 %v2287_v59, %v2296_v23 }
0x124f   :  { %v2304_v31 = vmul.f32 1.442695, %v2299_v28  ;;  %v2420_v28 = vld [vmem:[%s5797_s6] sm:$0xff] }
0x1250   :  { %v2533_v25 = vpop.xlane.xlu0 %2532 }
0x1251   :  { %5085 = vpow2.f32 %v2304_v31  ;;  %v2540_v26 = vsub.f32 %v2528_v3, %v2533_v25  ;;  %v2663_v31 = vld [vmem:[%s5797_s6 + $0x8] sm:$0xff] }
0x1252   :  { %4621 = vmatpush3.msra.mxu1 %v2663_v31 }
0x1253   :  { %v5082_v51 = vpop.eup %5081  ;;  %v2543_v27 = vmul.f32 1.442695, %v2540_v26  ;;  %4852 = vmatprep.subr.bf16.mxu1 %v5142_v0 }
0x1254   :  { %v2536_v29 = vpop.xlane.xlu1 %2535  ;;  %v2306_v30 = vsel %vm510_vm5, %v5082_v51, 0.0 }
0x1255   :  { %5087 = vpow2.f32 %v2543_v27  ;;  %v2541_v32 = vsub.f32 %v2529_v7, %v2536_v29  ;;  %2307 = vadd.xlane.f32.xlu1 %v2306_v30 }
0x1257   :  { %v5084_v34 = vpop.eup %5083  ;;  %v2545_v36 = vmul.f32 1.442695, %v2541_v32 }
0x1258   :  { %v2539_v56 = vpop.xlane.xlu0 %2538  ;;  %v2309_v37 = vsel %vm510_vm5, %v5084_v34, 0.0  ;;  %v2326_v53 = vpop.permute.xlu1 %2325 }
0x1259   :  { %5089 = vpow2.f32 %v2545_v36  ;;  %v2542_v54 = vsub.f32 %v2530_v16, %v2539_v56  ;;  %2310 = vadd.xlane.f32.xlu0 %v2309_v37 }
0x125b   :  { %v5086_v38 = vpop.eup %5085  ;;  %v2547_v39 = vmul.f32 1.442695, %v2542_v54 }
0x125c   :  { %v4993_v35 = vpop.permute.xlu0 %4992  ;;  %v2312_v42 = vsel %vm517_vm6, %v5086_v38, 0.0 }
0x125d   :  { %5091 = vpow2.f32 %v2547_v39  ;;  %v4995_v43 = vunpack.i.h.bf16 %v4993_v35  ;;  %v4994_v44 = vunpack.i.l.bf16 %v4993_v35  ;;  %2313 = vadd.xlane.f32.xlu1 %v2312_v42 }
0x125f   :  { %v5088_v45 = vpop.eup %5087  ;;  %v4843_v47 = vpack.c.bf16 %v4995_v43, %v4994_v44 }
0x1260   :  { %v2549_v49 = vsel %vm510_vm5, %v5088_v45, 0.0 }
0x1261   :  { %2550 = vadd.xlane.f32.xlu0 %v2549_v49  ;;  %4844 = vmatpush3.bf16.msra.mxu0 %v4843_v47 }
0x1262   :  { %4579 = vmatprep.subr.mxu0 %v5145_v1 }
0x1263   :  { %v5090_v50 = vpop.eup %5089 }
0x1264   :  { %v2552_v55 = vsel %vm510_vm5, %v5090_v50, 0.0 }
0x1265   :  { %2553 = vadd.xlane.f32.xlu1 %v2552_v55  ;;  %4580 = vmatpush3.msk.msra.mxu0 %vm562_vm7, %v2326_v53 }
0x1266   :  { %4849 = vmatprep.subr.bf16.mxu0 %v5142_v0 }
0x1267   :  { %v5092_v57 = vpop.eup %5091 }
0x1268   :  { %v2555_v59 = vsel %vm517_vm6, %v5092_v57, 0.0 }
0x1269   :  { %2556 = vadd.xlane.f32.xlu1 %v2555_v59 }
0x1277   :  { %4997 = vrot.lane.b32.xlu0 %v5676_v52, %s5157_s8 }
0x127a   :  { %2568 = vrot.lane.b32.xlu1 %v5678_v24, %s5157_s8  ;;  %s3965_s8 = sld [smem:[%s6057_s0 + %s5184_s2]]  }
0x127b   :  { %5002 = vrot.lane.b32.xlu0 %v5676_v52, %s5158_s9 }
0x127e   :  { %2852 = vrot.lane.b32.xlu1 %v5678_v24, %s5158_s9  ;;  %s5185_s9 = smov 29  }
0x127f   :  { %2842 = vrot.lane.b32.xlu0 %v5670_v19, %s5159_s10 }
0x1282   :  { %2844 = vrot.lane.b32.xlu1 %v5672_v20, %s5159_s10 }
0x1283   :  { %2846 = vrot.lane.b32.xlu0 %v5678_v24, %s5159_s10  ;;  %s3958_s10 = sld [smem:[%s6057_s0 + %s5177_s7]]  }
0x12e2   :  { %v2308_v60 = vpop.xlane.xlu1 %2307 }
0x12e3   :  { %5093 = vrcp.f32 %v2308_v60 }
0x12e6   :  { %v2311_v62 = vpop.xlane.xlu0 %2310 }
0x12e7   :  { %5095 = vrcp.f32 %v2311_v62 }
0x12ea   :  { %v2314_v63 = vpop.xlane.xlu1 %2313 }
0x12eb   :  { %5097 = vrcp.f32 %v2314_v63 }
0x12ed   :  { %v5094_v2 = vpop.eup %5093 }
0x12ee   :  { %v2318_v3 = vmul.f32 %v5094_v2, %v5082_v51  ;;  %v2551_v4 = vpop.xlane.xlu0 %2550 }
0x12ef   :  { %5099 = vrcp.f32 %v2551_v4 }
0x12f0   :  { %4582 = vmatmul.mubr.msk.f32.vlgmr.msra.gmra.mrb[54].mxu0 %vm510_vm5, %v2318_v3 }
0x12f1   :  { %v5096_v5 = vpop.eup %5095  ;;  %4584 = vmatprep.mubr.msk.f32.mxu0 %vm5144_vm0, %v5145_v1 }
0x12f2   :  { %v2554_v11 = vpop.xlane.xlu1 %2553  ;;  %v4998_v6 = vpop.permute.xlu0 %4997  ;;  %v2319_v7 = vmul.f32 %v5096_v5, %v5084_v34 }
0x12f3   :  { %5101 = vrcp.f32 %v2554_v11  ;;  %v5000_v8 = vunpack.i.h.bf16 %v4998_v6  ;;  %v4999_v9 = vunpack.i.l.bf16 %v4998_v6 }
0x12f4   :  { %4585 = vmatmul.mubr.msk.f32.gmra.mrb[56].mxu0 %vm510_vm5, %v2319_v7 }
0x12f5   :  { %v5098_v33 = vpop.eup %5097  ;;  %v4850_v12 = vpack.c.bf16 %v5000_v8, %v4999_v9  ;;  %4587 = vmatprep.mubr.msk.f32.mxu0 %vm5144_vm0, %v5145_v1 }
0x12f6   :  { %v2557_v16 = vpop.xlane.xlu1 %2556  ;;  %v2320_v14 = vmul.f32 %v5098_v33, %v5086_v38  ;;  %v5003_v27 = vpop.permute.xlu0 %5002 }
0x12f7   :  { %5103 = vrcp.f32 %v2557_v16  ;;  %4851 = vmatpush3.bf16.msra.mxu0 %v4850_v12  ;;  %v5005_v30 = vunpack.i.h.bf16 %v5003_v27  ;;  %v5004_v32 = vunpack.i.l.bf16 %v5003_v27 }
0x12f8   :  { %4588 = vmatmul.mubr.msk.f32.gmra.mrb[58].mxu0 %vm510_vm5, %v2320_v14  ;;  %4609 = vmatprep.subr.mxu0 %v5145_v1 }
0x12f9   :  { %v5100_v15 = vpop.eup %5099  ;;  %4611 = vmatprep.mubr.msk.f32.mxu0 %vm5144_vm0, %v5145_v1  ;;  %v4853_v56 = vpack.c.bf16 %v5005_v30, %v5004_v32 }
0x12fa   :  { %v2561_v17 = vmul.f32 %v5100_v15, %v5088_v45  ;;  %v2569_v22 = vpop.permute.xlu1 %2568  ;;  %v2843_v44 = vpop.permute.xlu0 %2842 }
0x12fb   :  { %4610 = vmatpush3.msk.msra.mxu0 %vm562_vm7, %v2569_v22 }
0x12fc   :  { %4612 = vmatmul.mubr.msk.f32.vlgmr.msra.gmra.mrb[60].mxu0 %vm510_vm5, %v2561_v17  ;;  %4631 = vmatprep.subr.mxu0 %v5145_v1 }
0x12fd   :  { %v5102_v18 = vpop.eup %5101  ;;  %4614 = vmatprep.mubr.msk.f32.mxu0 %vm5144_vm0, %v5145_v1  ;;  %4632 = vmatpush3.msra.mxu0 %v2420_v28 }
0x12fe   :  { %v2562_v46 = vmul.f32 %v5102_v18, %v5090_v50  ;;  %4856 = vmatprep.subr.bf16.mxu0 %v5142_v0  ;;  %v2853_v42 = vpop.permute.xlu1 %2852  ;;  %v2847_v47 = vpop.permute.xlu0 %2846 }
0x1300   :  { %4615 = vmatmul.mubr.msk.f32.gmra.mrb[62].mxu0 %vm510_vm5, %v2562_v46 }
0x1301   :  { %v5104_v21 = vpop.eup %5103  ;;  %4617 = vmatprep.mubr.msk.f32.mxu0 %vm5144_vm0, %v5145_v1 }
0x1302   :  { %v2563_v23 = vmul.f32 %v5104_v21, %v5092_v57  ;;  %v2845_v45 = vpop.permute.xlu1 %2844 }
0x1304   :  { %4618 = vmatmul.mubr.msk.f32.gmra.mrb[64].mxu0 %vm510_vm5, %v2563_v23 }
0x1305   :  { %4633 = vmatprep.mubr.msk.f32.mxu0 %vm5144_vm0, %v5145_v1 }
0x13c3   :  { %v2406_v25 = vpop.f32.mrb[54].mxu0 }
0x13c4   :  { %v4583_v26 = vpop.f32.mrb[55].mxu0  ;;  %4634 = vmatmul.mubr.msk.f32.vlgmr.msra.gmra.mrb[66].mxu0 %vm411_vm3, %v2406_v25 }
0x13c5   :  { %4636 = vmatprep.mubr.msk.f32.mxu0 %vm5144_vm0, %v5145_v1 }
0x13c7   :  { %v2411_v51 = vpop.f32.mrb[56].mxu0 }
0x13c8   :  { %v4586_v29 = vpop.f32.mrb[57].mxu0  ;;  %4637 = vmatmul.mubr.msk.f32.gmra.mrb[68].mxu0 %vm411_vm3, %v2411_v51 }
0x13c9   :  { %4639 = vmatprep.mubr.msk.f32.mxu0 %vm5144_vm0, %v5145_v1 }
0x13cb   :  { %v2416_v34 = vpop.f32.mrb[58].mxu0 }
0x13cc   :  { %v4589_v36 = vpop.f32.mrb[59].mxu0  ;;  %4640 = vmatmul.mubr.msk.f32.gmra.mrb[70].mxu0 %vm411_vm3, %v2416_v34 }
0x13cd   :  { %4663 = vmatprep.mubr.msk.f32.mxu0 %vm5144_vm0, %v5145_v1 }
0x13cf   :  { %v2649_v37 = vpop.f32.mrb[60].mxu0 }
0x13d0   :  { %v4613_v54 = vpop.f32.mrb[61].mxu0  ;;  %4623 = vmatmul.mubr.msk.f32.vlgmr.msra.gmra.mrb[60].mxu1 %vm411_vm3, %v2649_v37 }
0x13d1   :  { %4855 = vmatpush3.bf16.xpose.msk.msra.mxu1 %vm5284_vm4, %v4853_v56  ;;  %4625 = vmatprep.mubr.msk.f32.mxu1 %vm5144_vm0, %v5145_v1 }
0x13d2   :  { %4646 = vmatprep.subr.mxu1 %v5145_v1 }
0x13d3   :  { %v2654_v38 = vpop.f32.mrb[62].mxu0 }
0x13d4   :  { %v4616_v39 = vpop.f32.mrb[63].mxu0  ;;  %4626 = vmatmul.mubr.msk.f32.gmra.mrb[62].mxu1 %vm411_vm3, %v2654_v38 }
0x13d5   :  { %4628 = vmatprep.mubr.msk.f32.mxu1 %vm5144_vm0, %v5145_v1 }
0x13d7   :  { %v2659_v35 = vpop.f32.mrb[64].mxu0 }
0x13d8   :  { %v4619_v43 = vpop.f32.mrb[65].mxu0  ;;  %4629 = vmatmul.mubr.msk.f32.gmra.mrb[64].mxu1 %vm411_vm3, %v2659_v35 }
0x13d9   :  { %4647 = vmatpush3.xpose.msk.msra.mxu1 %vm411_vm3, %v2853_v42  ;;  %4648 = vmatprep.mubr.msk.f32.mxu1 %vm5144_vm0, %v5145_v1 }
0x13da   :  { %4672 = vmatprep.subr.mxu1 %v5145_v1 }
0x13dc   :  { %4649 = vmatmul.mubr.msk.f32.vlgmr.msra.gmra.mrb[66].mxu1 %vm411_vm3, %v2843_v44 }
0x13dd   :  { %4651 = vmatprep.mubr.msk.f32.mxu1 %vm5144_vm0, %v5145_v1  ;;  %4673 = vmatpush3.msra.mxu1 %v3084_v61 }
0x13de   :  { %4863 = vmatprep.subr.bf16.mxu1 %v5142_v0 }
0x13e0   :  { %4652 = vmatmul.mubr.msk.f32.gmra.mrb[68].mxu1 %vm411_vm3, %v2845_v45 }
0x13e1   :  { %4654 = vmatprep.mubr.msk.f32.mxu1 %vm5144_vm0, %v5145_v1 }
0x13e4   :  { %4655 = vmatmul.mubr.msk.f32.gmra.mrb[70].mxu1 %vm411_vm3, %v2847_v47 }
0x13e5   :  { %4674 = vmatprep.mubr.msk.f32.mxu1 %vm5144_vm0, %v5145_v1 }
0x1497   :  { %v2828_v49 = vpop.f32.mrb[66].mxu0 }
0x1498   :  { %v4635_v50 = vpop.f32.mrb[67].mxu0 }
0x149b   :  { %v2833_v53 = vpop.f32.mrb[68].mxu0 }
0x149c   :  { %v4638_v55 = vpop.f32.mrb[69].mxu0 }
0x149f   :  { %v2838_v57 = vpop.f32.mrb[70].mxu0 }
0x14a0   :  { %v4641_v59 = vpop.f32.mrb[71].mxu0 }
0x14a3   :  { %v2739_v60 = vpop.f32.mrb[60].mxu1 }
0x14a4   :  { %v5835_v62 = vadd.f32 %v2828_v49, %v2739_v60  ;;  %v4624_v63 = vpop.f32.mrb[61].mxu1 }
0x14a7   :  { %v2744_v2 = vpop.f32.mrb[62].mxu1 }
0x14a8   :  { %v5837_v3 = vadd.f32 %v2833_v53, %v2744_v2  ;;  %v4627_v4 = vpop.f32.mrb[63].mxu1 }
0x14ab   :  { %v2749_v5 = vpop.f32.mrb[64].mxu1 }
0x14ac   :  { %v5839_v11 = vadd.f32 %v2838_v57, %v2749_v5  ;;  %v4630_v6 = vpop.f32.mrb[65].mxu1 }
0x14af   :  { %v2932_v7 = vpop.f32.mrb[66].mxu1 }
0x14b0   :  { %v2946_v8 = vmul.f32 0.35355338, %v2932_v7  ;;  %v4650_v9 = vpop.f32.mrb[67].mxu1 }
0x14b2   :  { %v2949_v33 = vadd.f32 %v5726_v41, %v2946_v8 }
0x14b3   :  { %v2937_v12 = vpop.f32.mrb[68].mxu1 }
0x14b4   :  { %v2947_v16 = vmul.f32 0.35355338, %v2937_v12  ;;  %v4653_v14 = vpop.f32.mrb[69].mxu1  ;;  %v2952_v15 = vsel %vm510_vm5, %v2949_v33, -inf }
0x14b5   :  { %2953 = vmax.xlane.f32.xlu1 %v2952_v15 }
0x14b6   :  { %v2950_v17 = vadd.f32 %v5731_v48, %v2947_v16 }
0x14b7   :  { %v2942_v22 = vpop.f32.mrb[70].mxu1 }
0x14b8   :  { %v2948_v18 = vmul.f32 0.35355338, %v2942_v22  ;;  %v4656_v46 = vpop.f32.mrb[71].mxu1  ;;  %v2955_v21 = vsel %vm510_vm5, %v2950_v17, -inf }
0x14b9   :  { %2956 = vmax.xlane.f32.xlu0 %v2955_v21 }
0x14ba   :  { %v2951_v23 = vadd.f32 %v5736_v58, %v2948_v18 }
0x14bc   :  { %v2958_v28 = vsel %vm517_vm6, %v2951_v23, -inf }
0x14bd   :  { %2959 = vmax.xlane.f32.xlu0 %v2958_v28 }
0x1542   :  { %v2954_v31 = vpop.xlane.xlu1 %2953 }
0x1543   :  { %v2961_v25 = vsub.f32 %v2949_v33, %v2954_v31 }
0x1545   :  { %v2964_v26 = vmul.f32 1.442695, %v2961_v25 }
0x1546   :  { %v2957_v51 = vpop.xlane.xlu0 %2956 }
0x1547   :  { %5105 = vpow2.f32 %v2964_v26  ;;  %v2962_v27 = vsub.f32 %v2950_v17, %v2957_v51 }
0x1549   :  { %v2966_v29 = vmul.f32 1.442695, %v2962_v27 }
0x154a   :  { %v2960_v56 = vpop.xlane.xlu0 %2959 }
0x154b   :  { %5107 = vpow2.f32 %v2966_v29  ;;  %v2963_v37 = vsub.f32 %v2951_v23, %v2960_v56 }
0x154d   :  { %v2968_v54 = vmul.f32 1.442695, %v2963_v37 }
0x154f   :  { %5109 = vpow2.f32 %v2968_v54 }
0x1551   :  { %v5106_v30 = vpop.eup %5105 }
0x1552   :  { %v2970_v32 = vsel %vm510_vm5, %v5106_v30, 0.0 }
0x1553   :  { %2971 = vadd.xlane.f32.xlu1 %v2970_v32 }
0x1555   :  { %v5108_v34 = vpop.eup %5107 }
0x1556   :  { %v2973_v36 = vsel %vm510_vm5, %v5108_v34, 0.0 }
0x1557   :  { %2974 = vadd.xlane.f32.xlu0 %v2973_v36 }
0x1559   :  { %v5110_v38 = vpop.eup %5109 }
0x155a   :  { %v2976_v39 = vsel %vm517_vm6, %v5110_v38, 0.0 }
0x1564   :  { %2989 = vrot.lane.b32.xlu1 %v5678_v24, %s5161_s15 }
0x1568   :  { %5012 = vrot.lane.b32.xlu1 %v5676_v52, %s5162_s16 }
0x156d   :  { %5007 = vrot.lane.b32.xlu0 %v5676_v52, %s5161_s15  ;;  %s5178_s15 = smov 24  }
0x1571   :  { %3187 = vrot.lane.b32.xlu0 %v5678_v24, %s5162_s16  ;;  %s3966_s16 = sld [smem:[%s6057_s0 + %s5185_s9]]  }
0x158c   :  { %2977 = vadd.xlane.f32.xlu1 %v2976_v39 }
0x159d   :  { %3177 = vrot.lane.b32.xlu1 %v5670_v19, %s5163_s17 }
0x15e0   :  { %v2972_v35 = vpop.xlane.xlu1 %2971 }
0x15e1   :  { %5111 = vrcp.f32 %v2972_v35 }
0x15e4   :  { %v2975_v42 = vpop.xlane.xlu0 %2974  ;;  %v2990_v44 = vpop.permute.xlu1 %2989 }
0x15e5   :  { %5113 = vrcp.f32 %v2975_v42 }
0x15e8   :  { %v5008_v43 = vpop.permute.xlu0 %5007  ;;  %v5013_v53 = vpop.permute.xlu1 %5012 }
0x15e9   :  { %v5010_v45 = vunpack.i.h.bf16 %v5008_v43  ;;  %v5009_v47 = vunpack.i.l.bf16 %v5008_v43  ;;  %v5015_v59 = vunpack.i.h.bf16 %v5013_v53  ;;  %v5014_v19 = vunpack.i.l.bf16 %v5013_v53 }
0x15eb   :  { %v4857_v49 = vpack.c.bf16 %v5010_v45, %v5009_v47  ;;  %v5112_v50 = vpop.eup %5111  ;;  %v4860_v63 = vpack.c.bf16 %v5015_v59, %v5014_v19  ;;  %v3419_v45 = vld [vmem:[%s5797_s6 + $0x18] sm:$0xff] }
0x15ec   :  { %v2982_v55 = vmul.f32 %v5112_v50, %v5106_v30  ;;  %v3188_v2 = vpop.permute.xlu0 %3187 }
0x15ed   :  { %4858 = vmatpush3.bf16.msra.mxu0 %v4857_v49 }
0x15ee   :  { %4661 = vmatprep.subr.mxu0 %v5145_v1 }
0x15ef   :  { %v5114_v57 = vpop.eup %5113 }
0x15f0   :  { %v2983_v60 = vmul.f32 %v5114_v57, %v5108_v34 }
0x15f1   :  { %4662 = vmatpush3.msk.msra.mxu0 %vm562_vm7, %v2990_v44 }
0x15f2   :  { %4664 = vmatmul.mubr.msk.f32.vlgmr.msra.gmra.mrb[72].mxu0 %vm510_vm5, %v2982_v55  ;;  %4859 = vmatprep.subr.bf16.mxu0 %v5142_v0 }
0x15f3   :  { %4666 = vmatprep.mubr.msk.f32.mxu0 %vm5144_vm0, %v5145_v1 }
0x15f6   :  { %4667 = vmatmul.mubr.msk.f32.gmra.mrb[74].mxu0 %vm510_vm5, %v2983_v60 }
0x15f7   :  { %4669 = vmatprep.mubr.msk.f32.mxu0 %vm5144_vm0, %v5145_v1 }
0x15f8   :  { %4862 = vmatpush3.bf16.xpose.msk.msra.mxu0 %vm5284_vm4, %v4860_v63 }
0x15f9   :  { %4687 = vmatprep.subr.mxu0 %v5145_v1 }
0x1600   :  { %4688 = vmatpush3.xpose.msk.msra.mxu0 %vm411_vm3, %v3188_v2 }
0x1601   :  { %4713 = vmatprep.subr.mxu0 %v5145_v1 }
0x1619   :  { %v2978_v4 = vpop.xlane.xlu1 %2977 }
0x161a   :  { %5115 = vrcp.f32 %v2978_v4 }
0x161d   :  { %v3178_v7 = vpop.permute.xlu1 %3177 }
0x1624   :  { %v5116_v5 = vpop.eup %5115 }
0x1625   :  { %v2984_v6 = vmul.f32 %v5116_v5, %v5110_v38 }
0x1627   :  { %4670 = vmatmul.mubr.msk.f32.gmra.mrb[76].mxu0 %vm510_vm5, %v2984_v6 }
0x1628   :  { %4689 = vmatprep.mubr.msk.f32.mxu0 %vm5144_vm0, %v5145_v1 }
0x162b   :  { %4690 = vmatmul.mubr.msk.f32.vlgmr.msra.gmra.mrb[78].mxu0 %vm411_vm3, %v3178_v7  ;;  %v5936_v7 = vld [vmem:[%s3958_s10] ss:$0 sm:$0xff] }
0x162c   :  { %4692 = vmatprep.mubr.msk.f32.mxu0 %vm5144_vm0, %v5145_v1  ;;  %4714 = vmatpush3.msra.mxu0 %v3419_v45 }
0x162d   :  { %4872 = vmatprep.subr.bf16.mxu0 %v5142_v0 }
0x16c5   :  { %v3070_v8 = vpop.f32.mrb[72].mxu0 }
0x16c6   :  { %v4665_v9 = vpop.f32.mrb[73].mxu0  ;;  %4675 = vmatmul.mubr.msk.f32.vlgmr.msra.gmra.mrb[72].mxu1 %vm411_vm3, %v3070_v8 }
0x16c7   :  { %4677 = vmatprep.mubr.msk.f32.mxu1 %vm5144_vm0, %v5145_v1 }
0x16c9   :  { %v3075_v33 = vpop.f32.mrb[74].mxu0 }
0x16ca   :  { %v4668_v12 = vpop.f32.mrb[75].mxu0  ;;  %4678 = vmatmul.mubr.msk.f32.gmra.mrb[74].mxu1 %vm411_vm3, %v3075_v33 }
0x16cb   :  { %4680 = vmatprep.mubr.msk.f32.mxu1 %vm5144_vm0, %v5145_v1 }
0x16fa   :  { %v3080_v16 = vpop.f32.mrb[76].mxu0 }
0x16fb   :  { %v4671_v14 = vpop.f32.mrb[77].mxu0  ;;  %4681 = vmatmul.mubr.msk.f32.gmra.mrb[76].mxu1 %vm411_vm3, %v3080_v16 }
0x16fc   :  { %4704 = vmatprep.mubr.msk.f32.mxu1 %vm5144_vm0, %v5145_v1 }
0x16fe   :  { %v3267_v15 = vpop.f32.mrb[78].mxu0 }
0x16ff   :  { %v3281_v17 = vmul.f32 0.35355338, %v3267_v15  ;;  %v4691_v22 = vpop.f32.mrb[79].mxu0 }
0x1701   :  { %v3284_v18 = vadd.f32 %v5726_v41, %v3281_v17 }
0x1703   :  { %v3287_v46 = vsel %vm510_vm5, %v3284_v18, -inf }
0x1704   :  { %3288 = vmax.xlane.f32.xlu0 %v3287_v46 }
0x171a   :  { %5017 = vrot.lane.b32.xlu0 %v5676_v52, %s5164_s18 }
0x171e   :  { %3179 = vrot.lane.b32.xlu0 %v5672_v20, %s5163_s17 }
0x1791   :  { %v3289_v21 = vpop.xlane.xlu0 %3288 }
0x1792   :  { %v3296_v23 = vsub.f32 %v3284_v18, %v3289_v21 }
0x1794   :  { %v3299_v28 = vmul.f32 1.442695, %v3296_v23 }
0x1795   :  { %v5018_v31 = vpop.permute.xlu0 %5017 }
0x1796   :  { %5117 = vpow2.f32 %v3299_v28  ;;  %v5020_v25 = vunpack.i.h.bf16 %v5018_v31  ;;  %v5019_v26 = vunpack.i.l.bf16 %v5018_v31 }
0x1798   :  { %v4864_v51 = vpack.c.bf16 %v5020_v25, %v5019_v26 }
0x1799   :  { %v3160_v27 = vpop.f32.mrb[72].mxu1  ;;  %v3180_v29 = vpop.permute.xlu0 %3179 }
0x179a   :  { %v5898_v41 = vadd.f32 %v3160_v27, %v5835_v62  ;;  %v4676_v30 = vpop.f32.mrb[73].mxu1  ;;  %4693 = vmatmul.mubr.msk.f32.gmra.mrb[80].mxu0 %vm411_vm3, %v3180_v29  ;;  %4865 = vmatpush3.bf16.msra.mxu1 %v4864_v51 }
0x179b   :  { %4702 = vmatprep.subr.mxu1 %v5145_v1  ;;  %4695 = vmatprep.mubr.msk.f32.mxu0 %vm5144_vm0, %v5145_v1 }
0x179d   :  { %v3165_v20 = vpop.f32.mrb[74].mxu1 }
0x179e   :  { %v5905_v52 = vadd.f32 %v3165_v20, %v5837_v3  ;;  %v4679_v32 = vpop.f32.mrb[75].mxu1  ;;  %v3687_v20 = vld [vmem:[%s5958_s3] sm:$0xff] }
0x179f   :  { %v3688_v32 = vld [vmem:[%s5958_s3 + $0x8] sm:$0xff] }
0x17a0   :  { %v5118_v34 = vpop.eup %5117 }
0x17a1   :  { %v3305_v36 = vsel %vm510_vm5, %v5118_v34, 0.0 }
0x17a2   :  { %3306 = vadd.xlane.f32.xlu1 %v3305_v36  ;;  %v4873_v36 = vpack.c.bf16 %v3688_v32, %v3687_v20 }
0x17b3   :  { %3324 = vrot.lane.b32.xlu1 %v5678_v24, %s5164_s18  ;;  %s3961_s18 = sld [smem:[%s6057_s0 + %s5178_s15]]  }
0x17b7   :  { %3181 = vrot.lane.b32.xlu1 %v5678_v24, %s5163_s17  ;;  %s5186_s17 = smov 32  }
0x17b8   :  { %s3969_s28 = sld [smem:[%s6057_s0 + %s5186_s17]]  }
0x17b9   :  { %v3584_v26 = vld [vmem:[%s3961_s18] sm:$0xff]  ;;  %v3585_v51 = vld [vmem:[%s3961_s18 + $0x8] sm:$0xff]  ;;  %v3586_v29 = vld [vmem:[%s3961_s18 + $0x10] sm:$0xff] }
0x17ba   :  { %v4867_v27 = vpack.c.bf16 %v3585_v51, %v3584_v26 }
0x17ce   :  { %v3170_v62 = vpop.f32.mrb[76].mxu1 }
0x17cf   :  { %v5913_v56 = vadd.f32 %v3170_v62, %v5839_v11  ;;  %v4682_v37 = vpop.f32.mrb[77].mxu1  ;;  %v3690_v62 = vld [vmem:[%s5958_s3 + $0x18] sm:$0xff] }
0x182f   :  { %v3307_v54 = vpop.xlane.xlu1 %3306 }
0x1830   :  { %5119 = vrcp.f32 %v3307_v54  ;;  %v3691_v54 = vld [vmem:[%s5958_s3 + $0x20] sm:$0xff] }
0x1833   :  { %v3325_v3 = vpop.permute.xlu1 %3324 }
0x1834   :  { %4703 = vmatpush3.msk.msra.mxu1 %vm562_vm7, %v3325_v3  ;;  %v3692_v3 = vld [vmem:[%s5958_s3 + $0x28] sm:$0xff] }
0x1835   :  { %4866 = vmatprep.subr.bf16.mxu1 %v5142_v0 }
0x1837   :  { %v3182_v38 = vpop.permute.xlu1 %3181 }
0x1838   :  { %4696 = vmatmul.mubr.msk.f32.gmra.mrb[82].mxu0 %vm411_vm3, %v3182_v38  ;;  %v4879_v38 = vpack.c.bf16 %v3692_v3, %v3691_v54 }
0x1839   :  { %4715 = vmatprep.mubr.msk.f32.mxu0 %vm5144_vm0, %v5145_v1 }
0x183a   :  { %v5120_v24 = vpop.eup %5119 }
0x183b   :  { %v3317_v39 = vmul.f32 %v5120_v24, %v5118_v34  ;;  %v3689_v34 = vld [vmem:[%s5958_s3 + $0x10] sm:$0xff] }
0x183c   :  { %v4876_v37 = vpack.c.bf16 %v3690_v62, %v3689_v34 }
0x183d   :  { %4705 = vmatmul.mubr.msk.f32.vlgmr.msra.gmra.mrb[78].mxu1 %vm510_vm5, %v3317_v39 }
0x183e   :  { %4707 = vmatprep.mubr.msk.f32.mxu1 %vm5144_vm0, %v5145_v1  ;;  %4868 = vmatpush3.bf16.msra.mxu1 %v4867_v27 }
0x183f   :  { %4869 = vmatprep.subr.bf16.mxu1 %v5142_v0 }
0x186d   :  { %v3272_v11 = vpop.f32.mrb[80].mxu0 }
0x186e   :  { %v3282_v35 = vmul.f32 0.35355338, %v3272_v11  ;;  %v4694_v42 = vpop.f32.mrb[81].mxu0 }
0x186f   :  { %v5975_v42 = vld [vmem:[%s3959_s12] ss:$0 sm:$0xff] }
0x1870   :  { %v3285_v43 = vadd.f32 %v5731_v48, %v3282_v35 }
0x1872   :  { %v3290_v44 = vsel %vm510_vm5, %v3285_v43, -inf }
0x1873   :  { %3291 = vmax.xlane.f32.xlu0 %v3290_v44  ;;  %v5977_v44 = vld [vmem:[%s3960_s20] ss:$0 sm:$0xff] }
0x1900   :  { %v3292_v4 = vpop.xlane.xlu0 %3291 }
0x190b   :  { %v3277_v47 = vpop.f32.mrb[82].mxu0 }
0x190c   :  { %v3283_v49 = vmul.f32 0.35355338, %v3277_v47  ;;  %v4697_v50 = vpop.f32.mrb[83].mxu0 }
0x190e   :  { %v3286_v53 = vadd.f32 %v5736_v58, %v3283_v49  ;;  %v3297_v58 = vsub.f32 %v3285_v43, %v3292_v4 }
0x1910   :  { %v3405_v55 = vpop.f32.mrb[78].mxu1  ;;  %v3293_v57 = vsel %vm517_vm6, %v3286_v53, -inf  ;;  %v3301_v5 = vmul.f32 1.442695, %v3297_v58 }
0x1911   :  { %v4706_v59 = vpop.f32.mrb[79].mxu1  ;;  %4716 = vmatmul.mubr.msk.f32.vlgmr.msra.gmra.mrb[84].mxu0 %vm411_vm3, %v3405_v55  ;;  %3294 = vmax.xlane.f32.xlu1 %v3293_v57  ;;  %v3693_v57 = vld [vmem:[%s5958_s3 + $0x30] sm:$0xff] }
0x1912   :  { %4718 = vmatprep.mubr.msk.f32.mxu0 %vm5144_vm0, %v5145_v1  ;;  %4874 = vmatpush3.bf16.msra.mxu0 %v4873_v36  ;;  %v3694_v59 = vld [vmem:[%s5958_s3 + $0x38] sm:$0xff] }
0x1913   :  { %4875 = vmatprep.subr.bf16.mxu0 %v5142_v0 }
0x1916   :  { %4877 = vmatpush3.bf16.msra.mxu0 %v4876_v37 }
0x1917   :  { %4878 = vmatprep.subr.bf16.mxu0 %v5142_v0 }
0x191a   :  { %4880 = vmatpush3.bf16.msra.mxu0 %v4879_v38 }
0x191b   :  { %4881 = vmatprep.subr.bf16.mxu0 %v5142_v0 }
0x199e   :  { %v3295_v48 = vpop.xlane.xlu1 %3294 }
0x199f   :  { %v3298_v19 = vsub.f32 %v3286_v53, %v3295_v48  ;;  %v4882_v48 = vpack.c.bf16 %v3694_v59, %v3693_v57 }
0x19a1   :  { %v3303_v60 = vmul.f32 1.442695, %v3298_v19  ;;  %4883 = vmatpush3.bf16.msra.mxu0 %v4882_v48  ;;  %v5995_v19 = vld [vmem:[%s3962_s24] ss:$0 sm:$0xff] }
0x19a3   :  { %5121 = vpow2.f32 %v3303_v60 }
0x19a4   :  { %5123 = vpow2.f32 %v3301_v5 }
0x19ad   :  { %v5122_v63 = vpop.eup %5121 }
0x19ae   :  { %v3311_v2 = vsel %vm517_vm6, %v5122_v63, 0.0  ;;  %v5124_v16 = vpop.eup %5123 }
0x19af   :  { %3312 = vadd.xlane.f32.xlu1 %v3311_v2  ;;  %v3308_v14 = vsel %vm510_vm5, %v5124_v16, 0.0 }
0x19e4   :  { %v3495_v6 = vpop.f32.mrb[84].mxu0 }
0x19e5   :  { %v3509_v61 = vadd.f32 %v3495_v6, %v5898_v41  ;;  %v4717_v8 = vpop.f32.mrb[85].mxu0  ;;  %v3587_v41 = vld [vmem:[%s3961_s18 + $0x18] sm:$0xff] }
0x19e6   :  { %v4870_v30 = vpack.c.bf16 %v3587_v41, %v3586_v29 }
0x19e7   :  { %v3519_v9 = vadd.f32 %v5936_v7, %v3509_v61 }
0x19e8   :  { %4871 = vmatpush3.bf16.msra.mxu1 %v4870_v30 }
0x19e9   :  { %v3522_v33 = vadd.f32 %v3519_v9, %v5649_v10  ;;  %4884 = vmatprep.subr.bf16.mxu1 %v5142_v0 }
0x19eb   :  { %v3525_v12 = vsel %vm312_vm2, %v3522_v33, 0.0 }
0x19ec   :  { %3526 = vadd.xlane.f32.xlu0 %v3525_v12 }
0x19f0   :  { %3309 = vadd.xlane.f32.xlu0 %v3308_v14 }
0x1a3c   :  { %v3313_v18 = vpop.xlane.xlu1 %3312 }
0x1a79   :  { %v3527_v15 = vpop.xlane.xlu0 %3526 }
0x1a7a   :  { %v3534_v17 = vmul.f32 0.03125, %v3527_v15 }
0x1a7c   :  { %v3537_v22 = vsub.f32 %v3522_v33, %v3534_v17 }
0x1a7d   :  { %v3310_v46 = vpop.xlane.xlu0 %3309 }
0x1a7e   :  { %5125 = vrcp.f32 %v3310_v46  ;;  %v3540_v21 = vmul.f32 %v3537_v22, %v3537_v22 }
0x1a7f   :  { %5127 = vrcp.f32 %v3313_v18 }
0x1a80   :  { %v3543_v23 = vsel %vm312_vm2, %v3540_v21, 0.0 }
0x1a81   :  { %3544 = vadd.xlane.f32.xlu0 %v3543_v23 }
0x1a88   :  { %v5126_v28 = vpop.eup %5125 }
0x1a89   :  { %v3318_v10 = vmul.f32 %v5126_v28, %v5124_v16  ;;  %v5128_v31 = vpop.eup %5127 }
0x1a8a   :  { %v3319_v25 = vmul.f32 %v5128_v31, %v5122_v63 }
0x1a8b   :  { %4708 = vmatmul.mubr.msk.f32.gmra.mrb[80].mxu1 %vm510_vm5, %v3318_v10 }
0x1a8c   :  { %4710 = vmatprep.mubr.msk.f32.mxu1 %vm5144_vm0, %v5145_v1 }
0x1a8f   :  { %4711 = vmatmul.mubr.msk.f32.gmra.mrb[82].mxu1 %vm510_vm5, %v3319_v25 }
0x1a90   :  { %4732 = vmatprep.mubr.msk.f32.mxu1 %vm5144_vm0, %v5145_v1 }
0x1b0e   :  { %v3545_v24 = vpop.xlane.xlu0 %3544 }
0x1b0f   :  { %v3552_v39 = vmul.f32 0.03125, %v3545_v24 }
0x1b11   :  { %v3555_v11 = vadd.f32 1e-05, %v3552_v39 }
0x1b13   :  { %5129 = vrsqrt.f32 %v3555_v11 }
0x1b1d   :  { %v5130_v35 = vpop.eup %5129 }
0x1b1e   :  { %v3561_v43 = vmul.f32 %v5130_v35, %v3537_v22 }
0x1b20   :  { %v3571_v45 = vmul.f32 %v5975_v42, %v3561_v43 }
0x1b22   :  { %v3581_v47 = vadd.f32 %v5977_v44, %v3571_v45 }
0x1b24   :  { %4733 = vmatmul.mubr.msk.f32.vlgmr.msra.gmra.mrb[84].mxu1 %vm312_vm2, %v3581_v47 }
0x1b25   :  { %4735 = vmatprep.mubr.msk.f32.mxu1 %vm5144_vm0, %v5145_v1 }
0x1b5e   :  { %v3410_v49 = vpop.f32.mrb[80].mxu1 }
0x1b5f   :  { %v4709_v50 = vpop.f32.mrb[81].mxu1  ;;  %4719 = vmatmul.mubr.msk.f32.gmra.mrb[86].mxu0 %vm411_vm3, %v3410_v49 }
0x1b60   :  { %4721 = vmatprep.mubr.msk.f32.mxu0 %vm5144_vm0, %v5145_v1 }
0x1b62   :  { %v3415_v53 = vpop.f32.mrb[82].mxu1 }
0x1b63   :  { %v4712_v55 = vpop.f32.mrb[83].mxu1  ;;  %4722 = vmatmul.mubr.msk.f32.gmra.mrb[88].mxu0 %vm411_vm3, %v3415_v53 }
0x1b64   :  { %4757 = vmatprep.mubr.msk.f32.mxu0 %vm5144_vm0, %v5145_v1  ;;  %v4114_v55 = vld [vmem:[%s3966_s16] ss:$0 sm:$0xff] }
0x1bf7   :  { %v3670_v60 = vpop.f32.mrb[84].mxu1 }
0x1bf8   :  { %v3671_v63 = vadd.f32 %v5995_v19, %v3670_v60  ;;  %v4734_v2 = vpop.f32.mrb[85].mxu1 }
0x1bfa   :  { %v3684_v4 = vmax.f32 %v3671_v63, 0.0 }
0x1bfc   :  { %4758 = vmatmul.mubr.msk.f32.vlgmr.msra.gmra.mrb[90].mxu0 %vm1929_vm9, %v3684_v4 }
0x1bfd   :  { %4760 = vmatprep.mubr.msk.f32.mxu0 %vm5144_vm0, %v5145_v1 }
0x1c32   :  { %v3500_v58 = vpop.f32.mrb[86].mxu0 }
0x1c33   :  { %v3510_v5 = vadd.f32 %v3500_v58, %v5905_v52  ;;  %v4720_v6 = vpop.f32.mrb[87].mxu0 }
0x1c35   :  { %v3520_v61 = vadd.f32 %v5936_v7, %v3510_v5 }
0x1c36   :  { %v3505_v8 = vpop.f32.mrb[88].mxu0 }
0x1c37   :  { %v3511_v9 = vadd.f32 %v3505_v8, %v5913_v56  ;;  %v4723_v33 = vpop.f32.mrb[89].mxu0  ;;  %v3523_v12 = vadd.f32 %v3520_v61, %v5655_v13 }
0x1c39   :  { %v3521_v16 = vadd.f32 %v5936_v7, %v3511_v9  ;;  %v3528_v14 = vsel %vm312_vm2, %v3523_v12, 0.0  ;;  %v4109_v7 = vld [vmem:[%s3964_s1] ss:$0 sm:$0xff] }
0x1c3a   :  { %3529 = vadd.xlane.f32.xlu1 %v3528_v14  ;;  %v3849_v14 = vld [vmem:[%s3969_s28 + $0x8] sm:$0xff] }
0x1c3b   :  { %v3524_v15 = vadd.f32 %v3521_v16, %v5661_v40 }
0x1c3d   :  { %v3531_v17 = vsel %vm1756_vm8, %v3524_v15, 0.0 }
0x1c3e   :  { %3532 = vadd.xlane.f32.xlu0 %v3531_v17  ;;  %v3851_v17 = vld [vmem:[%s3969_s28 + $0x18] sm:$0xff] }
0x1cc7   :  { %v3530_v52 = vpop.xlane.xlu1 %3529 }
0x1cc8   :  { %v3535_v56 = vmul.f32 0.03125, %v3530_v52 }
0x1cca   :  { %v3538_v22 = vsub.f32 %v3523_v12, %v3535_v56  ;;  %v74_v56 = vstv %s3970_s5 }
0x1ccb   :  { %v3533_v18 = vpop.xlane.xlu0 %3532  ;;  %75 = vst [vmem:[#allocation2] sm:$0x1] %v74_v56 }
0x1ccc   :  { %v3536_v13 = vmul.f32 0.03125, %v3533_v18  ;;  %v3541_v46 = vmul.f32 %v3538_v22, %v3538_v22 }
0x1cce   :  { %v3546_v21 = vsel %vm312_vm2, %v3541_v46, 0.0  ;;  %v3539_v40 = vsub.f32 %v3524_v15, %v3536_v13 }
0x1ccf   :  { %3547 = vadd.xlane.f32.xlu0 %v3546_v21  ;;  %v3777_v23 = vpop.f32.mrb[90].mxu0 }
0x1cd0   :  { %v3778_v28 = vadd.f32 %v4109_v7, %v3777_v23  ;;  %v4759_v10 = vpop.f32.mrb[91].mxu0  ;;  %v3542_v26 = vmul.f32 %v3539_v40, %v3539_v40 }
0x1cd1   :  { %v4116_v10 = vld [vmem:[%s3968_s22] ss:$0 sm:$0xff] }
0x1cd2   :  { %v3789_v31 = vadd.f32 %v3778_v28, %v3581_v47  ;;  %v3549_v51 = vsel %vm1756_vm8, %v3542_v26, 0.0  ;;  %v4117_v26 = vld [vmem:[#allocation2] ss:$0 sm:$0xff] }
0x1cd4   :  { %v3790_v25 = vsel %vm312_vm2, %v3789_v31, 0.0 }
0x1cd5   :  { %3791 = vadd.xlane.f32.xlu1 %v3790_v25 }
0x1cd9   :  { %3550 = vadd.xlane.f32.xlu1 %v3549_v51 }
0x1d5c   :  { %v3548_v27 = vpop.xlane.xlu0 %3547 }
0x1d5d   :  { %v3553_v29 = vmul.f32 0.03125, %v3548_v27 }
0x1d5f   :  { %v3556_v41 = vadd.f32 1e-05, %v3553_v29 }
0x1d61   :  { %5131 = vrsqrt.f32 %v3556_v41 }
0x1d62   :  { %v3792_v30 = vpop.xlane.xlu1 %3791 }
0x1d63   :  { %v3793_v20 = vmul.f32 0.03125, %v3792_v30 }
0x1d65   :  { %v3794_v32 = vsub.f32 %v3789_v31, %v3793_v20 }
0x1d66   :  { %v3551_v34 = vpop.xlane.xlu1 %3550 }
0x1d67   :  { %v3554_v36 = vmul.f32 0.03125, %v3551_v34  ;;  %v3795_v62 = vmul.f32 %v3794_v32, %v3794_v32 }
0x1d69   :  { %v3557_v37 = vadd.f32 1e-05, %v3554_v36  ;;  %v3796_v54 = vsel %vm312_vm2, %v3795_v62, 0.0 }
0x1d6a   :  { %3797 = vadd.xlane.f32.xlu0 %v3796_v54 }
0x1d6b   :  { %v5132_v3 = vpop.eup %5131  ;;  %5133 = vrsqrt.f32 %v3557_v37 }
0x1d6c   :  { %v3562_v38 = vmul.f32 %v5132_v3, %v3538_v22 }
0x1d6e   :  { %v3572_v24 = vmul.f32 %v5975_v42, %v3562_v38 }
0x1d70   :  { %v3582_v39 = vadd.f32 %v5977_v44, %v3572_v24 }
0x1d72   :  { %4736 = vmatmul.mubr.msk.f32.gmra.mrb[86].mxu1 %vm312_vm2, %v3582_v39 }
0x1d73   :  { %4738 = vmatprep.mubr.msk.f32.mxu1 %vm5144_vm0, %v5145_v1 }
0x1d75   :  { %v5134_v11 = vpop.eup %5133 }
0x1d76   :  { %v3563_v35 = vmul.f32 %v5134_v11, %v3539_v40  ;;  %v4115_v40 = vld [vmem:[%s3967_s14] ss:$0 sm:$0xff] }
0x1d78   :  { %v3573_v43 = vmul.f32 %v5975_v42, %v3563_v35 }
0x1d7a   :  { %v3583_v45 = vadd.f32 %v5977_v44, %v3573_v43  ;;  %v4113_v44 = vld [vmem:[%s3965_s8] ss:$0 sm:$0xff] }
0x1d7c   :  { %4739 = vmatmul.mubr.msk.f32.gmra.mrb[88].mxu1 %vm312_vm2, %v3583_v45 }
0x1d7d   :  { %4774 = vmatprep.mubr.msk.f32.mxu1 %vm5144_vm0, %v5145_v1 }
0x1df7   :  { %v3798_v47 = vpop.xlane.xlu0 %3797 }
0x1df8   :  { %v3799_v49 = vmul.f32 0.03125, %v3798_v47 }
0x1dfa   :  { %v3800_v50 = vadd.f32 1e-05, %v3799_v49 }
0x1dfc   :  { %5135 = vrsqrt.f32 %v3800_v50 }
0x1e06   :  { %v5136_v42 = vpop.eup %5135 }
0x1e07   :  { %v3802_v53 = vmul.f32 %v5136_v42, %v3794_v32 }
0x1e09   :  { %v3810_v57 = vmul.f32 %v4113_v44, %v3802_v53 }
0x1e0b   :  { %v3818_v59 = vadd.f32 %v4114_v55, %v3810_v57 }
0x1e0d   :  { %v3819_v48 = vsel %vm312_vm2, %v3818_v59, 0.0 }
0x1e0e   :  { %3820 = vadd.xlane.f32.xlu1 %v3819_v48 }
0x1e45   :  { %v3675_v60 = vpop.f32.mrb[86].mxu1 }
0x1e46   :  { %v3676_v63 = vadd.f32 %v5995_v19, %v3675_v60  ;;  %v4737_v2 = vpop.f32.mrb[87].mxu1 }
0x1e48   :  { %v3685_v4 = vmax.f32 %v3676_v63, 0.0 }
0x1e4a   :  { %4761 = vmatmul.mubr.msk.f32.gmra.mrb[92].mxu0 %vm1929_vm9, %v3685_v4 }
0x1e4b   :  { %4763 = vmatprep.mubr.msk.f32.mxu0 %vm5144_vm0, %v5145_v1  ;;  %v3848_v1 = vld [vmem:[%s3969_s28] sm:$0xff] }
0x1e4c   :  { %v4885_v15 = vpack.c.bf16 %v3849_v14, %v3848_v1 }
0x1e4e   :  { %4886 = vmatpush3.bf16.msra.mxu1 %v4885_v15 }
0x1e4f   :  { %v3680_v58 = vpop.f32.mrb[88].mxu1  ;;  %4887 = vmatprep.subr.bf16.mxu1 %v5142_v0 }
0x1e50   :  { %v3681_v5 = vadd.f32 %v5995_v19, %v3680_v58  ;;  %v4740_v6 = vpop.f32.mrb[89].mxu1  ;;  %v3850_v19 = vld [vmem:[%s3969_s28 + $0x10] sm:$0xff] }
0x1e51   :  { %v4888_v52 = vpack.c.bf16 %v3851_v17, %v3850_v19 }
0x1e52   :  { %v3686_v61 = vmax.f32 %v3681_v5, 0.0 }
0x1e53   :  { %4889 = vmatpush3.bf16.msra.mxu1 %v4888_v52 }
0x1e54   :  { %4764 = vmatmul.mubr.msk.f32.gmra.mrb[94].mxu0 %vm1929_vm9, %v3686_v61 }
0x1e9b   :  { %v3821_v8 = vpop.xlane.xlu1 %3820 }
0x1e9c   :  { %v3822_v9 = vmul.f32 0.03125, %v3821_v8 }
0x1e9e   :  { %v3823_v33 = vsub.f32 %v3818_v59, %v3822_v9 }
0x1ea0   :  { %v3824_v12 = vmul.f32 %v3823_v33, %v3823_v33 }
0x1ea2   :  { %v3825_v16 = vsel %vm312_vm2, %v3824_v12, 0.0 }
0x1ea3   :  { %3826 = vadd.xlane.f32.xlu0 %v3825_v16 }
0x1f1d   :  { %v3782_v22 = vpop.f32.mrb[92].mxu0 }
0x1f1e   :  { %v4762_v18 = vpop.f32.mrb[93].mxu0 }
0x1f27   :  { %v3786_v13 = vpop.f32.mrb[94].mxu0 }
0x1f28   :  { %v4765_v46 = vpop.f32.mrb[95].mxu0 }
0x1f30   :  { %v3827_v7 = vpop.xlane.xlu0 %3826 }
0x1f31   :  { %v3828_v21 = vmul.f32 0.03125, %v3827_v7 }
0x1f33   :  { %v3829_v23 = vadd.f32 1e-05, %v3828_v21 }
0x1f35   :  { %5137 = vrsqrt.f32 %v3829_v23 }
0x1f3f   :  { %v5138_v0 = vpop.eup %5137 }
0x1f40   :  { %v3831_v28 = vmul.f32 %v5138_v0, %v3823_v33 }
0x1f42   :  { %v3839_v31 = vmul.f32 %v4115_v40, %v3831_v28 }
0x1f44   :  { %v3847_v25 = vadd.f32 %v4116_v10, %v3839_v31 }
0x1f46   :  { %4775 = vmatmul.mubr.msk.f32.vlgmr.msra.gmra.mrb[90].mxu1 %vm312_vm2, %v3847_v25 }
0x2019   :  { %v3928_v51 = vpop.f32.mrb[90].mxu1 }
0x201a   :  { %v3929_v27 = vadd.f32 %v4117_v26, %v3928_v51  ;;  %v4776_v29 = vpop.f32.mrb[91].mxu1 }
0x201c   :  { %3933 = vst.msk [vmem:[%s3971_s26] sm:$0x3] %vm3932_vm10, %v3929_v27 }

</bundles_post_ra>
